<compile_context>
chip_gen: v7x
topology: tpu7x:2x2x1
jax: 0.10.0
libtpu: 0.0.40
codegen_flags: <defaults>
</compile_context>

<pallas_src>
import functools
from math import log2

import numpy as np
import jax
import jax.numpy as jnp
from jax.experimental import pallas as pl
from jax.experimental.pallas import tpu as pltpu


# ----------------------------------------------------------------------------
# Fused Pallas kernel
# ----------------------------------------------------------------------------

def _stage_matmul(x, s_ref, w_ref, b_ref, relu):
    """y = act( sum_t S[t] @ x @ W[t] + b );  bf16 x bf16 matmuls, f32 accumulation."""
    xb = x.astype(jnp.bfloat16)
    acc = None
    for t in range(s_ref.shape[0]):                    # static tap count (<= 4)
        rows = jnp.dot(s_ref[t], xb, preferred_element_type=jnp.float32)
        part = jnp.dot(rows.astype(jnp.bfloat16), w_ref[t],
                       preferred_element_type=jnp.float32)
        acc = part if acc is None else acc + part
    if b_ref is not None:
        acc = acc + b_ref[...]
    if relu:
        acc = jnp.maximum(acc, 0.0)
    return acc


def _fused_vae_kernel(*refs, plan, tau):
    """refs = (img2d, mean_row, inv_std_row, gumbel, *stage_consts, recon_out, logits_out)."""
    recon_ref, logits_ref = refs[-2], refs[-1]
    img_ref, mean_ref, inv_std_ref, gumbel_ref = refs[:4]
    params = refs[4:-2]

    # in-kernel input normalization (folded into the fused kernel; stays in f32 on the VPU)
    x = (img_ref[...] - mean_ref[...]) * inv_std_ref[...]

    idx = 0
    for step in plan:
        kind = step[0]
        if kind == "conv":                             # conv / conv-transpose / 1x1-head stage
            relu = step[1]
            s_ref, w_ref, b_ref = params[idx], params[idx + 1], params[idx + 2]
            idx += 3
            x = _stage_matmul(x, s_ref, w_ref, b_ref, relu)
        elif kind == "gumbel":                         # gumbel-softmax + codebook lookup
            s_ref, w_ref = params[idx], params[idx + 1]
            idx += 2
            logits_ref[...] = x                        # encoder logits, (B*h*w, num_tokens)
            y = (x + gumbel_ref[...]) * (1.0 / tau)
            y = y - jnp.max(y, axis=-1, keepdims=True)
            p = jnp.exp(y)
            p = p * pl.reciprocal(jnp.sum(p, axis=-1, keepdims=True), approx=True)
            x = _stage_matmul(p, s_ref, w_ref, None, False)
        else:                                          # "dense": X @ W + b (decoder 1x1 head)
            relu = step[1]
            w_ref, b_ref = params[idx], params[idx + 1]
            idx += 2
            x = jnp.dot(x.astype(jnp.bfloat16), w_ref[...],
                        preferred_element_type=jnp.float32) + b_ref[...]
            if relu:
                x = jnp.maximum(x, 0.0)
    recon_ref[...] = x.astype(recon_ref.dtype)


# ----------------------------------------------------------------------------
# Constant (structured) matrix builders -- run once at init time, plain numpy.
# Activation layout everywhere: rows = (b, h), cols = (w, c) with c minor.
# ----------------------------------------------------------------------------

def _build_conv_stage(weight, bias, batch, h_in, w_in, stride, pad, transposed):
    """Fold a Conv2d / ConvTranspose2d (PyTorch weight layout) into per-kh (S, W, bias)."""
    weight = np.asarray(weight, np.float32)
    bias = np.asarray(bias, np.float32)
    if transposed:                                     # ConvTranspose2d: (Cin, Cout, KH, KW)
        c_in, c_out, kh_sz, kw_sz = weight.shape
        h_out = (h_in - 1) * stride - 2 * pad + kh_sz
        w_out = (w_in - 1) * stride - 2 * pad + kw_sz
    else:                                              # Conv2d: (Cout, Cin, KH, KW)
        c_out, c_in, kh_sz, kw_sz = weight.shape
        h_out = (h_in + 2 * pad - kh_sz) // stride + 1
        w_out = (w_in + 2 * pad - kw_sz) // stride + 1

    def src(o, k, size_in):
        """input coordinate feeding output coordinate o via tap k (None -> zero padding)."""
        if transposed:
            num = o + pad - k
            if num % stride:
                return None
            i = num // stride
        else:
            i = stride * o + k - pad
        return i if 0 <= i < size_in else None

    s_mats = np.zeros((kh_sz, batch * h_out, batch * h_in), np.float32)
    w_mats = np.zeros((kh_sz, w_in * c_in, w_out * c_out), np.float32)
    for kh in range(kh_sz):
        for oh in range(h_out):
            ih = src(oh, kh, h_in)
            if ih is None:
                continue
            for b in range(batch):
                s_mats[kh, b * h_out + oh, b * h_in + ih] = 1.0
        for kw in range(kw_sz):
            blk = weight[:, :, kh, kw]
            blk = blk if transposed else blk.T         # -> (Cin, Cout)
            for ow in range(w_out):
                iw = src(ow, kw, w_in)
                if iw is None:
                    continue
                w_mats[kh, iw * c_in:(iw + 1) * c_in,
                       ow * c_out:(ow + 1) * c_out] += blk
    bias_row = np.tile(bias, w_out)[None, :]           # cols are (ow, cout), cout minor
    return s_mats, w_mats, bias_row, h_out, w_out, c_out


def _build_pixel_head_stage(weight, bias, batch, h_sp, w_sp):
    """Encoder 1x1 conv that also re-lays rows from (b,h)x(w,c) to per-pixel (b,h,w)xN."""
    weight = np.asarray(weight, np.float32)            # (N, Cin, 1, 1)
    bias = np.asarray(bias, np.float32)
    n_out, c_in = weight.shape[0], weight.shape[1]
    wmat = weight[:, :, 0, 0].T                        # (Cin, N)
    s_mats = np.zeros((w_sp, batch * h_sp * w_sp, batch * h_sp), np.float32)
    w_mats = np.zeros((w_sp, w_sp * c_in, n_out), np.float32)
    for w in range(w_sp):
        for r in range(batch * h_sp):
            s_mats[w, r * w_sp + w, r] = 1.0
        w_mats[w, w * c_in:(w + 1) * c_in, :] = wmat
    return s_mats, w_mats, bias[None, :]


def _build_codebook_stage(codebook, batch, h_sp, w_sp):
    """softmax probs (per-pixel rows) -> codebook embedding in (B*h, w*D) layout."""
    codebook = np.asarray(codebook, np.float32)        # (N, D)
    n_tok, d = codebook.shape
    s_mats = np.zeros((w_sp, batch * h_sp, batch * h_sp * w_sp), np.float32)
    w_mats = np.zeros((w_sp, n_tok, w_sp * d), np.float32)
    for w in range(w_sp):
        for r in range(batch * h_sp):
            s_mats[w, r, r * w_sp + w] = 1.0
        w_mats[w, :, w * d:(w + 1) * d] = codebook
    return s_mats, w_mats


def _build_final_head(weight, bias, w_sp, min_cols=128):
    """Decoder 1x1 conv as one dense matmul; output padded to a >=128-wide lane-dense slab."""
    weight = np.asarray(weight, np.float32)            # (Cout, Cin, 1, 1)
    bias = np.asarray(bias, np.float32)
    c_out, c_in = weight.shape[0], weight.shape[1]
    n_cols = w_sp * c_out
    n_cols_pad = max(n_cols, min_cols)
    wmat = np.zeros((w_sp * c_in, n_cols_pad), np.float32)
    bias_row = np.zeros((1, n_cols_pad), np.float32)
    blk = weight[:, :, 0, 0].T                         # (Cin, Cout)
    for w in range(w_sp):
        wmat[w * c_in:(w + 1) * c_in, w * c_out:(w + 1) * c_out] = blk
        bias_row[0, w * c_out:(w + 1) * c_out] = bias
    return wmat, bias_row, n_cols


# ----------------------------------------------------------------------------
# DiscreteVAE (num_resnet_blocks = 0, straight_through = False)
# ----------------------------------------------------------------------------

class DiscreteVAEPallas:
    def __init__(self, key, image_size=16, num_tokens=32, codebook_dim=32,
                 num_layers=2, hidden_dim=16, channels=3, temperature=0.9,
                 normalization=((0.5,) * 3, (0.5,) * 3)):
        assert log2(image_size).is_integer(), "image size must be a power of 2"
        assert num_layers >= 1
        self.image_size = image_size
        self.channels = channels
        self.num_tokens = num_tokens
        self.codebook_dim = codebook_dim
        self.num_layers = num_layers
        self.temperature = temperature
        self.normalization = normalization
        self._plan_cache = {}

        keys = iter(jax.random.split(key, 4 * num_layers + 8))

        def init(k, shape, fan_in):
            bound = 1.0 / np.sqrt(fan_in)
            return np.asarray(jax.random.uniform(k, shape, jnp.float32, -bound, bound))

        # codebook: nn.Embedding(num_tokens, codebook_dim) -> N(0, 1)
        self.codebook = np.asarray(
            jax.random.normal(next(keys), (num_tokens, codebook_dim), jnp.float32))

        enc_chans = [channels] + [hidden_dim] * num_layers
        dec_chans = [codebook_dim] + [hidden_dim] * num_layers

        # encoder: [Conv2d(4, s2, p1) + ReLU] * num_layers, then Conv2d 1x1 -> num_tokens
        self.enc_convs = []
        for cin, cout in zip(enc_chans[:-1], enc_chans[1:]):
            fan = cin * 16                                           # Cin*KH*KW
            self.enc_convs.append((init(next(keys), (cout, cin, 4, 4), fan),
                                   init(next(keys), (cout,), fan)))
        fan = enc_chans[-1]
        self.enc_head_w = init(next(keys), (num_tokens, enc_chans[-1], 1, 1), fan)
        self.enc_head_b = init(next(keys), (num_tokens,), fan)

        # decoder: [ConvTranspose2d(4, s2, p1) + ReLU] * num_layers, then Conv2d 1x1 -> channels
        self.dec_convs = []
        for cin, cout in zip(dec_chans[:-1], dec_chans[1:]):
            fan = cout * 16                                          # PyTorch ConvT fan_in = Cout*KH*KW
            self.dec_convs.append((init(next(keys), (cin, cout, 4, 4), fan),
                                   init(next(keys), (cout,), fan)))
        fan = dec_chans[-1]
        self.dec_head_w = init(next(keys), (channels, dec_chans[-1], 1, 1), fan)
        self.dec_head_b = init(next(keys), (channels,), fan)

    # ---- constant-building (cached per batch size) --------------------------------

    def _get_plan(self, batch):
        if batch in self._plan_cache:
            return self._plan_cache[batch]

        def bf16(a):
            return jnp.asarray(a, jnp.bfloat16)

        plan, consts = [], []

        if self.normalization is not None:
            mean = np.asarray(self.normalization[0], np.float32)
            std = np.asarray(self.normalization[1], np.float32)
        else:
            mean = np.zeros((self.channels,), np.float32)
            std = np.ones((self.channels,), np.float32)
        mean_row = jnp.asarray(np.tile(mean, self.image_size)[None, :], jnp.float32)
        inv_std_row = jnp.asarray(np.tile(1.0 / std, self.image_size)[None, :], jnp.float32)

        h = w = self.image_size
        # encoder strided convs
        for wgt, b in self.enc_convs:
            s_m, w_m, b_row, h, w, _ = _build_conv_stage(wgt, b, batch, h, w, 2, 1, False)
            plan.append(("conv", True))
            consts += [bf16(s_m), bf16(w_m), jnp.asarray(b_row, jnp.float32)]
        # encoder 1x1 head -> per-pixel logits rows
        s_m, w_m, b_row = _build_pixel_head_stage(self.enc_head_w, self.enc_head_b, batch, h, w)
        plan.append(("conv", False))
        consts += [bf16(s_m), bf16(w_m), jnp.asarray(b_row, jnp.float32)]
        # gumbel-softmax + codebook lookup, back to the (B*h, w*D) layout
        s_m, w_m = _build_codebook_stage(self.codebook, batch, h, w)
        plan.append(("gumbel",))
        consts += [bf16(s_m), bf16(w_m)]
        # decoder transposed convs (no zero-dilated input; transpose folded into constants)
        for wgt, b in self.dec_convs:
            s_m, w_m, b_row, h, w, _ = _build_conv_stage(wgt, b, batch, h, w, 2, 1, True)
            plan.append(("conv", True))
            consts += [bf16(s_m), bf16(w_m), jnp.asarray(b_row, jnp.float32)]
        # decoder 1x1 head -> channels (output written through a 128-wide slab)
        w_m, b_row, n_cols = _build_final_head(self.dec_head_w, self.dec_head_b, w)
        plan.append(("dense", False))
        consts += [bf16(w_m), jnp.asarray(b_row, jnp.float32)]

        meta = dict(mean_row=mean_row, inv_std_row=inv_std_row,
                    out_cols=n_cols, out_cols_padded=int(w_m.shape[1]))
        entry = (tuple(plan), consts, meta)
        self._plan_cache[batch] = entry
        return entry

    # ---- forward -------------------------------------------------------------------

    def forward(self, img, noise_key=None, temp=None, return_logits=False):
        batch, chans, height, width = img.shape
        assert height == self.image_size and width == self.image_size, \
            f"input must have the correct image size {self.image_size}"
        assert chans == self.channels
        tau = float(self.temperature if temp is None else temp)
        plan, consts, meta = self._get_plan(batch)

        hq = wq = self.image_size // (2 ** self.num_layers)
        n_pix = batch * hq * wq

        # NCHW -> lane-dense (B*H, W*C) channels-last matrix (one-off API layout glue).
        img2d = jnp.transpose(img, (0, 2, 3, 1)).reshape(
            batch * height, width * chans).astype(jnp.float32)

        # TODO(synk): torch's F.gumbel_softmax draws noise from the torch RNG; here we draw
        #             an identically-distributed Gumbel sample from a JAX PRNG key.
        if noise_key is None:
            gumbel = jnp.zeros((n_pix, self.num_tokens), jnp.float32)
        else:
            gumbel = jax.random.gumbel(noise_key, (n_pix, self.num_tokens), jnp.float32)

        inputs = [img2d, meta["mean_row"], meta["inv_std_row"], gumbel] + list(consts)

        out_shapes = (
            jax.ShapeDtypeStruct((batch * height, meta["out_cols_padded"]), jnp.float32),
            jax.ShapeDtypeStruct((n_pix, self.num_tokens), jnp.float32),
        )

        def full_spec(arr):
            ndim = arr.ndim
            return pl.BlockSpec(arr.shape, lambda i, _n=ndim: (0,) * _n)

        kernel = functools.partial(_fused_vae_kernel, plan=plan, tau=tau)
        recon2d, logits2d = pl.pallas_call(
            kernel,
            out_shape=out_shapes,
            grid=(1,),
            in_specs=[full_spec(a) for a in inputs],
            out_specs=(
                pl.BlockSpec(out_shapes[0].shape, lambda i: (0, 0)),
                pl.BlockSpec(out_shapes[1].shape, lambda i: (0, 0)),
            ),
            compiler_params=pltpu.CompilerParams(dimension_semantics=("arbitrary",)),
        )(*inputs)

        if return_logits:
            # (B*h*w, N) -> (B, N, h, w), matching the PyTorch encoder output layout.
            return logits2d.reshape(batch, hq, wq, self.num_tokens).transpose(0, 3, 1, 2)

        recon = recon2d[:, :meta["out_cols"]].reshape(
            batch, height, width, chans).transpose(0, 3, 1, 2)
        return recon


# ----------------------------------------------------------------------------
# Pure-JAX f32 reference of the same forward pass (validation only, not Pallas)
# ----------------------------------------------------------------------------

def _ref_conv2d_nhwc(x, weight, bias, stride, pad):
    weight = jnp.asarray(weight, jnp.float32)          # (Cout, Cin, KH, KW)
    bias = jnp.asarray(bias, jnp.float32)
    b, h, w, _ = x.shape
    c_out, _, kh_sz, kw_sz = weight.shape
    xp = jnp.pad(x, ((0, 0), (pad, pad), (pad, pad), (0, 0)))
    oh = (h + 2 * pad - kh_sz) // stride + 1
    ow = (w + 2 * pad - kw_sz) // stride + 1
    out = jnp.broadcast_to(bias, (b, oh, ow, c_out)).astype(jnp.float32)
    for kh in range(kh_sz):
        for kw in range(kw_sz):
            patch = xp[:, kh:kh + stride * oh:stride, kw:kw + stride * ow:stride, :]
            out = out + jnp.einsum("bhwc,oc->bhwo", patch, weight[:, :, kh, kw])
    return out


def _ref_conv_transpose2d_nhwc(x, weight, bias, stride, pad):
    weight = jnp.asarray(weight, jnp.float32)          # (Cin, Cout, KH, KW)
    b, h, w, c_in = x.shape
    kh_sz = weight.shape[2]
    xd = jnp.zeros((b, (h - 1) * stride + 1, (w - 1) * stride + 1, c_in), x.dtype)
    xd = xd.at[:, ::stride, ::stride, :].set(x)
    w_conv = jnp.flip(weight, axis=(2, 3)).transpose(1, 0, 2, 3)
    return _ref_conv2d_nhwc(xd, w_conv, bias, 1, kh_sz - 1 - pad)


def _reference_forward(vae, img_nchw, gumbel_pix, tau):
    x = jnp.transpose(img_nchw, (0, 2, 3, 1)).astype(jnp.float32)
    if vae.normalization is not None:
        mean = jnp.asarray(vae.normalization[0], jnp.float32)
        std = jnp.asarray(vae.normalization[1], jnp.float32)
        x = (x - mean) / std
    for wgt, b in vae.enc_convs:
        x = jnp.maximum(_ref_conv2d_nhwc(x, wgt, b, 2, 1), 0.0)
    x = _ref_conv2d_nhwc(x, vae.enc_head_w, vae.enc_head_b, 1, 0)   # (B, h, w, N)
    bsz, hq, wq, n_tok = x.shape
    logits = x.reshape(bsz * hq * wq, n_tok)
    probs = jax.nn.softmax((logits + gumbel_pix) / tau, axis=-1)
    x = (probs @ jnp.asarray(vae.codebook, jnp.float32)).reshape(bsz, hq, wq, -1)
    for wgt, b in vae.dec_convs:
        x = jnp.maximum(_ref_conv_transpose2d_nhwc(x, wgt, b, 2, 1), 0.0)
    x = _ref_conv2d_nhwc(x, vae.dec_head_w, vae.dec_head_b, 1, 0)
    return jnp.transpose(x, (0, 3, 1, 2))


# ----------------------------------------------------------------------------
# main
# ----------------------------------------------------------------------------

if __name__ == "__main__":
    root = jax.random.PRNGKey(0)
    k_img, k_params, k_noise = jax.random.split(root, 3)

    B, C, S = 2, 3, 16
    img = jax.random.uniform(k_img, (B, C, S, S), jnp.float32)      # images in [0, 1], NCHW

    vae = DiscreteVAEPallas(k_params, image_size=S, num_tokens=32, codebook_dim=32,
                            num_layers=2, hidden_dim=16, channels=C, temperature=0.9)

    out = vae.forward(img, noise_key=k_noise)
    out = jax.block_until_ready(out)
    assert out.shape == (B, C, S, S), out.shape
    assert bool(jnp.all(jnp.isfinite(out)))

    # validate the fused bf16 kernel against a pure-JAX f32 reference (same gumbel noise)
    gq = S // (2 ** vae.num_layers)
    gumbel = jax.random.gumbel(k_noise, (B * gq * gq, vae.num_tokens), jnp.float32)
    ref = _reference_forward(vae, img, gumbel, vae.temperature)
    max_abs_err = float(jnp.max(jnp.abs(out - ref)))
    assert max_abs_err < 0.1, max_abs_err

    print("KERNEL_OK")
</pallas_src>

<mosaic_0001>
module attributes {stable_mosaic.version = 11 : i64} {
  func.func @_fused_vae_kernel(%arg0: i32, %arg1: memref<32x48xf32, #tpu.memory_space<vmem>>, %arg2: memref<1x48xf32, #tpu.memory_space<vmem>>, %arg3: memref<1x48xf32, #tpu.memory_space<vmem>>, %arg4: memref<32x32xf32, #tpu.memory_space<vmem>>, %arg5: memref<4x16x32xbf16, #tpu.memory_space<vmem>>, %arg6: memref<4x48x128xbf16, #tpu.memory_space<vmem>>, %arg7: memref<1x128xf32, #tpu.memory_space<vmem>>, %arg8: memref<4x8x16xbf16, #tpu.memory_space<vmem>>, %arg9: memref<4x128x64xbf16, #tpu.memory_space<vmem>>, %arg10: memref<1x64xf32, #tpu.memory_space<vmem>>, %arg11: memref<4x32x8xbf16, #tpu.memory_space<vmem>>, %arg12: memref<4x64x32xbf16, #tpu.memory_space<vmem>>, %arg13: memref<1x32xf32, #tpu.memory_space<vmem>>, %arg14: memref<4x8x32xbf16, #tpu.memory_space<vmem>>, %arg15: memref<4x32x128xbf16, #tpu.memory_space<vmem>>, %arg16: memref<4x16x8xbf16, #tpu.memory_space<vmem>>, %arg17: memref<4x128x128xbf16, #tpu.memory_space<vmem>>, %arg18: memref<1x128xf32, #tpu.memory_space<vmem>>, %arg19: memref<4x32x16xbf16, #tpu.memory_space<vmem>>, %arg20: memref<4x128x256xbf16, #tpu.memory_space<vmem>>, %arg21: memref<1x256xf32, #tpu.memory_space<vmem>>, %arg22: memref<256x128xbf16, #tpu.memory_space<vmem>>, %arg23: memref<1x128xf32, #tpu.memory_space<vmem>>, %arg24: memref<32x128xf32, #tpu.memory_space<vmem>>, %arg25: memref<32x32xf32, #tpu.memory_space<vmem>>) attributes {dimension_semantics = [#tpu.dimension_semantics<arbitrary>], iteration_bounds = array<i64: 1>, scalar_prefetch = 0 : i64, scratch_operands = 0 : i64, tpu.core_type = #tpu.core_type<tc>, window_params = [{pipeline_mode = #tpu.pipeline_mode<synchronous>, transform_indices = @transform_0, window_bounds = array<i64: 32, 48>}, {pipeline_mode = #tpu.pipeline_mode<synchronous>, transform_indices = @transform_1, window_bounds = array<i64: 1, 48>}, {pipeline_mode = #tpu.pipeline_mode<synchronous>, transform_indices = @transform_2, window_bounds = array<i64: 1, 48>}, {pipeline_mode = #tpu.pipeline_mode<synchronous>, transform_indices = @transform_3, window_bounds = array<i64: 32, 32>}, {pipeline_mode = #tpu.pipeline_mode<synchronous>, transform_indices = @transform_4, window_bounds = array<i64: 4, 16, 32>}, {pipeline_mode = #tpu.pipeline_mode<synchronous>, transform_indices = @transform_5, window_bounds = array<i64: 4, 48, 128>}, {pipeline_mode = #tpu.pipeline_mode<synchronous>, transform_indices = @transform_6, window_bounds = array<i64: 1, 128>}, {pipeline_mode = #tpu.pipeline_mode<synchronous>, transform_indices = @transform_7, window_bounds = array<i64: 4, 8, 16>}, {pipeline_mode = #tpu.pipeline_mode<synchronous>, transform_indices = @transform_8, window_bounds = array<i64: 4, 128, 64>}, {pipeline_mode = #tpu.pipeline_mode<synchronous>, transform_indices = @transform_9, window_bounds = array<i64: 1, 64>}, {pipeline_mode = #tpu.pipeline_mode<synchronous>, transform_indices = @transform_10, window_bounds = array<i64: 4, 32, 8>}, {pipeline_mode = #tpu.pipeline_mode<synchronous>, transform_indices = @transform_11, window_bounds = array<i64: 4, 64, 32>}, {pipeline_mode = #tpu.pipeline_mode<synchronous>, transform_indices = @transform_12, window_bounds = array<i64: 1, 32>}, {pipeline_mode = #tpu.pipeline_mode<synchronous>, transform_indices = @transform_13, window_bounds = array<i64: 4, 8, 32>}, {pipeline_mode = #tpu.pipeline_mode<synchronous>, transform_indices = @transform_14, window_bounds = array<i64: 4, 32, 128>}, {pipeline_mode = #tpu.pipeline_mode<synchronous>, transform_indices = @transform_15, window_bounds = array<i64: 4, 16, 8>}, {pipeline_mode = #tpu.pipeline_mode<synchronous>, transform_indices = @transform_16, window_bounds = array<i64: 4, 128, 128>}, {pipeline_mode = #tpu.pipeline_mode<synchronous>, transform_indices = @transform_17, window_bounds = array<i64: 1, 128>}, {pipeline_mode = #tpu.pipeline_mode<synchronous>, transform_indices = @transform_18, window_bounds = array<i64: 4, 32, 16>}, {pipeline_mode = #tpu.pipeline_mode<synchronous>, transform_indices = @transform_19, window_bounds = array<i64: 4, 128, 256>}, {pipeline_mode = #tpu.pipeline_mode<synchronous>, transform_indices = @transform_20, window_bounds = array<i64: 1, 256>}, {pipeline_mode = #tpu.pipeline_mode<synchronous>, transform_indices = @transform_21, window_bounds = array<i64: 256, 128>}, {pipeline_mode = #tpu.pipeline_mode<synchronous>, transform_indices = @transform_22, window_bounds = array<i64: 1, 128>}, {pipeline_mode = #tpu.pipeline_mode<synchronous>, transform_indices = @transform_23, window_bounds = array<i64: 32, 128>}, {pipeline_mode = #tpu.pipeline_mode<synchronous>, transform_indices = @transform_24, window_bounds = array<i64: 32, 32>}]} {
    %c0 = arith.constant 0 : index
    %c0_0 = arith.constant 0 : index
    %0 = vector.load %arg1[%c0, %c0_0] : memref<32x48xf32, #tpu.memory_space<vmem>>, vector<32x48xf32>
    %c0_1 = arith.constant 0 : index
    %c0_2 = arith.constant 0 : index
    %1 = vector.load %arg2[%c0_1, %c0_2] : memref<1x48xf32, #tpu.memory_space<vmem>>, vector<1x48xf32>
    %2 = vector.broadcast %1 : vector<1x48xf32> to vector<32x48xf32>
    %3 = arith.subf %0, %2 : vector<32x48xf32>
    %c0_3 = arith.constant 0 : index
    %c0_4 = arith.constant 0 : index
    %4 = vector.load %arg3[%c0_3, %c0_4] : memref<1x48xf32, #tpu.memory_space<vmem>>, vector<1x48xf32>
    %5 = vector.broadcast %4 : vector<1x48xf32> to vector<32x48xf32>
    %6 = arith.mulf %3, %5 : vector<32x48xf32>
    %7 = arith.truncf %6 : vector<32x48xf32> to vector<32x48xbf16>
    %c0_5 = arith.constant 0 : index
    %c0_6 = arith.constant 0 : index
    %c0_7 = arith.constant 0 : index
    %8 = vector.load %arg5[%c0_5, %c0_6, %c0_7] : memref<4x16x32xbf16, #tpu.memory_space<vmem>>, vector<1x16x32xbf16>
    %9 = vector.shape_cast %8 : vector<1x16x32xbf16> to vector<16x32xbf16>
    %cst = arith.constant dense<0.000000e+00> : vector<16x48xf32>
    %10 = tpu.matmul %9, %7, %cst {dimension_numbers = #tpu.dot_dimension_numbers<[1], [0], [0], [1], [0, 0, 1, 1], [], []>} : vector<16x32xbf16>, vector<32x48xbf16>, vector<16x48xf32> -> vector<16x48xf32>
    %11 = arith.truncf %10 : vector<16x48xf32> to vector<16x48xbf16>
    %c0_8 = arith.constant 0 : index
    %c0_9 = arith.constant 0 : index
    %c0_10 = arith.constant 0 : index
    %12 = vector.load %arg6[%c0_8, %c0_9, %c0_10] : memref<4x48x128xbf16, #tpu.memory_space<vmem>>, vector<1x48x128xbf16>
    %13 = vector.shape_cast %12 : vector<1x48x128xbf16> to vector<48x128xbf16>
    %cst_11 = arith.constant dense<0.000000e+00> : vector<16x128xf32>
    %14 = tpu.matmul %11, %13, %cst_11 {dimension_numbers = #tpu.dot_dimension_numbers<[1], [0], [0], [1], [0, 0, 1, 1], [], []>} : vector<16x48xbf16>, vector<48x128xbf16>, vector<16x128xf32> -> vector<16x128xf32>
    %c1 = arith.constant 1 : index
    %c0_12 = arith.constant 0 : index
    %c0_13 = arith.constant 0 : index
    %15 = vector.load %arg5[%c1, %c0_12, %c0_13] : memref<4x16x32xbf16, #tpu.memory_space<vmem>>, vector<1x16x32xbf16>
    %16 = vector.shape_cast %15 : vector<1x16x32xbf16> to vector<16x32xbf16>
    %cst_14 = arith.constant dense<0.000000e+00> : vector<16x48xf32>
    %17 = tpu.matmul %16, %7, %cst_14 {dimension_numbers = #tpu.dot_dimension_numbers<[1], [0], [0], [1], [0, 0, 1, 1], [], []>} : vector<16x32xbf16>, vector<32x48xbf16>, vector<16x48xf32> -> vector<16x48xf32>
    %18 = arith.truncf %17 : vector<16x48xf32> to vector<16x48xbf16>
    %c1_15 = arith.constant 1 : index
    %c0_16 = arith.constant 0 : index
    %c0_17 = arith.constant 0 : index
    %19 = vector.load %arg6[%c1_15, %c0_16, %c0_17] : memref<4x48x128xbf16, #tpu.memory_space<vmem>>, vector<1x48x128xbf16>
    %20 = vector.shape_cast %19 : vector<1x48x128xbf16> to vector<48x128xbf16>
    %cst_18 = arith.constant dense<0.000000e+00> : vector<16x128xf32>
    %21 = tpu.matmul %18, %20, %cst_18 {dimension_numbers = #tpu.dot_dimension_numbers<[1], [0], [0], [1], [0, 0, 1, 1], [], []>} : vector<16x48xbf16>, vector<48x128xbf16>, vector<16x128xf32> -> vector<16x128xf32>
    %22 = arith.addf %14, %21 : vector<16x128xf32>
    %c2 = arith.constant 2 : index
    %c0_19 = arith.constant 0 : index
    %c0_20 = arith.constant 0 : index
    %23 = vector.load %arg5[%c2, %c0_19, %c0_20] : memref<4x16x32xbf16, #tpu.memory_space<vmem>>, vector<1x16x32xbf16>
    %24 = vector.shape_cast %23 : vector<1x16x32xbf16> to vector<16x32xbf16>
    %cst_21 = arith.constant dense<0.000000e+00> : vector<16x48xf32>
    %25 = tpu.matmul %24, %7, %cst_21 {dimension_numbers = #tpu.dot_dimension_numbers<[1], [0], [0], [1], [0, 0, 1, 1], [], []>} : vector<16x32xbf16>, vector<32x48xbf16>, vector<16x48xf32> -> vector<16x48xf32>
    %26 = arith.truncf %25 : vector<16x48xf32> to vector<16x48xbf16>
    %c2_22 = arith.constant 2 : index
    %c0_23 = arith.constant 0 : index
    %c0_24 = arith.constant 0 : index
    %27 = vector.load %arg6[%c2_22, %c0_23, %c0_24] : memref<4x48x128xbf16, #tpu.memory_space<vmem>>, vector<1x48x128xbf16>
    %28 = vector.shape_cast %27 : vector<1x48x128xbf16> to vector<48x128xbf16>
    %cst_25 = arith.constant dense<0.000000e+00> : vector<16x128xf32>
    %29 = tpu.matmul %26, %28, %cst_25 {dimension_numbers = #tpu.dot_dimension_numbers<[1], [0], [0], [1], [0, 0, 1, 1], [], []>} : vector<16x48xbf16>, vector<48x128xbf16>, vector<16x128xf32> -> vector<16x128xf32>
    %30 = arith.addf %22, %29 : vector<16x128xf32>
    %c3 = arith.constant 3 : index
    %c0_26 = arith.constant 0 : index
    %c0_27 = arith.constant 0 : index
    %31 = vector.load %arg5[%c3, %c0_26, %c0_27] : memref<4x16x32xbf16, #tpu.memory_space<vmem>>, vector<1x16x32xbf16>
    %32 = vector.shape_cast %31 : vector<1x16x32xbf16> to vector<16x32xbf16>
    %cst_28 = arith.constant dense<0.000000e+00> : vector<16x48xf32>
    %33 = tpu.matmul %32, %7, %cst_28 {dimension_numbers = #tpu.dot_dimension_numbers<[1], [0], [0], [1], [0, 0, 1, 1], [], []>} : vector<16x32xbf16>, vector<32x48xbf16>, vector<16x48xf32> -> vector<16x48xf32>
    %34 = arith.truncf %33 : vector<16x48xf32> to vector<16x48xbf16>
    %c3_29 = arith.constant 3 : index
    %c0_30 = arith.constant 0 : index
    %c0_31 = arith.constant 0 : index
    %35 = vector.load %arg6[%c3_29, %c0_30, %c0_31] : memref<4x48x128xbf16, #tpu.memory_space<vmem>>, vector<1x48x128xbf16>
    %36 = vector.shape_cast %35 : vector<1x48x128xbf16> to vector<48x128xbf16>
    %cst_32 = arith.constant dense<0.000000e+00> : vector<16x128xf32>
    %37 = tpu.matmul %34, %36, %cst_32 {dimension_numbers = #tpu.dot_dimension_numbers<[1], [0], [0], [1], [0, 0, 1, 1], [], []>} : vector<16x48xbf16>, vector<48x128xbf16>, vector<16x128xf32> -> vector<16x128xf32>
    %38 = arith.addf %30, %37 : vector<16x128xf32>
    %c0_33 = arith.constant 0 : index
    %c0_34 = arith.constant 0 : index
    %39 = vector.load %arg7[%c0_33, %c0_34] : memref<1x128xf32, #tpu.memory_space<vmem>>, vector<1x128xf32>
    %40 = vector.broadcast %39 : vector<1x128xf32> to vector<16x128xf32>
    %41 = arith.addf %38, %40 : vector<16x128xf32>
    %cst_35 = arith.constant 0.000000e+00 : f32
    %42 = vector.broadcast %cst_35 : f32 to vector<16x128xf32>
    %43 = arith.maximumf %41, %42 : vector<16x128xf32>
    %44 = arith.truncf %43 : vector<16x128xf32> to vector<16x128xbf16>
    %c0_36 = arith.constant 0 : index
    %c0_37 = arith.constant 0 : index
    %c0_38 = arith.constant 0 : index
    %45 = vector.load %arg8[%c0_36, %c0_37, %c0_38] : memref<4x8x16xbf16, #tpu.memory_space<vmem>>, vector<1x8x16xbf16>
    %46 = vector.shape_cast %45 : vector<1x8x16xbf16> to vector<8x16xbf16>
    %cst_39 = arith.constant dense<0.000000e+00> : vector<8x128xf32>
    %47 = tpu.matmul %46, %44, %cst_39 {dimension_numbers = #tpu.dot_dimension_numbers<[1], [0], [0], [1], [0, 0, 1, 1], [], []>} : vector<8x16xbf16>, vector<16x128xbf16>, vector<8x128xf32> -> vector<8x128xf32>
    %48 = arith.truncf %47 : vector<8x128xf32> to vector<8x128xbf16>
    %c0_40 = arith.constant 0 : index
    %c0_41 = arith.constant 0 : index
    %c0_42 = arith.constant 0 : index
    %49 = vector.load %arg9[%c0_40, %c0_41, %c0_42] : memref<4x128x64xbf16, #tpu.memory_space<vmem>>, vector<1x128x64xbf16>
    %50 = vector.shape_cast %49 : vector<1x128x64xbf16> to vector<128x64xbf16>
    %cst_43 = arith.constant dense<0.000000e+00> : vector<8x64xf32>
    %51 = tpu.matmul %48, %50, %cst_43 {dimension_numbers = #tpu.dot_dimension_numbers<[1], [0], [0], [1], [0, 0, 1, 1], [], []>} : vector<8x128xbf16>, vector<128x64xbf16>, vector<8x64xf32> -> vector<8x64xf32>
    %c1_44 = arith.constant 1 : index
    %c0_45 = arith.constant 0 : index
    %c0_46 = arith.constant 0 : index
    %52 = vector.load %arg8[%c1_44, %c0_45, %c0_46] : memref<4x8x16xbf16, #tpu.memory_space<vmem>>, vector<1x8x16xbf16>
    %53 = vector.shape_cast %52 : vector<1x8x16xbf16> to vector<8x16xbf16>
    %cst_47 = arith.constant dense<0.000000e+00> : vector<8x128xf32>
    %54 = tpu.matmul %53, %44, %cst_47 {dimension_numbers = #tpu.dot_dimension_numbers<[1], [0], [0], [1], [0, 0, 1, 1], [], []>} : vector<8x16xbf16>, vector<16x128xbf16>, vector<8x128xf32> -> vector<8x128xf32>
    %55 = arith.truncf %54 : vector<8x128xf32> to vector<8x128xbf16>
    %c1_48 = arith.constant 1 : index
    %c0_49 = arith.constant 0 : index
    %c0_50 = arith.constant 0 : index
    %56 = vector.load %arg9[%c1_48, %c0_49, %c0_50] : memref<4x128x64xbf16, #tpu.memory_space<vmem>>, vector<1x128x64xbf16>
    %57 = vector.shape_cast %56 : vector<1x128x64xbf16> to vector<128x64xbf16>
    %cst_51 = arith.constant dense<0.000000e+00> : vector<8x64xf32>
    %58 = tpu.matmul %55, %57, %cst_51 {dimension_numbers = #tpu.dot_dimension_numbers<[1], [0], [0], [1], [0, 0, 1, 1], [], []>} : vector<8x128xbf16>, vector<128x64xbf16>, vector<8x64xf32> -> vector<8x64xf32>
    %59 = arith.addf %51, %58 : vector<8x64xf32>
    %c2_52 = arith.constant 2 : index
    %c0_53 = arith.constant 0 : index
    %c0_54 = arith.constant 0 : index
    %60 = vector.load %arg8[%c2_52, %c0_53, %c0_54] : memref<4x8x16xbf16, #tpu.memory_space<vmem>>, vector<1x8x16xbf16>
    %61 = vector.shape_cast %60 : vector<1x8x16xbf16> to vector<8x16xbf16>
    %cst_55 = arith.constant dense<0.000000e+00> : vector<8x128xf32>
    %62 = tpu.matmul %61, %44, %cst_55 {dimension_numbers = #tpu.dot_dimension_numbers<[1], [0], [0], [1], [0, 0, 1, 1], [], []>} : vector<8x16xbf16>, vector<16x128xbf16>, vector<8x128xf32> -> vector<8x128xf32>
    %63 = arith.truncf %62 : vector<8x128xf32> to vector<8x128xbf16>
    %c2_56 = arith.constant 2 : index
    %c0_57 = arith.constant 0 : index
    %c0_58 = arith.constant 0 : index
    %64 = vector.load %arg9[%c2_56, %c0_57, %c0_58] : memref<4x128x64xbf16, #tpu.memory_space<vmem>>, vector<1x128x64xbf16>
    %65 = vector.shape_cast %64 : vector<1x128x64xbf16> to vector<128x64xbf16>
    %cst_59 = arith.constant dense<0.000000e+00> : vector<8x64xf32>
    %66 = tpu.matmul %63, %65, %cst_59 {dimension_numbers = #tpu.dot_dimension_numbers<[1], [0], [0], [1], [0, 0, 1, 1], [], []>} : vector<8x128xbf16>, vector<128x64xbf16>, vector<8x64xf32> -> vector<8x64xf32>
    %67 = arith.addf %59, %66 : vector<8x64xf32>
    %c3_60 = arith.constant 3 : index
    %c0_61 = arith.constant 0 : index
    %c0_62 = arith.constant 0 : index
    %68 = vector.load %arg8[%c3_60, %c0_61, %c0_62] : memref<4x8x16xbf16, #tpu.memory_space<vmem>>, vector<1x8x16xbf16>
    %69 = vector.shape_cast %68 : vector<1x8x16xbf16> to vector<8x16xbf16>
    %cst_63 = arith.constant dense<0.000000e+00> : vector<8x128xf32>
    %70 = tpu.matmul %69, %44, %cst_63 {dimension_numbers = #tpu.dot_dimension_numbers<[1], [0], [0], [1], [0, 0, 1, 1], [], []>} : vector<8x16xbf16>, vector<16x128xbf16>, vector<8x128xf32> -> vector<8x128xf32>
    %71 = arith.truncf %70 : vector<8x128xf32> to vector<8x128xbf16>
    %c3_64 = arith.constant 3 : index
    %c0_65 = arith.constant 0 : index
    %c0_66 = arith.constant 0 : index
    %72 = vector.load %arg9[%c3_64, %c0_65, %c0_66] : memref<4x128x64xbf16, #tpu.memory_space<vmem>>, vector<1x128x64xbf16>
    %73 = vector.shape_cast %72 : vector<1x128x64xbf16> to vector<128x64xbf16>
    %cst_67 = arith.constant dense<0.000000e+00> : vector<8x64xf32>
    %74 = tpu.matmul %71, %73, %cst_67 {dimension_numbers = #tpu.dot_dimension_numbers<[1], [0], [0], [1], [0, 0, 1, 1], [], []>} : vector<8x128xbf16>, vector<128x64xbf16>, vector<8x64xf32> -> vector<8x64xf32>
    %75 = arith.addf %67, %74 : vector<8x64xf32>
    %c0_68 = arith.constant 0 : index
    %c0_69 = arith.constant 0 : index
    %76 = vector.load %arg10[%c0_68, %c0_69] : memref<1x64xf32, #tpu.memory_space<vmem>>, vector<1x64xf32>
    %77 = vector.broadcast %76 : vector<1x64xf32> to vector<8x64xf32>
    %78 = arith.addf %75, %77 : vector<8x64xf32>
    %cst_70 = arith.constant 0.000000e+00 : f32
    %79 = vector.broadcast %cst_70 : f32 to vector<8x64xf32>
    %80 = arith.maximumf %78, %79 : vector<8x64xf32>
    %81 = arith.truncf %80 : vector<8x64xf32> to vector<8x64xbf16>
    %c0_71 = arith.constant 0 : index
    %c0_72 = arith.constant 0 : index
    %c0_73 = arith.constant 0 : index
    %82 = vector.load %arg11[%c0_71, %c0_72, %c0_73] : memref<4x32x8xbf16, #tpu.memory_space<vmem>>, vector<1x32x8xbf16>
    %83 = vector.shape_cast %82 : vector<1x32x8xbf16> to vector<32x8xbf16>
    %cst_74 = arith.constant dense<0.000000e+00> : vector<32x64xf32>
    %84 = tpu.matmul %83, %81, %cst_74 {dimension_numbers = #tpu.dot_dimension_numbers<[1], [0], [0], [1], [0, 0, 1, 1], [], []>} : vector<32x8xbf16>, vector<8x64xbf16>, vector<32x64xf32> -> vector<32x64xf32>
    %85 = arith.truncf %84 : vector<32x64xf32> to vector<32x64xbf16>
    %c0_75 = arith.constant 0 : index
    %c0_76 = arith.constant 0 : index
    %c0_77 = arith.constant 0 : index
    %86 = vector.load %arg12[%c0_75, %c0_76, %c0_77] : memref<4x64x32xbf16, #tpu.memory_space<vmem>>, vector<1x64x32xbf16>
    %87 = vector.shape_cast %86 : vector<1x64x32xbf16> to vector<64x32xbf16>
    %cst_78 = arith.constant dense<0.000000e+00> : vector<32x32xf32>
    %88 = tpu.matmul %85, %87, %cst_78 {dimension_numbers = #tpu.dot_dimension_numbers<[1], [0], [0], [1], [0, 0, 1, 1], [], []>} : vector<32x64xbf16>, vector<64x32xbf16>, vector<32x32xf32> -> vector<32x32xf32>
    %c1_79 = arith.constant 1 : index
    %c0_80 = arith.constant 0 : index
    %c0_81 = arith.constant 0 : index
    %89 = vector.load %arg11[%c1_79, %c0_80, %c0_81] : memref<4x32x8xbf16, #tpu.memory_space<vmem>>, vector<1x32x8xbf16>
    %90 = vector.shape_cast %89 : vector<1x32x8xbf16> to vector<32x8xbf16>
    %cst_82 = arith.constant dense<0.000000e+00> : vector<32x64xf32>
    %91 = tpu.matmul %90, %81, %cst_82 {dimension_numbers = #tpu.dot_dimension_numbers<[1], [0], [0], [1], [0, 0, 1, 1], [], []>} : vector<32x8xbf16>, vector<8x64xbf16>, vector<32x64xf32> -> vector<32x64xf32>
    %92 = arith.truncf %91 : vector<32x64xf32> to vector<32x64xbf16>
    %c1_83 = arith.constant 1 : index
    %c0_84 = arith.constant 0 : index
    %c0_85 = arith.constant 0 : index
    %93 = vector.load %arg12[%c1_83, %c0_84, %c0_85] : memref<4x64x32xbf16, #tpu.memory_space<vmem>>, vector<1x64x32xbf16>
    %94 = vector.shape_cast %93 : vector<1x64x32xbf16> to vector<64x32xbf16>
    %cst_86 = arith.constant dense<0.000000e+00> : vector<32x32xf32>
    %95 = tpu.matmul %92, %94, %cst_86 {dimension_numbers = #tpu.dot_dimension_numbers<[1], [0], [0], [1], [0, 0, 1, 1], [], []>} : vector<32x64xbf16>, vector<64x32xbf16>, vector<32x32xf32> -> vector<32x32xf32>
    %96 = arith.addf %88, %95 : vector<32x32xf32>
    %c2_87 = arith.constant 2 : index
    %c0_88 = arith.constant 0 : index
    %c0_89 = arith.constant 0 : index
    %97 = vector.load %arg11[%c2_87, %c0_88, %c0_89] : memref<4x32x8xbf16, #tpu.memory_space<vmem>>, vector<1x32x8xbf16>
    %98 = vector.shape_cast %97 : vector<1x32x8xbf16> to vector<32x8xbf16>
    %cst_90 = arith.constant dense<0.000000e+00> : vector<32x64xf32>
    %99 = tpu.matmul %98, %81, %cst_90 {dimension_numbers = #tpu.dot_dimension_numbers<[1], [0], [0], [1], [0, 0, 1, 1], [], []>} : vector<32x8xbf16>, vector<8x64xbf16>, vector<32x64xf32> -> vector<32x64xf32>
    %100 = arith.truncf %99 : vector<32x64xf32> to vector<32x64xbf16>
    %c2_91 = arith.constant 2 : index
    %c0_92 = arith.constant 0 : index
    %c0_93 = arith.constant 0 : index
    %101 = vector.load %arg12[%c2_91, %c0_92, %c0_93] : memref<4x64x32xbf16, #tpu.memory_space<vmem>>, vector<1x64x32xbf16>
    %102 = vector.shape_cast %101 : vector<1x64x32xbf16> to vector<64x32xbf16>
    %cst_94 = arith.constant dense<0.000000e+00> : vector<32x32xf32>
    %103 = tpu.matmul %100, %102, %cst_94 {dimension_numbers = #tpu.dot_dimension_numbers<[1], [0], [0], [1], [0, 0, 1, 1], [], []>} : vector<32x64xbf16>, vector<64x32xbf16>, vector<32x32xf32> -> vector<32x32xf32>
    %104 = arith.addf %96, %103 : vector<32x32xf32>
    %c3_95 = arith.constant 3 : index
    %c0_96 = arith.constant 0 : index
    %c0_97 = arith.constant 0 : index
    %105 = vector.load %arg11[%c3_95, %c0_96, %c0_97] : memref<4x32x8xbf16, #tpu.memory_space<vmem>>, vector<1x32x8xbf16>
    %106 = vector.shape_cast %105 : vector<1x32x8xbf16> to vector<32x8xbf16>
    %cst_98 = arith.constant dense<0.000000e+00> : vector<32x64xf32>
    %107 = tpu.matmul %106, %81, %cst_98 {dimension_numbers = #tpu.dot_dimension_numbers<[1], [0], [0], [1], [0, 0, 1, 1], [], []>} : vector<32x8xbf16>, vector<8x64xbf16>, vector<32x64xf32> -> vector<32x64xf32>
    %108 = arith.truncf %107 : vector<32x64xf32> to vector<32x64xbf16>
    %c3_99 = arith.constant 3 : index
    %c0_100 = arith.constant 0 : index
    %c0_101 = arith.constant 0 : index
    %109 = vector.load %arg12[%c3_99, %c0_100, %c0_101] : memref<4x64x32xbf16, #tpu.memory_space<vmem>>, vector<1x64x32xbf16>
    %110 = vector.shape_cast %109 : vector<1x64x32xbf16> to vector<64x32xbf16>
    %cst_102 = arith.constant dense<0.000000e+00> : vector<32x32xf32>
    %111 = tpu.matmul %108, %110, %cst_102 {dimension_numbers = #tpu.dot_dimension_numbers<[1], [0], [0], [1], [0, 0, 1, 1], [], []>} : vector<32x64xbf16>, vector<64x32xbf16>, vector<32x32xf32> -> vector<32x32xf32>
    %112 = arith.addf %104, %111 : vector<32x32xf32>
    %c0_103 = arith.constant 0 : index
    %c0_104 = arith.constant 0 : index
    %113 = vector.load %arg13[%c0_103, %c0_104] : memref<1x32xf32, #tpu.memory_space<vmem>>, vector<1x32xf32>
    %114 = vector.broadcast %113 : vector<1x32xf32> to vector<32x32xf32>
    %115 = arith.addf %112, %114 : vector<32x32xf32>
    %c0_105 = arith.constant 0 : index
    %c0_106 = arith.constant 0 : index
    %116 = vector.load %arg25[%c0_105, %c0_106] : memref<32x32xf32, #tpu.memory_space<vmem>>, vector<32x32xf32>
    tpu.vector_store %arg25[%c0_105, %c0_106], %115 {strides = array<i32>} : memref<32x32xf32, #tpu.memory_space<vmem>>, vector<32x32xf32>,
    %c0_107 = arith.constant 0 : index
    %c0_108 = arith.constant 0 : index
    %117 = vector.load %arg4[%c0_107, %c0_108] : memref<32x32xf32, #tpu.memory_space<vmem>>, vector<32x32xf32>
    %118 = arith.addf %115, %117 : vector<32x32xf32>
    %cst_109 = arith.constant 1.11111116 : f32
    %119 = vector.broadcast %cst_109 : f32 to vector<32x32xf32>
    %120 = arith.mulf %118, %119 : vector<32x32xf32>
    %cst_110 = arith.constant dense<0xFF800000> : vector<32xf32>
    %121 = vector.multi_reduction <maximumf>, %120, %cst_110 [1] : vector<32x32xf32> to vector<32xf32>
    %122 = vector.shape_cast %121 : vector<32xf32> to vector<32x1xf32>
    %123 = vector.broadcast %122 : vector<32x1xf32> to vector<32x32xf32>
    %124 = arith.subf %120, %123 : vector<32x32xf32>
    %125 = math.exp %124 : vector<32x32xf32>
    %cst_111 = arith.constant dense<0.000000e+00> : vector<32xf32>
    %126 = vector.multi_reduction <add>, %125, %cst_111 [1] : vector<32x32xf32> to vector<32xf32>
    %127 = vector.shape_cast %126 : vector<32xf32> to vector<32x1xf32>
    %128 = tpu.reciprocal %127 {approx = true} : vector<32x1xf32> -> vector<32x1xf32>
    %129 = vector.broadcast %128 : vector<32x1xf32> to vector<32x32xf32>
    %130 = arith.mulf %125, %129 : vector<32x32xf32>
    %131 = arith.truncf %130 : vector<32x32xf32> to vector<32x32xbf16>
    %c0_112 = arith.constant 0 : index
    %c0_113 = arith.constant 0 : index
    %c0_114 = arith.constant 0 : index
    %132 = vector.load %arg14[%c0_112, %c0_113, %c0_114] : memref<4x8x32xbf16, #tpu.memory_space<vmem>>, vector<1x8x32xbf16>
    %133 = vector.shape_cast %132 : vector<1x8x32xbf16> to vector<8x32xbf16>
    %cst_115 = arith.constant dense<0.000000e+00> : vector<8x32xf32>
    %134 = tpu.matmul %133, %131, %cst_115 {dimension_numbers = #tpu.dot_dimension_numbers<[1], [0], [0], [1], [0, 0, 1, 1], [], []>} : vector<8x32xbf16>, vector<32x32xbf16>, vector<8x32xf32> -> vector<8x32xf32>
    %135 = arith.truncf %134 : vector<8x32xf32> to vector<8x32xbf16>
    %c0_116 = arith.constant 0 : index
    %c0_117 = arith.constant 0 : index
    %c0_118 = arith.constant 0 : index
    %136 = vector.load %arg15[%c0_116, %c0_117, %c0_118] : memref<4x32x128xbf16, #tpu.memory_space<vmem>>, vector<1x32x128xbf16>
    %137 = vector.shape_cast %136 : vector<1x32x128xbf16> to vector<32x128xbf16>
    %cst_119 = arith.constant dense<0.000000e+00> : vector<8x128xf32>
    %138 = tpu.matmul %135, %137, %cst_119 {dimension_numbers = #tpu.dot_dimension_numbers<[1], [0], [0], [1], [0, 0, 1, 1], [], []>} : vector<8x32xbf16>, vector<32x128xbf16>, vector<8x128xf32> -> vector<8x128xf32>
    %c1_120 = arith.constant 1 : index
    %c0_121 = arith.constant 0 : index
    %c0_122 = arith.constant 0 : index
    %139 = vector.load %arg14[%c1_120, %c0_121, %c0_122] : memref<4x8x32xbf16, #tpu.memory_space<vmem>>, vector<1x8x32xbf16>
    %140 = vector.shape_cast %139 : vector<1x8x32xbf16> to vector<8x32xbf16>
    %cst_123 = arith.constant dense<0.000000e+00> : vector<8x32xf32>
    %141 = tpu.matmul %140, %131, %cst_123 {dimension_numbers = #tpu.dot_dimension_numbers<[1], [0], [0], [1], [0, 0, 1, 1], [], []>} : vector<8x32xbf16>, vector<32x32xbf16>, vector<8x32xf32> -> vector<8x32xf32>
    %142 = arith.truncf %141 : vector<8x32xf32> to vector<8x32xbf16>
    %c1_124 = arith.constant 1 : index
    %c0_125 = arith.constant 0 : index
    %c0_126 = arith.constant 0 : index
    %143 = vector.load %arg15[%c1_124, %c0_125, %c0_126] : memref<4x32x128xbf16, #tpu.memory_space<vmem>>, vector<1x32x128xbf16>
    %144 = vector.shape_cast %143 : vector<1x32x128xbf16> to vector<32x128xbf16>
    %cst_127 = arith.constant dense<0.000000e+00> : vector<8x128xf32>
    %145 = tpu.matmul %142, %144, %cst_127 {dimension_numbers = #tpu.dot_dimension_numbers<[1], [0], [0], [1], [0, 0, 1, 1], [], []>} : vector<8x32xbf16>, vector<32x128xbf16>, vector<8x128xf32> -> vector<8x128xf32>
    %146 = arith.addf %138, %145 : vector<8x128xf32>
    %c2_128 = arith.constant 2 : index
    %c0_129 = arith.constant 0 : index
    %c0_130 = arith.constant 0 : index
    %147 = vector.load %arg14[%c2_128, %c0_129, %c0_130] : memref<4x8x32xbf16, #tpu.memory_space<vmem>>, vector<1x8x32xbf16>
    %148 = vector.shape_cast %147 : vector<1x8x32xbf16> to vector<8x32xbf16>
    %cst_131 = arith.constant dense<0.000000e+00> : vector<8x32xf32>
    %149 = tpu.matmul %148, %131, %cst_131 {dimension_numbers = #tpu.dot_dimension_numbers<[1], [0], [0], [1], [0, 0, 1, 1], [], []>} : vector<8x32xbf16>, vector<32x32xbf16>, vector<8x32xf32> -> vector<8x32xf32>
    %150 = arith.truncf %149 : vector<8x32xf32> to vector<8x32xbf16>
    %c2_132 = arith.constant 2 : index
    %c0_133 = arith.constant 0 : index
    %c0_134 = arith.constant 0 : index
    %151 = vector.load %arg15[%c2_132, %c0_133, %c0_134] : memref<4x32x128xbf16, #tpu.memory_space<vmem>>, vector<1x32x128xbf16>
    %152 = vector.shape_cast %151 : vector<1x32x128xbf16> to vector<32x128xbf16>
    %cst_135 = arith.constant dense<0.000000e+00> : vector<8x128xf32>
    %153 = tpu.matmul %150, %152, %cst_135 {dimension_numbers = #tpu.dot_dimension_numbers<[1], [0], [0], [1], [0, 0, 1, 1], [], []>} : vector<8x32xbf16>, vector<32x128xbf16>, vector<8x128xf32> -> vector<8x128xf32>
    %154 = arith.addf %146, %153 : vector<8x128xf32>
    %c3_136 = arith.constant 3 : index
    %c0_137 = arith.constant 0 : index
    %c0_138 = arith.constant 0 : index
    %155 = vector.load %arg14[%c3_136, %c0_137, %c0_138] : memref<4x8x32xbf16, #tpu.memory_space<vmem>>, vector<1x8x32xbf16>
    %156 = vector.shape_cast %155 : vector<1x8x32xbf16> to vector<8x32xbf16>
    %cst_139 = arith.constant dense<0.000000e+00> : vector<8x32xf32>
    %157 = tpu.matmul %156, %131, %cst_139 {dimension_numbers = #tpu.dot_dimension_numbers<[1], [0], [0], [1], [0, 0, 1, 1], [], []>} : vector<8x32xbf16>, vector<32x32xbf16>, vector<8x32xf32> -> vector<8x32xf32>
    %158 = arith.truncf %157 : vector<8x32xf32> to vector<8x32xbf16>
    %c3_140 = arith.constant 3 : index
    %c0_141 = arith.constant 0 : index
    %c0_142 = arith.constant 0 : index
    %159 = vector.load %arg15[%c3_140, %c0_141, %c0_142] : memref<4x32x128xbf16, #tpu.memory_space<vmem>>, vector<1x32x128xbf16>
    %160 = vector.shape_cast %159 : vector<1x32x128xbf16> to vector<32x128xbf16>
    %cst_143 = arith.constant dense<0.000000e+00> : vector<8x128xf32>
    %161 = tpu.matmul %158, %160, %cst_143 {dimension_numbers = #tpu.dot_dimension_numbers<[1], [0], [0], [1], [0, 0, 1, 1], [], []>} : vector<8x32xbf16>, vector<32x128xbf16>, vector<8x128xf32> -> vector<8x128xf32>
    %162 = arith.addf %154, %161 : vector<8x128xf32>
    %163 = arith.truncf %162 : vector<8x128xf32> to vector<8x128xbf16>
    %c0_144 = arith.constant 0 : index
    %c0_145 = arith.constant 0 : index
    %c0_146 = arith.constant 0 : index
    %164 = vector.load %arg16[%c0_144, %c0_145, %c0_146] : memref<4x16x8xbf16, #tpu.memory_space<vmem>>, vector<1x16x8xbf16>
    %165 = vector.shape_cast %164 : vector<1x16x8xbf16> to vector<16x8xbf16>
    %cst_147 = arith.constant dense<0.000000e+00> : vector<16x128xf32>
    %166 = tpu.matmul %165, %163, %cst_147 {dimension_numbers = #tpu.dot_dimension_numbers<[1], [0], [0], [1], [0, 0, 1, 1], [], []>} : vector<16x8xbf16>, vector<8x128xbf16>, vector<16x128xf32> -> vector<16x128xf32>
    %167 = arith.truncf %166 : vector<16x128xf32> to vector<16x128xbf16>
    %c0_148 = arith.constant 0 : index
    %c0_149 = arith.constant 0 : index
    %c0_150 = arith.constant 0 : index
    %168 = vector.load %arg17[%c0_148, %c0_149, %c0_150] : memref<4x128x128xbf16, #tpu.memory_space<vmem>>, vector<1x128x128xbf16>
    %169 = vector.shape_cast %168 : vector<1x128x128xbf16> to vector<128x128xbf16>
    %cst_151 = arith.constant dense<0.000000e+00> : vector<16x128xf32>
    %170 = tpu.matmul %167, %169, %cst_151 {dimension_numbers = #tpu.dot_dimension_numbers<[1], [0], [0], [1], [0, 0, 1, 1], [], []>} : vector<16x128xbf16>, vector<128x128xbf16>, vector<16x128xf32> -> vector<16x128xf32>
    %c1_152 = arith.constant 1 : index
    %c0_153 = arith.constant 0 : index
    %c0_154 = arith.constant 0 : index
    %171 = vector.load %arg16[%c1_152, %c0_153, %c0_154] : memref<4x16x8xbf16, #tpu.memory_space<vmem>>, vector<1x16x8xbf16>
    %172 = vector.shape_cast %171 : vector<1x16x8xbf16> to vector<16x8xbf16>
    %cst_155 = arith.constant dense<0.000000e+00> : vector<16x128xf32>
    %173 = tpu.matmul %172, %163, %cst_155 {dimension_numbers = #tpu.dot_dimension_numbers<[1], [0], [0], [1], [0, 0, 1, 1], [], []>} : vector<16x8xbf16>, vector<8x128xbf16>, vector<16x128xf32> -> vector<16x128xf32>
    %174 = arith.truncf %173 : vector<16x128xf32> to vector<16x128xbf16>
    %c1_156 = arith.constant 1 : index
    %c0_157 = arith.constant 0 : index
    %c0_158 = arith.constant 0 : index
    %175 = vector.load %arg17[%c1_156, %c0_157, %c0_158] : memref<4x128x128xbf16, #tpu.memory_space<vmem>>, vector<1x128x128xbf16>
    %176 = vector.shape_cast %175 : vector<1x128x128xbf16> to vector<128x128xbf16>
    %cst_159 = arith.constant dense<0.000000e+00> : vector<16x128xf32>
    %177 = tpu.matmul %174, %176, %cst_159 {dimension_numbers = #tpu.dot_dimension_numbers<[1], [0], [0], [1], [0, 0, 1, 1], [], []>} : vector<16x128xbf16>, vector<128x128xbf16>, vector<16x128xf32> -> vector<16x128xf32>
    %178 = arith.addf %170, %177 : vector<16x128xf32>
    %c2_160 = arith.constant 2 : index
    %c0_161 = arith.constant 0 : index
    %c0_162 = arith.constant 0 : index
    %179 = vector.load %arg16[%c2_160, %c0_161, %c0_162] : memref<4x16x8xbf16, #tpu.memory_space<vmem>>, vector<1x16x8xbf16>
    %180 = vector.shape_cast %179 : vector<1x16x8xbf16> to vector<16x8xbf16>
    %cst_163 = arith.constant dense<0.000000e+00> : vector<16x128xf32>
    %181 = tpu.matmul %180, %163, %cst_163 {dimension_numbers = #tpu.dot_dimension_numbers<[1], [0], [0], [1], [0, 0, 1, 1], [], []>} : vector<16x8xbf16>, vector<8x128xbf16>, vector<16x128xf32> -> vector<16x128xf32>
    %182 = arith.truncf %181 : vector<16x128xf32> to vector<16x128xbf16>
    %c2_164 = arith.constant 2 : index
    %c0_165 = arith.constant 0 : index
    %c0_166 = arith.constant 0 : index
    %183 = vector.load %arg17[%c2_164, %c0_165, %c0_166] : memref<4x128x128xbf16, #tpu.memory_space<vmem>>, vector<1x128x128xbf16>
    %184 = vector.shape_cast %183 : vector<1x128x128xbf16> to vector<128x128xbf16>
    %cst_167 = arith.constant dense<0.000000e+00> : vector<16x128xf32>
    %185 = tpu.matmul %182, %184, %cst_167 {dimension_numbers = #tpu.dot_dimension_numbers<[1], [0], [0], [1], [0, 0, 1, 1], [], []>} : vector<16x128xbf16>, vector<128x128xbf16>, vector<16x128xf32> -> vector<16x128xf32>
    %186 = arith.addf %178, %185 : vector<16x128xf32>
    %c3_168 = arith.constant 3 : index
    %c0_169 = arith.constant 0 : index
    %c0_170 = arith.constant 0 : index
    %187 = vector.load %arg16[%c3_168, %c0_169, %c0_170] : memref<4x16x8xbf16, #tpu.memory_space<vmem>>, vector<1x16x8xbf16>
    %188 = vector.shape_cast %187 : vector<1x16x8xbf16> to vector<16x8xbf16>
    %cst_171 = arith.constant dense<0.000000e+00> : vector<16x128xf32>
    %189 = tpu.matmul %188, %163, %cst_171 {dimension_numbers = #tpu.dot_dimension_numbers<[1], [0], [0], [1], [0, 0, 1, 1], [], []>} : vector<16x8xbf16>, vector<8x128xbf16>, vector<16x128xf32> -> vector<16x128xf32>
    %190 = arith.truncf %189 : vector<16x128xf32> to vector<16x128xbf16>
    %c3_172 = arith.constant 3 : index
    %c0_173 = arith.constant 0 : index
    %c0_174 = arith.constant 0 : index
    %191 = vector.load %arg17[%c3_172, %c0_173, %c0_174] : memref<4x128x128xbf16, #tpu.memory_space<vmem>>, vector<1x128x128xbf16>
    %192 = vector.shape_cast %191 : vector<1x128x128xbf16> to vector<128x128xbf16>
    %cst_175 = arith.constant dense<0.000000e+00> : vector<16x128xf32>
    %193 = tpu.matmul %190, %192, %cst_175 {dimension_numbers = #tpu.dot_dimension_numbers<[1], [0], [0], [1], [0, 0, 1, 1], [], []>} : vector<16x128xbf16>, vector<128x128xbf16>, vector<16x128xf32> -> vector<16x128xf32>
    %194 = arith.addf %186, %193 : vector<16x128xf32>
    %c0_176 = arith.constant 0 : index
    %c0_177 = arith.constant 0 : index
    %195 = vector.load %arg18[%c0_176, %c0_177] : memref<1x128xf32, #tpu.memory_space<vmem>>, vector<1x128xf32>
    %196 = vector.broadcast %195 : vector<1x128xf32> to vector<16x128xf32>
    %197 = arith.addf %194, %196 : vector<16x128xf32>
    %cst_178 = arith.constant 0.000000e+00 : f32
    %198 = vector.broadcast %cst_178 : f32 to vector<16x128xf32>
    %199 = arith.maximumf %197, %198 : vector<16x128xf32>
    %200 = arith.truncf %199 : vector<16x128xf32> to vector<16x128xbf16>
    %c0_179 = arith.constant 0 : index
    %c0_180 = arith.constant 0 : index
    %c0_181 = arith.constant 0 : index
    %201 = vector.load %arg19[%c0_179, %c0_180, %c0_181] : memref<4x32x16xbf16, #tpu.memory_space<vmem>>, vector<1x32x16xbf16>
    %202 = vector.shape_cast %201 : vector<1x32x16xbf16> to vector<32x16xbf16>
    %cst_182 = arith.constant dense<0.000000e+00> : vector<32x128xf32>
    %203 = tpu.matmul %202, %200, %cst_182 {dimension_numbers = #tpu.dot_dimension_numbers<[1], [0], [0], [1], [0, 0, 1, 1], [], []>} : vector<32x16xbf16>, vector<16x128xbf16>, vector<32x128xf32> -> vector<32x128xf32>
    %204 = arith.truncf %203 : vector<32x128xf32> to vector<32x128xbf16>
    %c0_183 = arith.constant 0 : index
    %c0_184 = arith.constant 0 : index
    %c0_185 = arith.constant 0 : index
    %205 = vector.load %arg20[%c0_183, %c0_184, %c0_185] : memref<4x128x256xbf16, #tpu.memory_space<vmem>>, vector<1x128x256xbf16>
    %206 = vector.shape_cast %205 : vector<1x128x256xbf16> to vector<128x256xbf16>
    %cst_186 = arith.constant dense<0.000000e+00> : vector<32x256xf32>
    %207 = tpu.matmul %204, %206, %cst_186 {dimension_numbers = #tpu.dot_dimension_numbers<[1], [0], [0], [1], [0, 0, 1, 1], [], []>} : vector<32x128xbf16>, vector<128x256xbf16>, vector<32x256xf32> -> vector<32x256xf32>
    %c1_187 = arith.constant 1 : index
    %c0_188 = arith.constant 0 : index
    %c0_189 = arith.constant 0 : index
    %208 = vector.load %arg19[%c1_187, %c0_188, %c0_189] : memref<4x32x16xbf16, #tpu.memory_space<vmem>>, vector<1x32x16xbf16>
    %209 = vector.shape_cast %208 : vector<1x32x16xbf16> to vector<32x16xbf16>
    %cst_190 = arith.constant dense<0.000000e+00> : vector<32x128xf32>
    %210 = tpu.matmul %209, %200, %cst_190 {dimension_numbers = #tpu.dot_dimension_numbers<[1], [0], [0], [1], [0, 0, 1, 1], [], []>} : vector<32x16xbf16>, vector<16x128xbf16>, vector<32x128xf32> -> vector<32x128xf32>
    %211 = arith.truncf %210 : vector<32x128xf32> to vector<32x128xbf16>
    %c1_191 = arith.constant 1 : index
    %c0_192 = arith.constant 0 : index
    %c0_193 = arith.constant 0 : index
    %212 = vector.load %arg20[%c1_191, %c0_192, %c0_193] : memref<4x128x256xbf16, #tpu.memory_space<vmem>>, vector<1x128x256xbf16>
    %213 = vector.shape_cast %212 : vector<1x128x256xbf16> to vector<128x256xbf16>
    %cst_194 = arith.constant dense<0.000000e+00> : vector<32x256xf32>
    %214 = tpu.matmul %211, %213, %cst_194 {dimension_numbers = #tpu.dot_dimension_numbers<[1], [0], [0], [1], [0, 0, 1, 1], [], []>} : vector<32x128xbf16>, vector<128x256xbf16>, vector<32x256xf32> -> vector<32x256xf32>
    %215 = arith.addf %207, %214 : vector<32x256xf32>
    %c2_195 = arith.constant 2 : index
    %c0_196 = arith.constant 0 : index
    %c0_197 = arith.constant 0 : index
    %216 = vector.load %arg19[%c2_195, %c0_196, %c0_197] : memref<4x32x16xbf16, #tpu.memory_space<vmem>>, vector<1x32x16xbf16>
    %217 = vector.shape_cast %216 : vector<1x32x16xbf16> to vector<32x16xbf16>
    %cst_198 = arith.constant dense<0.000000e+00> : vector<32x128xf32>
    %218 = tpu.matmul %217, %200, %cst_198 {dimension_numbers = #tpu.dot_dimension_numbers<[1], [0], [0], [1], [0, 0, 1, 1], [], []>} : vector<32x16xbf16>, vector<16x128xbf16>, vector<32x128xf32> -> vector<32x128xf32>
    %219 = arith.truncf %218 : vector<32x128xf32> to vector<32x128xbf16>
    %c2_199 = arith.constant 2 : index
    %c0_200 = arith.constant 0 : index
    %c0_201 = arith.constant 0 : index
    %220 = vector.load %arg20[%c2_199, %c0_200, %c0_201] : memref<4x128x256xbf16, #tpu.memory_space<vmem>>, vector<1x128x256xbf16>
    %221 = vector.shape_cast %220 : vector<1x128x256xbf16> to vector<128x256xbf16>
    %cst_202 = arith.constant dense<0.000000e+00> : vector<32x256xf32>
    %222 = tpu.matmul %219, %221, %cst_202 {dimension_numbers = #tpu.dot_dimension_numbers<[1], [0], [0], [1], [0, 0, 1, 1], [], []>} : vector<32x128xbf16>, vector<128x256xbf16>, vector<32x256xf32> -> vector<32x256xf32>
    %223 = arith.addf %215, %222 : vector<32x256xf32>
    %c3_203 = arith.constant 3 : index
    %c0_204 = arith.constant 0 : index
    %c0_205 = arith.constant 0 : index
    %224 = vector.load %arg19[%c3_203, %c0_204, %c0_205] : memref<4x32x16xbf16, #tpu.memory_space<vmem>>, vector<1x32x16xbf16>
    %225 = vector.shape_cast %224 : vector<1x32x16xbf16> to vector<32x16xbf16>
    %cst_206 = arith.constant dense<0.000000e+00> : vector<32x128xf32>
    %226 = tpu.matmul %225, %200, %cst_206 {dimension_numbers = #tpu.dot_dimension_numbers<[1], [0], [0], [1], [0, 0, 1, 1], [], []>} : vector<32x16xbf16>, vector<16x128xbf16>, vector<32x128xf32> -> vector<32x128xf32>
    %227 = arith.truncf %226 : vector<32x128xf32> to vector<32x128xbf16>
    %c3_207 = arith.constant 3 : index
    %c0_208 = arith.constant 0 : index
    %c0_209 = arith.constant 0 : index
    %228 = vector.load %arg20[%c3_207, %c0_208, %c0_209] : memref<4x128x256xbf16, #tpu.memory_space<vmem>>, vector<1x128x256xbf16>
    %229 = vector.shape_cast %228 : vector<1x128x256xbf16> to vector<128x256xbf16>
    %cst_210 = arith.constant dense<0.000000e+00> : vector<32x256xf32>
    %230 = tpu.matmul %227, %229, %cst_210 {dimension_numbers = #tpu.dot_dimension_numbers<[1], [0], [0], [1], [0, 0, 1, 1], [], []>} : vector<32x128xbf16>, vector<128x256xbf16>, vector<32x256xf32> -> vector<32x256xf32>
    %231 = arith.addf %223, %230 : vector<32x256xf32>
    %c0_211 = arith.constant 0 : index
    %c0_212 = arith.constant 0 : index
    %232 = vector.load %arg21[%c0_211, %c0_212] : memref<1x256xf32, #tpu.memory_space<vmem>>, vector<1x256xf32>
    %233 = vector.broadcast %232 : vector<1x256xf32> to vector<32x256xf32>
    %234 = arith.addf %231, %233 : vector<32x256xf32>
    %cst_213 = arith.constant 0.000000e+00 : f32
    %235 = vector.broadcast %cst_213 : f32 to vector<32x256xf32>
    %236 = arith.maximumf %234, %235 : vector<32x256xf32>
    %237 = arith.truncf %236 : vector<32x256xf32> to vector<32x256xbf16>
    %c0_214 = arith.constant 0 : index
    %c0_215 = arith.constant 0 : index
    %238 = vector.load %arg22[%c0_214, %c0_215] : memref<256x128xbf16, #tpu.memory_space<vmem>>, vector<256x128xbf16>
    %cst_216 = arith.constant dense<0.000000e+00> : vector<32x128xf32>
    %239 = tpu.matmul %237, %238, %cst_216 {dimension_numbers = #tpu.dot_dimension_numbers<[1], [0], [0], [1], [0, 0, 1, 1], [], []>} : vector<32x256xbf16>, vector<256x128xbf16>, vector<32x128xf32> -> vector<32x128xf32>
    %c0_217 = arith.constant 0 : index
    %c0_218 = arith.constant 0 : index
    %240 = vector.load %arg23[%c0_217, %c0_218] : memref<1x128xf32, #tpu.memory_space<vmem>>, vector<1x128xf32>
    %241 = vector.broadcast %240 : vector<1x128xf32> to vector<32x128xf32>
    %242 = arith.addf %239, %241 : vector<32x128xf32>
    %c0_219 = arith.constant 0 : index
    %c0_220 = arith.constant 0 : index
    %243 = vector.load %arg24[%c0_219, %c0_220] : memref<32x128xf32, #tpu.memory_space<vmem>>, vector<32x128xf32>
    tpu.vector_store %arg24[%c0_219, %c0_220], %242 {strides = array<i32>} : memref<32x128xf32, #tpu.memory_space<vmem>>, vector<32x128xf32>,
    return
  }
  func.func @transform_0(%arg0: i32) -> (i32, i32) {
    %c0_i32 = arith.constant 0 : i32
    %c0_i32_0 = arith.constant 0 : i32
    %c0_i32_1 = arith.constant 0 : i32
    return %c0_i32, %c0_i32_0 : i32, i32
  }
  func.func @transform_1(%arg0: i32) -> (i32, i32) {
    %c0_i32 = arith.constant 0 : i32
    %c0_i32_0 = arith.constant 0 : i32
    %c0_i32_1 = arith.constant 0 : i32
    return %c0_i32, %c0_i32_0 : i32, i32
  }
  func.func @transform_2(%arg0: i32) -> (i32, i32) {
    %c0_i32 = arith.constant 0 : i32
    %c0_i32_0 = arith.constant 0 : i32
    %c0_i32_1 = arith.constant 0 : i32
    return %c0_i32, %c0_i32_0 : i32, i32
  }
  func.func @transform_3(%arg0: i32) -> (i32, i32) {
    %c0_i32 = arith.constant 0 : i32
    %c0_i32_0 = arith.constant 0 : i32
    %c0_i32_1 = arith.constant 0 : i32
    return %c0_i32, %c0_i32_0 : i32, i32
  }
  func.func @transform_4(%arg0: i32) -> (i32, i32, i32) {
    %c0_i32 = arith.constant 0 : i32
    %c0_i32_0 = arith.constant 0 : i32
    %c0_i32_1 = arith.constant 0 : i32
    %c0_i32_2 = arith.constant 0 : i32
    return %c0_i32, %c0_i32_0, %c0_i32_1 : i32, i32, i32
  }
  func.func @transform_5(%arg0: i32) -> (i32, i32, i32) {
    %c0_i32 = arith.constant 0 : i32
    %c0_i32_0 = arith.constant 0 : i32
    %c0_i32_1 = arith.constant 0 : i32
    %c0_i32_2 = arith.constant 0 : i32
    return %c0_i32, %c0_i32_0, %c0_i32_1 : i32, i32, i32
  }
  func.func @transform_6(%arg0: i32) -> (i32, i32) {
    %c0_i32 = arith.constant 0 : i32
    %c0_i32_0 = arith.constant 0 : i32
    %c0_i32_1 = arith.constant 0 : i32
    return %c0_i32, %c0_i32_0 : i32, i32
  }
  func.func @transform_7(%arg0: i32) -> (i32, i32, i32) {
    %c0_i32 = arith.constant 0 : i32
    %c0_i32_0 = arith.constant 0 : i32
    %c0_i32_1 = arith.constant 0 : i32
    %c0_i32_2 = arith.constant 0 : i32
    return %c0_i32, %c0_i32_0, %c0_i32_1 : i32, i32, i32
  }
  func.func @transform_8(%arg0: i32) -> (i32, i32, i32) {
    %c0_i32 = arith.constant 0 : i32
    %c0_i32_0 = arith.constant 0 : i32
    %c0_i32_1 = arith.constant 0 : i32
    %c0_i32_2 = arith.constant 0 : i32
    return %c0_i32, %c0_i32_0, %c0_i32_1 : i32, i32, i32
  }
  func.func @transform_9(%arg0: i32) -> (i32, i32) {
    %c0_i32 = arith.constant 0 : i32
    %c0_i32_0 = arith.constant 0 : i32
    %c0_i32_1 = arith.constant 0 : i32
    return %c0_i32, %c0_i32_0 : i32, i32
  }
  func.func @transform_10(%arg0: i32) -> (i32, i32, i32) {
    %c0_i32 = arith.constant 0 : i32
    %c0_i32_0 = arith.constant 0 : i32
    %c0_i32_1 = arith.constant 0 : i32
    %c0_i32_2 = arith.constant 0 : i32
    return %c0_i32, %c0_i32_0, %c0_i32_1 : i32, i32, i32
  }
  func.func @transform_11(%arg0: i32) -> (i32, i32, i32) {
    %c0_i32 = arith.constant 0 : i32
    %c0_i32_0 = arith.constant 0 : i32
    %c0_i32_1 = arith.constant 0 : i32
    %c0_i32_2 = arith.constant 0 : i32
    return %c0_i32, %c0_i32_0, %c0_i32_1 : i32, i32, i32
  }
  func.func @transform_12(%arg0: i32) -> (i32, i32) {
    %c0_i32 = arith.constant 0 : i32
    %c0_i32_0 = arith.constant 0 : i32
    %c0_i32_1 = arith.constant 0 : i32
    return %c0_i32, %c0_i32_0 : i32, i32
  }
  func.func @transform_13(%arg0: i32) -> (i32, i32, i32) {
    %c0_i32 = arith.constant 0 : i32
    %c0_i32_0 = arith.constant 0 : i32
    %c0_i32_1 = arith.constant 0 : i32
    %c0_i32_2 = arith.constant 0 : i32
    return %c0_i32, %c0_i32_0, %c0_i32_1 : i32, i32, i32
  }
  func.func @transform_14(%arg0: i32) -> (i32, i32, i32) {
    %c0_i32 = arith.constant 0 : i32
    %c0_i32_0 = arith.constant 0 : i32
    %c0_i32_1 = arith.constant 0 : i32
    %c0_i32_2 = arith.constant 0 : i32
    return %c0_i32, %c0_i32_0, %c0_i32_1 : i32, i32, i32
  }
  func.func @transform_15(%arg0: i32) -> (i32, i32, i32) {
    %c0_i32 = arith.constant 0 : i32
    %c0_i32_0 = arith.constant 0 : i32
    %c0_i32_1 = arith.constant 0 : i32
    %c0_i32_2 = arith.constant 0 : i32
    return %c0_i32, %c0_i32_0, %c0_i32_1 : i32, i32, i32
  }
  func.func @transform_16(%arg0: i32) -> (i32, i32, i32) {
    %c0_i32 = arith.constant 0 : i32
    %c0_i32_0 = arith.constant 0 : i32
    %c0_i32_1 = arith.constant 0 : i32
    %c0_i32_2 = arith.constant 0 : i32
    return %c0_i32, %c0_i32_0, %c0_i32_1 : i32, i32, i32
  }
  func.func @transform_17(%arg0: i32) -> (i32, i32) {
    %c0_i32 = arith.constant 0 : i32
    %c0_i32_0 = arith.constant 0 : i32
    %c0_i32_1 = arith.constant 0 : i32
    return %c0_i32, %c0_i32_0 : i32, i32
  }
  func.func @transform_18(%arg0: i32) -> (i32, i32, i32) {
    %c0_i32 = arith.constant 0 : i32
    %c0_i32_0 = arith.constant 0 : i32
    %c0_i32_1 = arith.constant 0 : i32
    %c0_i32_2 = arith.constant 0 : i32
    return %c0_i32, %c0_i32_0, %c0_i32_1 : i32, i32, i32
  }
  func.func @transform_19(%arg0: i32) -> (i32, i32, i32) {
    %c0_i32 = arith.constant 0 : i32
    %c0_i32_0 = arith.constant 0 : i32
    %c0_i32_1 = arith.constant 0 : i32
    %c0_i32_2 = arith.constant 0 : i32
    return %c0_i32, %c0_i32_0, %c0_i32_1 : i32, i32, i32
  }
  func.func @transform_20(%arg0: i32) -> (i32, i32) {
    %c0_i32 = arith.constant 0 : i32
    %c0_i32_0 = arith.constant 0 : i32
    %c0_i32_1 = arith.constant 0 : i32
    return %c0_i32, %c0_i32_0 : i32, i32
  }
  func.func @transform_21(%arg0: i32) -> (i32, i32) {
    %c0_i32 = arith.constant 0 : i32
    %c0_i32_0 = arith.constant 0 : i32
    %c0_i32_1 = arith.constant 0 : i32
    return %c0_i32, %c0_i32_0 : i32, i32
  }
  func.func @transform_22(%arg0: i32) -> (i32, i32) {
    %c0_i32 = arith.constant 0 : i32
    %c0_i32_0 = arith.constant 0 : i32
    %c0_i32_1 = arith.constant 0 : i32
    return %c0_i32, %c0_i32_0 : i32, i32
  }
  func.func @transform_23(%arg0: i32) -> (i32, i32) {
    %c0_i32 = arith.constant 0 : i32
    %c0_i32_0 = arith.constant 0 : i32
    %c0_i32_1 = arith.constant 0 : i32
    return %c0_i32, %c0_i32_0 : i32, i32
  }
  func.func @transform_24(%arg0: i32) -> (i32, i32) {
    %c0_i32 = arith.constant 0 : i32
    %c0_i32_0 = arith.constant 0 : i32
    %c0_i32_1 = arith.constant 0 : i32
    return %c0_i32, %c0_i32_0 : i32, i32
  }
}

</mosaic_0001>

<bundles_post_ra>
// kernel: tpu_custom_call.1
= control target key start
LH: loop header
LB: loop body
LE: loop exit
PB: predicated region body
PF: predicated region fallthrough
CT: control target
= control target key end

     0   :  { %s7126_s0 = inlined_call_operand.hbm [shape: f32[32,48], index: 0, kind: input, shape index: {}]   ;;  %s7127_s1 = inlined_call_operand.vmem [shape: f32[1,48], index: 1, kind: input, shape index: {}]   ;;  %s7128_s2 = inlined_call_operand.vmem [shape: f32[1,48], index: 2, kind: input, shape index: {}]   ;;  %s7129_s3 = inlined_call_operand.hbm [shape: f32[32,32], index: 3, kind: input, shape index: {}]   ;;  %s7130_s4 = inlined_call_operand.hbm [shape: bf16[4,16,32], index: 4, kind: input, shape index: {}]   ;;  %s7131_s5 = inlined_call_operand.vmem [shape: bf16[4,48,128], index: 5, kind: input, shape index: {}]   ;;  %s7132_s6 = inlined_call_operand.vmem [shape: f32[1,128], index: 6, kind: input, shape index: {}]   ;;  %s7133_s7 = inlined_call_operand.hbm [shape: bf16[4,8,16], index: 7, kind: input, shape index: {}]   ;;  %s7134_s8 = inlined_call_operand.vmem [shape: bf16[4,128,64], index: 8, kind: input, shape index: {}]   ;;  %s7135_s9 = inlined_call_operand.vmem [shape: f32[1,64], index: 9, kind: input, shape index: {}]   ;;  %s7136_s10 = inlined_call_operand.vmem [shape: bf16[4,32,8], index: 10, kind: input, shape index: {}]   ;;  %s7137_s11 = inlined_call_operand.vmem [shape: bf16[4,64,32], index: 11, kind: input, shape index: {}]   ;;  %s7138_s12 = inlined_call_operand.vmem [shape: f32[1,32], index: 12, kind: input, shape index: {}]   ;;  %s7139_s13 = inlined_call_operand.hbm [shape: bf16[4,8,32], index: 13, kind: input, shape index: {}]   ;;  %s7140_s14 = inlined_call_operand.hbm [shape: bf16[4,32,128], index: 14, kind: input, shape index: {}]   ;;  %s7141_s15 = inlined_call_operand.vmem [shape: bf16[4,16,8], index: 15, kind: input, shape index: {}]   ;;  %s7142_s16 = inlined_call_operand.vmem [shape: bf16[4,128,128], index: 16, kind: input, shape index: {}]   ;;  %s7143_s17 = inlined_call_operand.hbm [shape: f32[1,128], index: 17, kind: input, shape index: {}]   ;;  %s7144_s18 = inlined_call_operand.vmem [shape: bf16[4,32,16], index: 18, kind: input, shape index: {}]   ;;  %s7145_s19 = inlined_call_operand.vmem [shape: bf16[4,128,256], index: 19, kind: input, shape index: {}]   ;;  %s7146_s20 = inlined_call_operand.vmem [shape: f32[1,256], index: 20, kind: input, shape index: {}]   ;;  %s7147_s21 = inlined_call_operand.hbm [shape: bf16[256,128], index: 21, kind: input, shape index: {}]   ;;  %s7148_s22 = inlined_call_operand.vmem [shape: f32[1,128], index: 22, kind: input, shape index: {}]   ;;  %s7149_s23 = inlined_call_operand.hbm [shape: f32[32,128], index: 23, kind: output, shape index: {0}]   ;;  %s7150_s24 = inlined_call_operand.hbm [shape: f32[32,32], index: 24, kind: output, shape index: {1}]  }
   0x1   :  { %7161 = sst [smem:[#allocation26_spill]] %s7126_s0 }
   0x2   :  { %7162 = sst [smem:[#allocation27_spill]] %s7127_s1 }
   0x3   :  { %7163 = sst [smem:[#allocation28_spill]] %s7128_s2 }
   0x4   :  { %7164 = sst [smem:[#allocation29_spill]] %s7129_s3 }
   0x5   :  { %7165 = sst [smem:[#allocation30_spill]] %s7130_s4 }
   0x6   :  { %7166 = sst [smem:[#allocation31_spill]] %s7131_s5 }
   0x7   :  { %7167 = sst [smem:[#allocation32_spill]] %s7132_s6 }
   0x8   :  { %7168 = sst [smem:[#allocation33_spill]] %s7133_s7 }
   0x9   :  { %7169 = sst [smem:[#allocation34_spill]] %s7134_s8 }
   0xa   :  { %7170 = sst [smem:[#allocation35_spill]] %s7148_s22 }
   0xb   :  { %7171 = sst [smem:[#allocation36_spill]] %s7149_s23 }
   0xc   :  { %7172 = sst [smem:[#allocation37_spill]] %s7150_s24 }
   0xd   :  { %30 = vsyncpa [#allocation3], 0 }
   0xe   :  { %31 = vsyncpa [#allocation6], 0 }
   0xf   :  { %32 = vsyncpa [#allocation9], 0 }
  0x10   :  { %33 = vsyncpa [#allocation12], 0 }
  0x11   :  { %34 = vsyncpa [#allocation15], 0 }
  0x12   :  { %35 = vsyncpa [#allocation4], 0 }
  0x13   :  { %36 = vsyncpa [#allocation18], 0  ;;  %s5981_s5 = smov [#allocation5]   ;;  %s7173_s6 = sld [smem:[#allocation29_spill]] }
  0x14   :  { %s58_s26 = sshll.u32 %s5981_s5, 4  ;;  %s59_s26 = int_to_ptr.vmem [resolvable:$true] %s58_s26 }
  0x19   :  { %s5747_s2 = scalar_lea.hbm %s7173_s6, 512 }
  0x1a   :  { %p5748_p0 = scmp.ne.s32.totalorder %s7173_s6, %s5747_s2  ;;  %p5751_p1 = scmp.lt.u32.totalorder %s5747_s2, %s7173_s6 }
  0x1c   :  { %p5753_p2 = pnand %p5751_p1, %p5748_p0 }
  0x1e   :  { %5756 = shalt.err (!%p5753_p2)
}
  0x1f   :  { %s5757_s3 = scalar_lea.vmem %s59_s26, 512  ;;  %p5762_p4 = scmp.lt.s32.totalorder %s59_s26, %s59_s26 }
  0x20   :  { %p5758_p3 = scmp.ne.s32.totalorder %s59_s26, %s5757_s3  ;;  %p5763_p5 = scmp.lt.s32.totalorder %s5757_s3, %s5757_s3 }
  0x22   :  { %p5764_p6 = por %p5763_p5, %p5762_p4 }
  0x24   :  { %p5765_p7 = pnand %p5764_p6, %p5758_p3 }
  0x26   :  { %5768 = shalt.err (!%p5765_p7)
}
  0x27   :  { %s7159_s25 = smov 128   ;;  %s5983_s8 = smov 8  }
  0x28   :  { %64 = dma.hbm_to_vmem [thread:$0]  %s7173_s6, 512, %s59_s26, [#allocation6], %s7159_s25, %s7159_s25, %s5983_s8  }
  0x29   :  { %s5984_s5 = smov [#allocation8]   ;;  %s5985_s28 = smov [#allocation11]  }
  0x2a   :  { %s86_s27 = sshll.u32 %s5984_s5, 4  ;;  %s120_s2 = sshll.u32 %s5985_s28, 4  ;;  %s87_s27 = int_to_ptr.vmem [resolvable:$true] %s86_s27  ;;  %s121_s2 = int_to_ptr.vmem [resolvable:$true] %s120_s2 }
  0x2b   :  { %s7174_s7 = sld [smem:[#allocation33_spill]] }
  0x31   :  { %s5769_s30 = scalar_lea.hbm %s7174_s7, 256 }
  0x32   :  { %p5770_p8 = scmp.ne.s32.totalorder %s7174_s7, %s5769_s30  ;;  %p5773_p9 = scmp.lt.u32.totalorder %s5769_s30, %s7174_s7 }
  0x34   :  { %p5775_p10 = pnand %p5773_p9, %p5770_p8 }
  0x36   :  { %5778 = shalt.err (!%p5775_p10)
}
  0x37   :  { %s5779_s26 = scalar_lea.vmem %s87_s27, 256  ;;  %p5784_p12 = scmp.lt.s32.totalorder %s87_s27, %s87_s27 }
  0x38   :  { %p5780_p11 = scmp.ne.s32.totalorder %s87_s27, %s5779_s26  ;;  %p5785_p13 = scmp.lt.s32.totalorder %s5779_s26, %s5779_s26 }
  0x3a   :  { %p5786_p0 = por %p5785_p13, %p5784_p12 }
  0x3c   :  { %p5787_p1 = pnand %p5786_p0, %p5780_p11 }
  0x3e   :  { %5790 = shalt.err (!%p5787_p1)
}
  0x3f   :  { %s5986_s6 = smov 64   ;;  %s5987_s4 = smov 4  }
  0x40   :  { %92 = dma.hbm_to_vmem [thread:$0]  %s7174_s7, 256, %s87_s27, [#allocation9], %s5986_s6, %s5986_s6, %s5987_s4  }
  0x41   :  { %s5791_s5 = scalar_lea.hbm %s7140_s14, 1024 }
  0x42   :  { %p5792_p2 = scmp.ne.s32.totalorder %s7140_s14, %s5791_s5  ;;  %p5795_p3 = scmp.lt.u32.totalorder %s5791_s5, %s7140_s14 }
  0x44   :  { %p5797_p4 = pnand %p5795_p3, %p5792_p2 }
  0x46   :  { %5800 = shalt.err (!%p5797_p4)
}
  0x47   :  { %s5801_s3 = scalar_lea.vmem %s121_s2, 1024  ;;  %p5806_p6 = scmp.lt.s32.totalorder %s121_s2, %s121_s2 }
  0x48   :  { %p5802_p5 = scmp.ne.s32.totalorder %s121_s2, %s5801_s3  ;;  %p5807_p7 = scmp.lt.s32.totalorder %s5801_s3, %s5801_s3 }
  0x4a   :  { %p5808_p8 = por %p5807_p7, %p5806_p6 }
  0x4c   :  { %p5809_p9 = pnand %p5808_p8, %p5802_p5 }
  0x4e   :  { %5812 = shalt.err (!%p5809_p9)
}
  0x4f   :  { %126 = dma.hbm_to_vmem [thread:$0]  %s7140_s14, 1024, %s121_s2, [#allocation12], %s5986_s6, %s5986_s6, %s5987_s4  }
  0x50   :  { %s5988_s26 = smov [#allocation2]   ;;  %s5989_s1 = smov [#allocation7]  }
  0x51   :  { %s42_s23 = sshll.u32 %s5988_s26, 4  ;;  %s70_s22 = sshll.u32 %s5989_s1, 4  ;;  %s43_s23 = int_to_ptr.vmem [resolvable:$true] %s42_s23  ;;  %s71_s22 = int_to_ptr.vmem [resolvable:$true] %s70_s22 }
  0x52   :  { %s7175_s28 = sld [smem:[#allocation26_spill]] }
  0x58   :  { %s5813_s29 = scalar_lea.hbm %s7175_s28, 512 }
  0x59   :  { %p5814_p10 = scmp.ne.s32.totalorder %s7175_s28, %s5813_s29  ;;  %p5817_p11 = scmp.lt.u32.totalorder %s5813_s29, %s7175_s28 }
  0x5b   :  { %p5819_p12 = pnand %p5817_p11, %p5814_p10 }
  0x5d   :  { %5822 = shalt.err (!%p5819_p12)
}
  0x5e   :  { %s5823_s14 = scalar_lea.vmem %s43_s23, 512  ;;  %p5828_p0 = scmp.lt.s32.totalorder %s43_s23, %s43_s23 }
  0x5f   :  { %p5824_p13 = scmp.ne.s32.totalorder %s43_s23, %s5823_s14  ;;  %p5829_p1 = scmp.lt.s32.totalorder %s5823_s14, %s5823_s14 }
  0x61   :  { %p5830_p2 = por %p5829_p1, %p5828_p0 }
  0x63   :  { %p5831_p3 = pnand %p5830_p2, %p5824_p13 }
  0x65   :  { %5834 = shalt.err (!%p5831_p3)
}
  0x66   :  { %s7176_s2 = smov 128   ;;  %s7177_s1 = sld [smem:[#allocation30_spill]] }
  0x67   :  { %48 = dma.hbm_to_vmem [thread:$0]  %s7175_s28, 512, %s43_s23, [#allocation3], %s7176_s2, %s7176_s2, %s5983_s8  }
  0x6c   :  { %s5835_s24 = scalar_lea.hbm %s7177_s1, 512 }
  0x6d   :  { %p5836_p4 = scmp.ne.s32.totalorder %s7177_s1, %s5835_s24  ;;  %p5839_p5 = scmp.lt.u32.totalorder %s5835_s24, %s7177_s1 }
  0x6f   :  { %p5841_p6 = pnand %p5839_p5, %p5836_p4 }
  0x71   :  { %5844 = shalt.err (!%p5841_p6)
}
  0x72   :  { %s5845_s3 = scalar_lea.vmem %s71_s22, 512  ;;  %p5850_p8 = scmp.lt.s32.totalorder %s71_s22, %s71_s22 }
  0x73   :  { %p5846_p7 = scmp.ne.s32.totalorder %s71_s22, %s5845_s3  ;;  %p5851_p9 = scmp.lt.s32.totalorder %s5845_s3, %s5845_s3 }
  0x75   :  { %p5852_p10 = por %p5851_p9, %p5850_p8 }
  0x77   :  { %p5853_p11 = pnand %p5852_p10, %p5846_p7 }
  0x79   :  { %5856 = shalt.err (!%p5853_p11)
}
  0x7a   :  { %76 = dma.hbm_to_vmem [thread:$0]  %s7177_s1, 512, %s71_s22, [#allocation6], %s5986_s6, %s5986_s6, %s5987_s4  }
  0x7b   :  { %s5990_s14 = smov [#allocation10]   ;;  %s5991_s7 = smov [#allocation13]  }
  0x7c   :  { %s108_s27 = sshll.u32 %s5990_s14, 4  ;;  %s137_s26 = sshll.u32 %s5991_s7, 4  ;;  %s109_s27 = int_to_ptr.vmem [resolvable:$true] %s108_s27  ;;  %s138_s26 = int_to_ptr.vmem [resolvable:$true] %s137_s26 }
  0x7d   :  { %s5857_s5 = scalar_lea.hbm %s7139_s13, 256 }
  0x7e   :  { %p5858_p12 = scmp.ne.s32.totalorder %s7139_s13, %s5857_s5  ;;  %p5861_p13 = scmp.lt.u32.totalorder %s5857_s5, %s7139_s13 }
  0x80   :  { %p5863_p0 = pnand %p5861_p13, %p5858_p12 }
  0x82   :  { %5866 = shalt.err (!%p5863_p0)
}
  0x83   :  { %s5867_s22 = scalar_lea.vmem %s109_s27, 256  ;;  %p5872_p2 = scmp.lt.s32.totalorder %s109_s27, %s109_s27 }
  0x84   :  { %p5868_p1 = scmp.ne.s32.totalorder %s109_s27, %s5867_s22  ;;  %p5873_p3 = scmp.lt.s32.totalorder %s5867_s22, %s5867_s22 }
  0x86   :  { %p5874_p4 = por %p5873_p3, %p5872_p2 }
  0x88   :  { %p5875_p5 = pnand %p5874_p4, %p5868_p1 }
  0x8a   :  { %5878 = shalt.err (!%p5875_p5)
}
  0x8b   :  { %114 = dma.hbm_to_vmem [thread:$0]  %s7139_s13, 256, %s109_s27, [#allocation9], %s5986_s6, %s5986_s6, %s5987_s4  }
  0x8c   :  { %s5879_s7 = scalar_lea.hbm %s7143_s17, 16 }
  0x8d   :  { %p5880_p6 = scmp.ne.s32.totalorder %s7143_s17, %s5879_s7  ;;  %p5883_p7 = scmp.lt.u32.totalorder %s5879_s7, %s7143_s17 }
  0x8f   :  { %p5885_p8 = pnand %p5883_p7, %p5880_p6 }
  0x91   :  { %5888 = shalt.err (!%p5885_p8)
}
  0x92   :  { %s5889_s0 = scalar_lea.vmem %s138_s26, 16  ;;  %s5893_s30 = scalar_lea.vmem %s138_s26, 32 }
  0x93   :  { %p5890_p9 = scmp.ne.s32.totalorder %s138_s26, %s5889_s0  ;;  %p5894_p10 = scmp.lt.s32.totalorder %s138_s26, %s138_s26 }
  0x94   :  { %p5895_p11 = scmp.lt.s32.totalorder %s5893_s30, %s5889_s0 }
  0x96   :  { %p5896_p12 = por %p5895_p11, %p5894_p10 }
  0x98   :  { %p5897_p13 = pnand %p5896_p12, %p5890_p9 }
  0x9a   :  { %5900 = shalt.err (!%p5897_p13)
}
  0x9b   :  { %140 = dma.hbm_to_vmem [thread:$0]  %s7143_s17, 16, %s138_s26, [#allocation12]  }
  0x9c   :  { %s5992_s3 = smov [#allocation14]   ;;  %s5901_s28 = scalar_lea.hbm %s7147_s21, 2048 }
  0x9d   :  { %s152_s22 = sshll.u32 %s5992_s3, 4  ;;  %p5902_p0 = scmp.ne.s32.totalorder %s7147_s21, %s5901_s28  ;;  %s153_s22 = int_to_ptr.vmem [resolvable:$true] %s152_s22 }
  0x9e   :  { %p5905_p1 = scmp.lt.u32.totalorder %s5901_s28, %s7147_s21 }
  0xa0   :  { %p5907_p2 = pnand %p5905_p1, %p5902_p0 }
  0xa2   :  { %5910 = shalt.err (!%p5907_p2)
}
  0xa3   :  { %s5911_s5 = scalar_lea.vmem %s153_s22, 2048  ;;  %p5916_p4 = scmp.lt.s32.totalorder %s153_s22, %s153_s22 }
  0xa4   :  { %p5912_p3 = scmp.ne.s32.totalorder %s153_s22, %s5911_s5  ;;  %p5917_p5 = scmp.lt.s32.totalorder %s5911_s5, %s5911_s5 }
  0xa6   :  { %p5918_p6 = por %p5917_p5, %p5916_p4 }
  0xa8   :  { %p5919_p7 = pnand %p5918_p6, %p5912_p3 }
  0xaa   :  { %5922 = shalt.err (!%p5919_p7)
}
  0xab   :  { %158 = dma.hbm_to_vmem [thread:$0]  %s7147_s21, 2048, %s153_s22, [#allocation15], %s5986_s6, %s5986_s6, %s5987_s4  }
  0xac   :  { %5967 = dma.done.wait [#allocation3], 512  }
  0xad   :  { %5968 = vsyncadd [#allocation3], 4294966784 }
  0xae   :  { %5969 = dma.done.wait [#allocation6], 1024  }
  0xaf   :  { %5970 = vsyncadd [#allocation6], 4294966272 }
  0xb0   :  { %5971 = dma.done.wait [#allocation9], 512  }
  0xb1   :  { %5972 = vsyncadd [#allocation9], 4294966784 }
  0xb2   :  { %5973 = dma.done.wait [#allocation12], 1040  }
  0xb3   :  { %5974 = vsyncadd [#allocation12], 4294966256 }
  0xb4   :  { %5975 = dma.done.wait [#allocation15], 2048  }
  0xb5   :  { %5976 = vsyncadd [#allocation15], 4294965248  ;;  %v5993_v0 = vmov 0.0   ;;  %vm5994_vm0 = vmmov 0   ;;  %v186_v1 = vld [vmem:[#allocation2] sm:$0xff]  ;;  %v187_v2 = vld [vmem:[#allocation2 + $0x8] sm:$0xff] }
  0xb6   :  { %4986 = vmatprep.subr.bf16.mxu0 %v5993_v0  ;;  %4994 = vmatprep.subr.bf16.mxu1 %v5993_v0  ;;  %s7178_s4 = sld [smem:[#allocation27_spill]]  ;;  %s7179_s30 = sld [smem:[#allocation28_spill]]  ;;  %v188_v7 = vld [vmem:[#allocation2 + $0x10] sm:$0xff]  ;;  %v189_v8 = vld [vmem:[#allocation2 + $0x18] sm:$0xff]  ;;  %vm221_vm1 = vcmask 261120   ;;  %v5495_v17 = vld [vmem:[#allocation7] sm:$0xff]  }
  0xb7   :  { %4990 = vmatprep.mubr.msk.bf16.mxu0 %vm5994_vm0, %v5993_v0  ;;  %4998 = vmatprep.mubr.msk.bf16.mxu1 %vm5994_vm0, %v5993_v0  ;;  %v5496_v18 = vld [vmem:[#allocation7 + $0x8] sm:$0xff]   ;;  %s7180_s3 = sld [smem:[#allocation31_spill]]  ;;  %vm351_vm2 = vcmask 392192   ;;  %v5503_v35 = vld [vmem:[#allocation7 + $0x10] sm:$0xff]   ;;  %v5504_v36 = vld [vmem:[#allocation7 + $0x18] sm:$0xff]   ;;  %s7181_s14 = sld [smem:[#allocation32_spill]] }
  0xb8   :  { %vm719_vm3 = vcmask 130048   ;;  %s7182_s24 = sld [smem:[#allocation34_spill]]  ;;  %vm1347_vm4 = vcmask 64512   ;;  %vm1354_vm5 = vcmask 1043456   ;;  %vm1522_vm6 = vcmask 523264  }
  0xbc   :  { %v4295_v3 = vld [vmem:[%s7178_s4] ss:$0 sm:$0xff] }
  0xbd   :  { %v197_v4 = vsub.f32 %v186_v1, %v4295_v3  ;;  %v198_v5 = vsub.f32 %v187_v2, %v4295_v3  ;;  %v4296_v6 = vld [vmem:[%s7179_s30] ss:$0 sm:$0xff]  ;;  %v199_v9 = vsub.f32 %v188_v7, %v4295_v3  ;;  %v200_v10 = vsub.f32 %v189_v8, %v4295_v3  ;;  %v5497_v19 = vld [vmem:[%s7180_s3 + $0x18] sm:$0xff]   ;;  %v5500_v22 = vld [vmem:[%s7180_s3 + $0x8] sm:$0xff]  }
  0xbe   :  { %v5498_v20 = vld [vmem:[%s7180_s3] sm:$0xff]   ;;  %v5501_v23 = vld [vmem:[%s7180_s3 + $0x28] sm:$0xff]   ;;  %v5502_v24 = vld [vmem:[%s7180_s3 + $0x10] sm:$0xff]  }
  0xbf   :  { %v208_v11 = vmul.f32 %v4296_v6, %v197_v4  ;;  %v209_v12 = vmul.f32 %v4296_v6, %v198_v5  ;;  %v210_v13 = vmul.f32 %v4296_v6, %v199_v9  ;;  %v211_v14 = vmul.f32 %v4296_v6, %v200_v10  ;;  %v5499_v21 = vld [vmem:[%s7180_s3 + $0x20] sm:$0xff]   ;;  %v5505_v37 = vld [vmem:[%s7180_s3 + $0x30] sm:$0xff]   ;;  %v5506_v38 = vld [vmem:[%s7180_s3 + $0x38] sm:$0xff]  }
  0xc0   :  { %v5507_v39 = vld [vmem:[%s7180_s3 + $0x40] sm:$0xff]   ;;  %v5508_v53 = vld [vmem:[%s7180_s3 + $0x48] sm:$0xff]   ;;  %v5509_v56 = vld [vmem:[%s7180_s3 + $0x50] sm:$0xff]  }
  0xc1   :  { %v212_v15 = vpack.c.bf16 %v209_v12, %v208_v11  ;;  %v213_v16 = vpack.c.bf16 %v211_v14, %v210_v13  ;;  %v5510_v60 = vld [vmem:[%s7180_s3 + $0x58] sm:$0xff]   ;;  %v4339_v7 = vld [vmem:[%s7181_s14] ss:$0 sm:$0xff] }
  0xc3   :  { %4987 = vmatpush3.bf16.msra.mxu0 %v212_v15  ;;  %4995 = vmatpush3.bf16.msra.mxu1 %v212_v15 }
  0xc4   :  { %4988 = vmatprep.subr.bf16.mxu0 %v5993_v0  ;;  %4996 = vmatprep.subr.bf16.mxu1 %v5993_v0 }
  0xc7   :  { %4989 = vmatpush3.bf16.msra.mxu0 %v213_v16  ;;  %4997 = vmatpush3.bf16.msra.mxu1 %v213_v16 }
  0xc8   :  { %5002 = vmatprep.subr.bf16.mxu0 %v5993_v0  ;;  %5012 = vmatprep.subr.bf16.mxu1 %v5993_v0 }
  0xca   :  { %4991 = vmatmul.mubr.msk.bf16.vlgmr.msra.gmra.mrb[0].mxu0 %vm221_vm1, %v5495_v17  ;;  %4999 = vmatmul.mubr.msk.bf16.vlgmr.msra.gmra.mrb[0].mxu1 %vm221_vm1, %v5496_v18  ;;  %v718_v18 = vld [vmem:[#allocation8] sm:$0xf] }
  0xcb   :  { %5003 = vmatpush3.bf16.msra.mxu0 %v5497_v19  ;;  %5013 = vmatpush3.bf16.msra.mxu1 %v5498_v20  ;;  %v1020_v19 = vld [vmem:[#allocation8 + $0x8] sm:$0xf]  ;;  %v781_v20 = vld [vmem:[#allocation8 + $0x4] sm:$0xf] }
  0xcc   :  { %5004 = vmatprep.subr.bf16.mxu0 %v5993_v0  ;;  %5014 = vmatprep.subr.bf16.mxu1 %v5993_v0 }
  0xcd   :  { %5008 = vmatprep.mubr.msk.bf16.mxu0 %vm5994_vm0, %v5993_v0  ;;  %5018 = vmatprep.mubr.msk.bf16.mxu1 %vm5994_vm0, %v5993_v0 }
  0xcf   :  { %5005 = vmatpush3.bf16.msra.mxu0 %v5499_v21  ;;  %5015 = vmatpush3.bf16.msra.mxu1 %v5500_v22  ;;  %v1172_v21 = vld [vmem:[#allocation8 + $0xc] sm:$0xf]  ;;  %v5511_v22 = vld [vmem:[%s7182_s24 + $0x40] sm:$0xff]  }
  0xd0   :  { %5006 = vmatprep.subr.bf16.mxu0 %v5993_v0  ;;  %5016 = vmatprep.subr.bf16.mxu1 %v5993_v0 }
  0xd3   :  { %5007 = vmatpush3.bf16.msra.mxu0 %v5501_v23  ;;  %5017 = vmatpush3.bf16.msra.mxu1 %v5502_v24  ;;  %v5512_v23 = vld [vmem:[%s7182_s24 + $0x48] sm:$0xff]   ;;  %v5513_v24 = vld [vmem:[%s7182_s24 + $0x50] sm:$0xff]  }
  0xd4   :  { %5022 = vmatprep.subr.bf16.mxu0 %v5993_v0  ;;  %5030 = vmatprep.subr.bf16.mxu1 %v5993_v0 }
 0x19d   :  { %v259_v25 = vpop.f32.mrb[0].mxu0  ;;  %v318_v26 = vpop.f32.mrb[0].mxu1 }
 0x19e   :  { %v4992_v27 = vpop.f32.mrb[1].mxu0  ;;  %v5000_v28 = vpop.f32.mrb[1].mxu1 }
 0x19f   :  { %v262_v29 = vpop.f32.mrb[2].mxu0  ;;  %v321_v30 = vpop.f32.mrb[2].mxu1  ;;  %v5516_v27 = vld [vmem:[%s7182_s24 + $0x68] sm:$0xff]   ;;  %v5517_v28 = vld [vmem:[%s7182_s24 + $0x70] sm:$0xff]  }
 0x1a0   :  { %v266_v31 = vpack.c.bf16 %v262_v29, %v259_v25  ;;  %v325_v32 = vpack.c.bf16 %v321_v30, %v318_v26  ;;  %v5001_v33 = vpop.f32.mrb[3].mxu1  ;;  %v4993_v34 = vpop.f32.mrb[3].mxu0  ;;  %v5514_v25 = vld [vmem:[%s7182_s24 + $0x58] sm:$0xff]   ;;  %v5515_v26 = vld [vmem:[%s7182_s24 + $0x60] sm:$0xff]  }
 0x1a1   :  { %v5518_v29 = vld [vmem:[%s7182_s24 + $0x78] sm:$0xff]   ;;  %v5527_v30 = vld [vmem:[%s7182_s24 + $0xc0] sm:$0xff]  }
 0x1a2   :  { %5009 = vmatmul.mubr.msk.bf16.vlgmr.msra.gmra.mrb[4].mxu0 %vm351_vm2, %v325_v32  ;;  %5019 = vmatmul.mubr.msk.bf16.vlgmr.msra.gmra.mrb[4].mxu1 %vm351_vm2, %v266_v31  ;;  %v5529_v31 = vld [vmem:[%s7182_s24 + $0xc8] sm:$0xff]   ;;  %v5531_v32 = vld [vmem:[%s7182_s24 + $0xd0] sm:$0xff]   ;;  %v5533_v33 = vld [vmem:[%s7182_s24 + $0xd8] sm:$0xff]  }
 0x1a3   :  { %5023 = vmatpush3.bf16.msra.mxu0 %v212_v15  ;;  %5026 = vmatprep.mubr.msk.bf16.mxu0 %vm5994_vm0, %v5993_v0  ;;  %v5535_v34 = vld [vmem:[%s7182_s24 + $0xe0] sm:$0xff]  }
 0x1a4   :  { %5024 = vmatprep.subr.bf16.mxu0 %v5993_v0  ;;  %5036 = vmatprep.mubr.msk.bf16.mxu1 %vm5994_vm0, %v5993_v0 }
 0x1a5   :  { %5031 = vmatpush3.bf16.msra.mxu1 %v5505_v37  ;;  %v5541_v37 = vld [vmem:[%s7182_s24 + $0xf8] sm:$0xff]  }
 0x1a6   :  { %5032 = vmatprep.subr.bf16.mxu1 %v5993_v0 }
 0x1a7   :  { %5025 = vmatpush3.bf16.msra.mxu0 %v213_v16 }
 0x1a8   :  { %5040 = vmatprep.subr.bf16.mxu0 %v5993_v0 }
 0x1a9   :  { %5033 = vmatpush3.bf16.msra.mxu1 %v5506_v38 }
 0x1aa   :  { %5027 = vmatmul.mubr.msk.bf16.vlgmr.msra.gmra.mrb[8].mxu0 %vm221_vm1, %v5503_v35  ;;  %5034 = vmatprep.subr.bf16.mxu1 %v5993_v0  ;;  %v5537_v35 = vld [vmem:[%s7182_s24 + $0xe8] sm:$0xff]  }
 0x1ab   :  { %5041 = vmatpush3.bf16.msra.mxu0 %v212_v15  ;;  %5044 = vmatprep.mubr.msk.bf16.mxu0 %vm5994_vm0, %v5993_v0 }
 0x1ac   :  { %5042 = vmatprep.subr.bf16.mxu0 %v5993_v0 }
 0x1ad   :  { %5035 = vmatpush3.bf16.msra.mxu1 %v5507_v39 }
 0x1ae   :  { %5048 = vmatprep.subr.bf16.mxu1 %v5993_v0 }
 0x1af   :  { %5043 = vmatpush3.bf16.msra.mxu0 %v213_v16 }
 0x1b0   :  { %5058 = vmatprep.subr.bf16.mxu0 %v5993_v0 }
 0x1b2   :  { %5045 = vmatmul.mubr.msk.bf16.vlgmr.msra.gmra.mrb[12].mxu0 %vm221_vm1, %v5504_v36  ;;  %v5539_v36 = vld [vmem:[%s7182_s24 + $0xf0] sm:$0xff]  }
 0x1b3   :  { %5060 = vmatprep.mubr.msk.bf16.mxu0 %vm5994_vm0, %v5993_v0 }
 0x275   :  { %v389_v40 = vpop.f32.mrb[4].mxu0  ;;  %v451_v41 = vpop.f32.mrb[4].mxu1 }
 0x276   :  { %v452_v42 = vadd.f32 %v451_v41, %v389_v40  ;;  %v5010_v43 = vpop.f32.mrb[5].mxu0  ;;  %v5020_v44 = vpop.f32.mrb[5].mxu1 }
 0x277   :  { %v392_v45 = vpop.f32.mrb[6].mxu0  ;;  %v454_v46 = vpop.f32.mrb[6].mxu1 }
 0x278   :  { %v455_v47 = vadd.f32 %v454_v46, %v392_v45  ;;  %v5011_v48 = vpop.f32.mrb[7].mxu0  ;;  %v5021_v49 = vpop.f32.mrb[7].mxu1 }
 0x27d   :  { %v503_v50 = vpop.f32.mrb[8].mxu0 }
 0x27e   :  { %v5028_v51 = vpop.f32.mrb[9].mxu0 }
 0x27f   :  { %v506_v52 = vpop.f32.mrb[10].mxu0 }
 0x280   :  { %v510_v54 = vpack.c.bf16 %v506_v52, %v503_v50  ;;  %v5029_v55 = vpop.f32.mrb[11].mxu0 }
 0x282   :  { %5037 = vmatmul.mubr.msk.bf16.vlgmr.msra.gmra.mrb[8].mxu1 %vm351_vm2, %v510_v54 }
 0x283   :  { %5049 = vmatpush3.bf16.msra.mxu1 %v5508_v53  ;;  %5054 = vmatprep.mubr.msk.bf16.mxu1 %vm5994_vm0, %v5993_v0 }
 0x284   :  { %5050 = vmatprep.subr.bf16.mxu1 %v5993_v0 }
 0x285   :  { %v627_v57 = vpop.f32.mrb[12].mxu0 }
 0x286   :  { %v5046_v58 = vpop.f32.mrb[13].mxu0 }
 0x287   :  { %5051 = vmatpush3.bf16.msra.mxu1 %v5509_v56  ;;  %v630_v59 = vpop.f32.mrb[14].mxu0  ;;  %v5521_v58 = vld [vmem:[%s7182_s24 + $0x10] sm:$0xff]  }
 0x288   :  { %v634_v61 = vpack.c.bf16 %v630_v59, %v627_v57  ;;  %v5047_v62 = vpop.f32.mrb[15].mxu0  ;;  %5052 = vmatprep.subr.bf16.mxu1 %v5993_v0  ;;  %v5520_v57 = vld [vmem:[%s7182_s24 + $0x8] sm:$0xff]   ;;  %v5522_v59 = vld [vmem:[%s7182_s24 + $0x18] sm:$0xff]  }
 0x289   :  { %v5525_v62 = vld [vmem:[%s7182_s24 + $0x30] sm:$0xff]  }
 0x28b   :  { %5053 = vmatpush3.bf16.msra.mxu1 %v5510_v60  ;;  %v5523_v60 = vld [vmem:[%s7182_s24 + $0x20] sm:$0xff]  }
 0x28c   :  { %5110 = vmatprep.subr.bf16.mxu1 %v5993_v0 }
 0x28e   :  { %5055 = vmatmul.mubr.msk.bf16.vlgmr.msra.gmra.mrb[12].mxu1 %vm351_vm2, %v634_v61  ;;  %v5524_v61 = vld [vmem:[%s7182_s24 + $0x28] sm:$0xff]  }
 0x28f   :  { %5112 = vmatprep.mubr.msk.bf16.mxu1 %vm5994_vm0, %v5993_v0 }
 0x355   :  { %v573_v63 = vpop.f32.mrb[8].mxu1 }
 0x356   :  { %v580_v1 = vadd.f32 %v573_v63, %v452_v42  ;;  %v5038_v2 = vpop.f32.mrb[9].mxu1  ;;  %v5526_v63 = vld [vmem:[%s7182_s24 + $0x38] sm:$0xff]  }
 0x357   :  { %v576_v3 = vpop.f32.mrb[10].mxu1 }
 0x358   :  { %v581_v4 = vadd.f32 %v576_v3, %v455_v47  ;;  %v5039_v5 = vpop.f32.mrb[11].mxu1  ;;  %v5519_v47 = vld [vmem:[%s7182_s24] sm:$0xff]   ;;  %v5530_v3 = vld [vmem:[%s7182_s24 + $0x88] sm:$0xff]  }
 0x359   :  { %v5534_v5 = vld [vmem:[%s7182_s24 + $0x98] sm:$0xff]  }
 0x361   :  { %v697_v6 = vpop.f32.mrb[12].mxu1 }
 0x362   :  { %v704_v8 = vadd.f32 %v697_v6, %v580_v1  ;;  %v5056_v9 = vpop.f32.mrb[13].mxu1  ;;  %v5528_v1 = vld [vmem:[%s7182_s24 + $0x80] sm:$0xff]  }
 0x363   :  { %v700_v10 = vpop.f32.mrb[14].mxu1  ;;  %v5536_v6 = vld [vmem:[%s7182_s24 + $0xa0] sm:$0xff]   ;;  %v5542_v9 = vld [vmem:[%s7182_s24 + $0xb8] sm:$0xff]  }
 0x364   :  { %v713_v11 = vadd.f32 %v4339_v7, %v704_v8  ;;  %v705_v12 = vadd.f32 %v700_v10, %v581_v4  ;;  %v5057_v13 = vpop.f32.mrb[15].mxu1  ;;  %v5532_v4 = vld [vmem:[%s7182_s24 + $0x90] sm:$0xff]  }
 0x365   :  { %v5540_v8 = vld [vmem:[%s7182_s24 + $0xb0] sm:$0xff]  }
 0x366   :  { %v714_v14 = vadd.f32 %v4339_v7, %v705_v12  ;;  %v715_v15 = vmax.f32 %v713_v11, 0.0  ;;  %v5538_v7 = vld [vmem:[%s7182_s24 + $0xa8] sm:$0xff]   ;;  %v5543_v11 = vld [vmem:[%s7136_s10] sm:$0xff]  }
 0x367   :  { %v5551_v12 = vld [vmem:[%s7137_s11 + $0x20] sm:$0xff]  }
 0x368   :  { %v716_v16 = vmax.f32 %v714_v14, 0.0 }
 0x36a   :  { %v717_v17 = vpack.c.bf16 %v716_v16, %v715_v15 }
 0x36c   :  { %5059 = vmatpush3.bf16.msra.mxu0 %v717_v17  ;;  %5111 = vmatpush3.bf16.msra.mxu1 %v717_v17 }
 0x36d   :  { %5064 = vmatprep.subr.bf16.mxu0 %v5993_v0  ;;  %5136 = vmatprep.subr.bf16.mxu1 %v5993_v0 }
 0x36f   :  { %5061 = vmatmul.mubr.msk.bf16.vlgmr.msra.gmra.mrb[16].mxu0 %vm719_vm3, %v718_v18  ;;  %5113 = vmatmul.mubr.msk.bf16.vlgmr.msra.gmra.mrb[16].mxu1 %vm719_vm3, %v1020_v19 }
 0x370   :  { %5065 = vmatpush3.bf16.msra.mxu0 %v717_v17  ;;  %5137 = vmatpush3.bf16.msra.mxu1 %v717_v17 }
 0x371   :  { %5066 = vmatprep.mubr.msk.bf16.mxu0 %vm5994_vm0, %v5993_v0  ;;  %5138 = vmatprep.mubr.msk.bf16.mxu1 %vm5994_vm0, %v5993_v0 }
 0x372   :  { %5070 = vmatprep.subr.bf16.mxu0 %v5993_v0  ;;  %5142 = vmatprep.subr.bf16.mxu1 %v5993_v0 }
 0x377   :  { %5067 = vmatmul.mubr.msk.bf16.vlgmr.msra.gmra.mrb[20].mxu0 %vm719_vm3, %v781_v20  ;;  %5139 = vmatmul.mubr.msk.bf16.vlgmr.msra.gmra.mrb[20].mxu1 %vm719_vm3, %v1172_v21 }
 0x378   :  { %5071 = vmatpush3.bf16.msra.mxu0 %v5511_v22  ;;  %5086 = vmatprep.mubr.msk.bf16.mxu0 %vm5994_vm0, %v5993_v0 }
 0x379   :  { %5072 = vmatprep.subr.bf16.mxu0 %v5993_v0  ;;  %5158 = vmatprep.mubr.msk.bf16.mxu1 %vm5994_vm0, %v5993_v0 }
 0x37a   :  { %5143 = vmatpush3.bf16.msra.mxu1 %v5527_v30 }
 0x37b   :  { %5144 = vmatprep.subr.bf16.mxu1 %v5993_v0 }
 0x37c   :  { %5073 = vmatpush3.bf16.msra.mxu0 %v5512_v23 }
 0x37d   :  { %5074 = vmatprep.subr.bf16.mxu0 %v5993_v0 }
 0x37e   :  { %5145 = vmatpush3.bf16.msra.mxu1 %v5529_v31 }
 0x37f   :  { %5146 = vmatprep.subr.bf16.mxu1 %v5993_v0 }
 0x380   :  { %5075 = vmatpush3.bf16.msra.mxu0 %v5513_v24 }
 0x381   :  { %5076 = vmatprep.subr.bf16.mxu0 %v5993_v0 }
 0x382   :  { %5147 = vmatpush3.bf16.msra.mxu1 %v5531_v32 }
 0x383   :  { %5148 = vmatprep.subr.bf16.mxu1 %v5993_v0 }
 0x384   :  { %5077 = vmatpush3.bf16.msra.mxu0 %v5514_v25 }
 0x385   :  { %5078 = vmatprep.subr.bf16.mxu0 %v5993_v0 }
 0x386   :  { %5149 = vmatpush3.bf16.msra.mxu1 %v5533_v33 }
 0x387   :  { %5150 = vmatprep.subr.bf16.mxu1 %v5993_v0 }
 0x388   :  { %5079 = vmatpush3.bf16.msra.mxu0 %v5515_v26 }
 0x389   :  { %5080 = vmatprep.subr.bf16.mxu0 %v5993_v0 }
 0x38a   :  { %5151 = vmatpush3.bf16.msra.mxu1 %v5535_v34 }
 0x38b   :  { %5152 = vmatprep.subr.bf16.mxu1 %v5993_v0 }
 0x38c   :  { %5081 = vmatpush3.bf16.msra.mxu0 %v5516_v27 }
 0x38d   :  { %5082 = vmatprep.subr.bf16.mxu0 %v5993_v0 }
 0x38e   :  { %5153 = vmatpush3.bf16.msra.mxu1 %v5537_v35 }
 0x38f   :  { %5154 = vmatprep.subr.bf16.mxu1 %v5993_v0 }
 0x390   :  { %5083 = vmatpush3.bf16.msra.mxu0 %v5517_v28 }
 0x391   :  { %5084 = vmatprep.subr.bf16.mxu0 %v5993_v0 }
 0x392   :  { %5155 = vmatpush3.bf16.msra.mxu1 %v5539_v36 }
 0x393   :  { %5156 = vmatprep.subr.bf16.mxu1 %v5993_v0 }
 0x394   :  { %5085 = vmatpush3.bf16.msra.mxu0 %v5518_v29  ;;  %v4424_v29 = vld [vmem:[%s7135_s9] ss:$0 sm:$0xff] }
 0x395   :  { %5090 = vmatprep.subr.bf16.mxu0 %v5993_v0 }
 0x396   :  { %5157 = vmatpush3.bf16.msra.mxu1 %v5541_v37  ;;  %v5544_v37 = vld [vmem:[%s7136_s10 + $0x8] sm:$0xff]  }
 0x397   :  { %5174 = vmatprep.subr.bf16.mxu1 %v5551_v12 }
 0x442   :  { %v757_v38 = vpop.f32.mrb[16].mxu0  ;;  %v6414_v39 = vpop.f32.mrb[16].mxu1 }
 0x443   :  { %v5062_v40 = vpop.f32.mrb[17].mxu0  ;;  %v5114_v41 = vpop.f32.mrb[17].mxu1  ;;  %v763_v2 = vpack.c.bf16 %v757_v38, %v757_v38  ;;  %v1064_v10 = vpack.c.bf16 %v6414_v39, %v6414_v39  ;;  %v5545_v38 = vld [vmem:[%s7136_s10 + $0x10] sm:$0xff]   ;;  %v5546_v39 = vld [vmem:[%s7136_s10 + $0x18] sm:$0xff]  }
 0x444   :  { %v760_v42 = vpop.f32.mrb[18].mxu0  ;;  %v1061_v43 = vpop.f32.mrb[18].mxu1  ;;  %v5547_v40 = vld [vmem:[%s7136_s10 + $0x20] sm:$0xff]   ;;  %v5548_v41 = vld [vmem:[%s7136_s10 + $0x28] sm:$0xff]  }
 0x445   :  { %v5063_v44 = vpop.f32.mrb[19].mxu0  ;;  %v5115_v45 = vpop.f32.mrb[19].mxu1  ;;  %v5549_v42 = vld [vmem:[%s7136_s10 + $0x30] sm:$0xff]   ;;  %v5550_v43 = vld [vmem:[%s7136_s10 + $0x38] sm:$0xff]  }
 0x446   :  { %v5552_v44 = vld [vmem:[%s7137_s11 + $0x28] sm:$0xff]   ;;  %v5553_v45 = vld [vmem:[%s7137_s11 + $0x30] sm:$0xff]  }
 0x44a   :  { %v819_v46 = vpop.f32.mrb[20].mxu0  ;;  %v1210_v48 = vpop.f32.mrb[20].mxu1 }
 0x44b   :  { %v825_v49 = vpack.c.bf16 %v819_v46, %v819_v46  ;;  %v5068_v50 = vpop.f32.mrb[21].mxu0  ;;  %v1216_v51 = vpack.c.bf16 %v1210_v48, %v1210_v48  ;;  %v5140_v52 = vpop.f32.mrb[21].mxu1  ;;  %v5554_v46 = vld [vmem:[%s7137_s11 + $0x38] sm:$0xff]  }
 0x44c   :  { %v822_v53 = vpop.f32.mrb[22].mxu0  ;;  %v1213_v54 = vpop.f32.mrb[22].mxu1 }
 0x44d   :  { %v5069_v55 = vpop.f32.mrb[23].mxu0  ;;  %5087 = vmatmul.mubr.bf16.vlgmr.msra.gmra.mrb[24].mxu0 %v825_v49  ;;  %v5141_v56 = vpop.f32.mrb[23].mxu1  ;;  %5159 = vmatmul.mubr.bf16.vlgmr.msra.gmra.mrb[24].mxu1 %v1216_v51 }
 0x44e   :  { %5091 = vmatpush3.bf16.msra.mxu0 %v5519_v47  ;;  %5106 = vmatprep.mubr.msk.bf16.mxu0 %vm5994_vm0, %v5993_v0  ;;  %v5555_v47 = vld [vmem:[%s7137_s11] sm:$0xff]  }
 0x44f   :  { %5092 = vmatprep.subr.bf16.mxu0 %v5993_v0  ;;  %5175 = vmatpush3.bf16.msra.mxu1 %v5551_v12 }
 0x450   :  { %5176 = vmatprep.subr.bf16.mxu1 %v5552_v44 }
 0x452   :  { %5093 = vmatpush3.bf16.msra.mxu0 %v5520_v57 }
 0x453   :  { %5094 = vmatprep.subr.bf16.mxu0 %v5993_v0  ;;  %5177 = vmatpush3.bf16.msra.mxu1 %v5552_v44 }
 0x454   :  { %5178 = vmatprep.subr.bf16.mxu1 %v5553_v45 }
 0x456   :  { %5095 = vmatpush3.bf16.msra.mxu0 %v5521_v58 }
 0x457   :  { %5096 = vmatprep.subr.bf16.mxu0 %v5993_v0  ;;  %5179 = vmatpush3.bf16.msra.mxu1 %v5553_v45 }
 0x458   :  { %5180 = vmatprep.subr.bf16.mxu1 %v5554_v46 }
 0x45a   :  { %5097 = vmatpush3.bf16.msra.mxu0 %v5522_v59 }
 0x45b   :  { %5098 = vmatprep.subr.bf16.mxu0 %v5993_v0  ;;  %5181 = vmatpush3.bf16.msra.mxu1 %v5554_v46 }
 0x45c   :  { %5186 = vmatprep.subr.bf16.mxu1 %v5555_v47 }
 0x45e   :  { %5099 = vmatpush3.bf16.msra.mxu0 %v5523_v60  ;;  %v5556_v60 = vld [vmem:[%s7137_s11 + $0x8] sm:$0xff]  }
 0x45f   :  { %5100 = vmatprep.subr.bf16.mxu0 %v5993_v0 }
 0x462   :  { %5101 = vmatpush3.bf16.msra.mxu0 %v5524_v61 }
 0x463   :  { %5102 = vmatprep.subr.bf16.mxu0 %v5993_v0 }
 0x466   :  { %5103 = vmatpush3.bf16.msra.mxu0 %v5525_v62  ;;  %v5557_v62 = vld [vmem:[%s7137_s11 + $0x10] sm:$0xff]  }
 0x467   :  { %5104 = vmatprep.subr.bf16.mxu0 %v5993_v0 }
 0x46a   :  { %5105 = vmatpush3.bf16.msra.mxu0 %v5526_v63 }
 0x46b   :  { %5116 = vmatprep.subr.bf16.mxu0 %v5993_v0 }
 0x46d   :  { %5107 = vmatmul.mubr.bf16.vlgmr.msra.gmra.mrb[28].mxu0 %v763_v2 }
 0x46e   :  { %5117 = vmatpush3.bf16.msra.mxu0 %v5528_v1  ;;  %5132 = vmatprep.mubr.msk.bf16.mxu0 %vm5994_vm0, %v5993_v0 }
 0x46f   :  { %5118 = vmatprep.subr.bf16.mxu0 %v5993_v0 }
 0x472   :  { %5119 = vmatpush3.bf16.msra.mxu0 %v5530_v3 }
 0x473   :  { %5120 = vmatprep.subr.bf16.mxu0 %v5993_v0 }
 0x476   :  { %5121 = vmatpush3.bf16.msra.mxu0 %v5532_v4 }
 0x477   :  { %5122 = vmatprep.subr.bf16.mxu0 %v5993_v0 }
 0x47a   :  { %5123 = vmatpush3.bf16.msra.mxu0 %v5534_v5  ;;  %v5558_v5 = vld [vmem:[%s7137_s11 + $0x18] sm:$0xff]  }
 0x47b   :  { %5124 = vmatprep.subr.bf16.mxu0 %v5993_v0 }
 0x47e   :  { %5125 = vmatpush3.bf16.msra.mxu0 %v5536_v6 }
 0x47f   :  { %5126 = vmatprep.subr.bf16.mxu0 %v5993_v0 }
 0x482   :  { %5127 = vmatpush3.bf16.msra.mxu0 %v5538_v7  ;;  %v5559_v7 = vld [vmem:[%s7137_s11 + $0x40] sm:$0xff]  }
 0x483   :  { %5128 = vmatprep.subr.bf16.mxu0 %v5993_v0 }
 0x486   :  { %5129 = vmatpush3.bf16.msra.mxu0 %v5540_v8 }
 0x487   :  { %5130 = vmatprep.subr.bf16.mxu0 %v5993_v0 }
 0x48a   :  { %5131 = vmatpush3.bf16.msra.mxu0 %v5542_v9 }
 0x48d   :  { %5133 = vmatmul.mubr.bf16.vlgmr.msra.gmra.mrb[32].mxu0 %v1064_v10 }
 0x48e   :  { %5164 = vmatprep.mubr.msk.bf16.mxu0 %vm1347_vm4, %v5543_v11 }
 0x520   :  { %v925_v13 = vpop.f32.mrb[24].mxu0  ;;  %v1316_v14 = vpop.f32.mrb[24].mxu1 }
 0x521   :  { %v5088_v15 = vpop.f32.mrb[25].mxu0  ;;  %v5160_v16 = vpop.f32.mrb[25].mxu1 }
 0x522   :  { %v928_v17 = vpop.f32.mrb[26].mxu0  ;;  %v1319_v18 = vpop.f32.mrb[26].mxu1  ;;  %v5562_v15 = vld [vmem:[%s7137_s11 + $0x58] sm:$0xff]   ;;  %v5563_v16 = vld [vmem:[%s7137_s11 + $0x60] sm:$0xff]  }
 0x523   :  { %v5089_v19 = vpop.f32.mrb[27].mxu0  ;;  %v5161_v20 = vpop.f32.mrb[27].mxu1  ;;  %v5564_v17 = vld [vmem:[%s7137_s11 + $0x68] sm:$0xff]   ;;  %v5565_v18 = vld [vmem:[%s7137_s11 + $0x70] sm:$0xff]  }
 0x524   :  { %v5566_v19 = vld [vmem:[%s7137_s11 + $0x78] sm:$0xff]   ;;  %v4501_v20 = vld [vmem:[%s7138_s12] ss:$0 sm:$0xff] }
 0x540   :  { %v1013_v21 = vpop.f32.mrb[28].mxu0 }
 0x541   :  { %v1014_v22 = vadd.f32 %v1013_v21, %v925_v13  ;;  %v5108_v23 = vpop.f32.mrb[29].mxu0  ;;  %v5560_v13 = vld [vmem:[%s7137_s11 + $0x48] sm:$0xff]  }
 0x542   :  { %v1016_v24 = vpop.f32.mrb[30].mxu0 }
 0x543   :  { %v5109_v25 = vpop.f32.mrb[31].mxu0 }
 0x544   :  { %v2000_v25 = vld [vmem:[#allocation5] sm:$0xff] }
 0x560   :  { %v1164_v26 = vpop.f32.mrb[32].mxu0 }
 0x561   :  { %v1170_v27 = vadd.f32 %v1164_v26, %v1014_v22  ;;  %v5134_v28 = vpop.f32.mrb[33].mxu0  ;;  %v2002_v22 = vld [vmem:[#allocation5 + $0x10] sm:$0xff] }
 0x562   :  { %v1167_v30 = vpop.f32.mrb[34].mxu0  ;;  %v2003_v28 = vld [vmem:[#allocation5 + $0x18] sm:$0xff] }
 0x563   :  { %v1322_v31 = vadd.f32 %v1316_v14, %v1170_v27  ;;  %v5135_v32 = vpop.f32.mrb[35].mxu0  ;;  %v5561_v14 = vld [vmem:[%s7137_s11 + $0x50] sm:$0xff]  }
 0x565   :  { %v1330_v33 = vadd.f32 %v4424_v29, %v1322_v31  ;;  %v2001_v31 = vld [vmem:[#allocation5 + $0x8] sm:$0xff] }
 0x567   :  { %v1331_v34 = vmax.f32 %v1330_v33, 0.0 }
 0x569   :  { %v1332_v35 = vpack.c.bf16 %v1331_v34, %v1331_v34 }
 0x56b   :  { %5474 = vmatprep.subr.msk.bf16.mxu0 %vm1354_vm5, %v1332_v35  ;;  %v1356_v36 = vsel %vm1354_vm5, %v1332_v35, 0 }
 0x56c   :  { %5163 = vmatpush3.bf16.msra.mxu0 %v1356_v36 }
 0x56d   :  { %5475 = vmatprep.subr.msk.bf16.mxu0 %vm1354_vm5, %v1332_v35 }
 0x56f   :  { %5165 = vmatmul.mubr.msk.bf16.vlgmr.msra.gmra.mrb[36].mxu0 %vm1347_vm4, %v5544_v37 }
 0x570   :  { %5169 = vmatpush3.bf16.msra.mxu0 %v1356_v36  ;;  %5170 = vmatprep.mubr.msk.bf16.mxu0 %vm1347_vm4, %v5545_v38 }
 0x571   :  { %5476 = vmatprep.subr.msk.bf16.mxu0 %vm1354_vm5, %v1332_v35 }
 0x577   :  { %5171 = vmatmul.mubr.msk.bf16.vlgmr.msra.gmra.mrb[40].mxu0 %vm1347_vm4, %v5546_v39 }
 0x578   :  { %5199 = vmatpush3.bf16.msra.mxu0 %v1356_v36  ;;  %5200 = vmatprep.mubr.msk.bf16.mxu0 %vm1347_vm4, %v5547_v40 }
 0x579   :  { %5477 = vmatprep.subr.msk.bf16.mxu0 %vm1354_vm5, %v1332_v35 }
 0x57f   :  { %5201 = vmatmul.mubr.msk.bf16.vlgmr.msra.gmra.mrb[44].mxu0 %vm1347_vm4, %v5548_v41 }
 0x580   :  { %5217 = vmatpush3.bf16.msra.mxu0 %v1356_v36  ;;  %5218 = vmatprep.mubr.msk.bf16.mxu0 %vm1347_vm4, %v5549_v42 }
 0x581   :  { %5234 = vmatprep.subr.bf16.mxu0 %v5993_v0 }
 0x587   :  { %5219 = vmatmul.mubr.msk.bf16.vlgmr.msra.gmra.mrb[48].mxu0 %vm1347_vm4, %v5550_v43 }
 0x588   :  { %5238 = vmatprep.mubr.msk.bf16.mxu0 %vm5994_vm0, %v5993_v0 }
 0x642   :  { %v5166_v48 = vpop.f32.mrb[36].mxu0 }
 0x643   :  { %v1392_v49 = vpop.f32.mrb[37].mxu0 }
 0x644   :  { %v5167_v50 = vpop.f32.mrb[38].mxu0 }
 0x645   :  { %v1408_v51 = vpack.c.bf16 %v5167_v50, %v5166_v48  ;;  %v1395_v52 = vpop.f32.mrb[39].mxu0 }
 0x646   :  { %v1407_v53 = vpack.c.bf16 %v1395_v52, %v1392_v49 }
 0x64a   :  { %v5172_v54 = vpop.f32.mrb[40].mxu0 }
 0x64b   :  { %v1472_v55 = vpop.f32.mrb[41].mxu0 }
 0x64c   :  { %v5173_v56 = vpop.f32.mrb[42].mxu0 }
 0x64d   :  { %v1488_v57 = vpack.c.bf16 %v5173_v56, %v5172_v54  ;;  %v1475_v58 = vpop.f32.mrb[43].mxu0 }
 0x64e   :  { %v1487_v59 = vpack.c.bf16 %v1475_v58, %v1472_v55 }
 0x650   :  { %5182 = vmatprep.mubr.msk.bf16.mxu1 %vm1522_vm6, %v1487_v59 }
 0x651   :  { %5183 = vmatmul.mubr.msk.bf16.vlgmr.msra.gmra.mrb[28].mxu1 %vm1522_vm6, %v1488_v57 }
 0x652   :  { %5187 = vmatpush3.bf16.msra.mxu1 %v5555_v47  ;;  %5194 = vmatprep.mubr.msk.bf16.mxu1 %vm1522_vm6, %v1407_v53  ;;  %v5202_v61 = vpop.f32.mrb[44].mxu0 }
 0x653   :  { %5188 = vmatprep.subr.bf16.mxu1 %v5556_v60  ;;  %v1712_v63 = vpop.f32.mrb[45].mxu0 }
 0x654   :  { %v5203_v1 = vpop.f32.mrb[46].mxu0 }
 0x655   :  { %v1728_v2 = vpack.c.bf16 %v5203_v1, %v5202_v61  ;;  %v1715_v3 = vpop.f32.mrb[47].mxu0 }
 0x656   :  { %5189 = vmatpush3.bf16.msra.mxu1 %v5556_v60  ;;  %v1727_v4 = vpack.c.bf16 %v1715_v3, %v1712_v63 }
 0x657   :  { %5190 = vmatprep.subr.bf16.mxu1 %v5557_v62 }
 0x65a   :  { %5191 = vmatpush3.bf16.msra.mxu1 %v5557_v62  ;;  %v5220_v6 = vpop.f32.mrb[48].mxu0 }
 0x65b   :  { %5192 = vmatprep.subr.bf16.mxu1 %v5558_v5  ;;  %v1876_v8 = vpop.f32.mrb[49].mxu0 }
 0x65c   :  { %v5221_v9 = vpop.f32.mrb[50].mxu0 }
 0x65d   :  { %v1892_v10 = vpack.c.bf16 %v5221_v9, %v5220_v6  ;;  %v1879_v11 = vpop.f32.mrb[51].mxu0 }
 0x65e   :  { %5193 = vmatpush3.bf16.msra.mxu1 %v5558_v5  ;;  %v1891_v12 = vpack.c.bf16 %v1879_v11, %v1876_v8 }
 0x65f   :  { %5204 = vmatprep.subr.bf16.mxu1 %v5559_v7 }
 0x661   :  { %5195 = vmatmul.mubr.msk.bf16.vlgmr.msra.gmra.mrb[28].mxu1 %vm1522_vm6, %v1408_v51 }
 0x662   :  { %5205 = vmatpush3.bf16.msra.mxu1 %v5559_v7  ;;  %5212 = vmatprep.mubr.msk.bf16.mxu1 %vm1522_vm6, %v1727_v4 }
 0x663   :  { %5206 = vmatprep.subr.bf16.mxu1 %v5560_v13 }
 0x666   :  { %5207 = vmatpush3.bf16.msra.mxu1 %v5560_v13 }
 0x667   :  { %5208 = vmatprep.subr.bf16.mxu1 %v5561_v14 }
 0x66a   :  { %5209 = vmatpush3.bf16.msra.mxu1 %v5561_v14 }
 0x66b   :  { %5210 = vmatprep.subr.bf16.mxu1 %v5562_v15 }
 0x66e   :  { %5211 = vmatpush3.bf16.msra.mxu1 %v5562_v15 }
 0x66f   :  { %5222 = vmatprep.subr.bf16.mxu1 %v5563_v16 }
 0x671   :  { %5213 = vmatmul.mubr.msk.bf16.vlgmr.msra.gmra.mrb[28].mxu1 %vm1522_vm6, %v1728_v2 }
 0x672   :  { %5223 = vmatpush3.bf16.msra.mxu1 %v5563_v16  ;;  %5230 = vmatprep.mubr.msk.bf16.mxu1 %vm1522_vm6, %v1891_v12  ;;  %v2058_v16 = vld [vmem:[#allocation10] sm:$0xf] }
 0x673   :  { %5224 = vmatprep.subr.bf16.mxu1 %v5564_v17 }
 0x676   :  { %5225 = vmatpush3.bf16.msra.mxu1 %v5564_v17  ;;  %v2108_v17 = vld [vmem:[#allocation10 + $0x4] sm:$0xf] }
 0x677   :  { %5226 = vmatprep.subr.bf16.mxu1 %v5565_v18 }
 0x67a   :  { %5227 = vmatpush3.bf16.msra.mxu1 %v5565_v18  ;;  %v5567_v18 = vld [vmem:[#allocation11 + $0x10] sm:$0xff]  }
 0x67b   :  { %5228 = vmatprep.subr.bf16.mxu1 %v5566_v19 }
 0x67e   :  { %5229 = vmatpush3.bf16.msra.mxu1 %v5566_v19  ;;  %v5568_v19 = vld [vmem:[#allocation11 + $0x18] sm:$0xff]  }
 0x67f   :  { %5282 = vmatprep.subr.bf16.mxu1 %v5993_v0 }
 0x681   :  { %5231 = vmatmul.mubr.msk.bf16.vlgmr.msra.gmra.mrb[28].mxu1 %vm1522_vm6, %v1892_v10 }
 0x682   :  { %5286 = vmatprep.mubr.msk.bf16.mxu1 %vm5994_vm0, %v5993_v0 }
 0x754   :  { %v5232_v21 = vpop.f32.mrb[28].mxu1 }
 0x755   :  { %v1994_v23 = vadd.f32 %v5232_v21, %v4501_v20  ;;  %v1966_v24 = vpop.f32.mrb[29].mxu1 }
 0x756   :  { %v1992_v26 = vadd.f32 %v4501_v20, %v1966_v24  ;;  %v5233_v27 = vpop.f32.mrb[30].mxu1 }
 0x757   :  { %1998 = vst.msk [vmem:[#allocation17 + $0x10] sm:$0xff] %vm221_vm1, %v1994_v23  ;;  %v1995_v29 = vadd.f32 %v5233_v27, %v4501_v20  ;;  %v1969_v30 = vpop.f32.mrb[31].mxu1  ;;  %v2006_v32 = vadd.f32 %v2002_v22, %v1994_v23 }
 0x758   :  { %1996 = vst.msk [vmem:[#allocation17] sm:$0xff] %vm221_vm1, %v1992_v26  ;;  %v1993_v33 = vadd.f32 %v4501_v20, %v1969_v30  ;;  %v2004_v34 = vadd.f32 %v2000_v25, %v1992_v26  ;;  %v2376_v20 = vld [vmem:[#allocation10 + $0xc] sm:$0xf]  ;;  %v5569_v26 = vld [vmem:[#allocation11] sm:$0xff]  }
 0x759   :  { %1999 = vst.msk [vmem:[#allocation17 + $0x18] sm:$0xff] %vm221_vm1, %v1995_v29  ;;  %v2007_v35 = vadd.f32 %v2003_v28, %v1995_v29  ;;  %v2010_v36 = vmul.f32 1.1111112, %v2006_v32 }
 0x75a   :  { %1997 = vst.msk [vmem:[#allocation17 + $0x8] sm:$0xff] %vm221_vm1, %v1993_v33  ;;  %v2005_v37 = vadd.f32 %v2001_v31, %v1993_v33  ;;  %v2008_v38 = vmul.f32 1.1111112, %v2004_v34  ;;  %v5570_v31 = vld [vmem:[#allocation11 + $0x8] sm:$0xff]   ;;  %v2269_v33 = vld [vmem:[#allocation10 + $0x8] sm:$0xf] }
 0x75b   :  { %v2018_v39 = vsel %vm221_vm1, %v2010_v36, -inf  ;;  %v2011_v40 = vmul.f32 1.1111112, %v2007_v35  ;;  %v5571_v34 = vld [vmem:[#allocation11 + $0x20] sm:$0xff]   ;;  %v5572_v35 = vld [vmem:[#allocation11 + $0x28] sm:$0xff]  }
 0x75c   :  { %2019 = vmax.xlane.f32.xlu1 %v2018_v39  ;;  %v2012_v41 = vsel %vm221_vm1, %v2008_v38, -inf  ;;  %v2009_v42 = vmul.f32 1.1111112, %v2005_v37 }
 0x75d   :  { %2013 = vmax.xlane.f32.xlu0 %v2012_v41  ;;  %v2021_v43 = vsel %vm221_vm1, %v2011_v40, -inf  ;;  %v5573_v41 = vld [vmem:[#allocation11 + $0x30] sm:$0xff]  }
 0x75e   :  { %v2015_v44 = vsel %vm221_vm1, %v2009_v42, -inf }
 0x760   :  { %2022 = vmax.xlane.f32.xlu1 %v2021_v43 }
 0x761   :  { %2016 = vmax.xlane.f32.xlu0 %v2015_v44 }
 0x7e9   :  { %v2020_v45 = vpop.xlane.xlu1 %2019 }
 0x7ea   :  { %v2026_v46 = vsub.f32 %v2010_v36, %v2020_v45  ;;  %v2014_v47 = vpop.xlane.xlu0 %2013 }
 0x7eb   :  { %v2024_v48 = vsub.f32 %v2008_v38, %v2014_v47 }
 0x7ec   :  { %v2032_v49 = vmul.f32 1.442695, %v2026_v46  ;;  %v5574_v46 = vld [vmem:[#allocation11 + $0x38] sm:$0xff]  }
 0x7ed   :  { %v2028_v50 = vmul.f32 1.442695, %v2024_v48  ;;  %v2023_v51 = vpop.xlane.xlu1 %2022 }
 0x7ee   :  { %v2027_v52 = vsub.f32 %v2011_v40, %v2023_v51  ;;  %v2017_v53 = vpop.xlane.xlu0 %2016 }
 0x7ef   :  { %5731 = vpow2.f32 %v2028_v50  ;;  %v2025_v54 = vsub.f32 %v2009_v42, %v2017_v53 }
 0x7f0   :  { %5733 = vpow2.f32 %v2032_v49  ;;  %v2034_v55 = vmul.f32 1.442695, %v2027_v52 }
 0x7f1   :  { %v2030_v56 = vmul.f32 1.442695, %v2025_v54  ;;  %v5575_v54 = vld [vmem:[%s7141_s15] sm:$0xff]  }
 0x7f3   :  { %5735 = vpow2.f32 %v2030_v56  ;;  %v5577_v56 = vld [vmem:[%s7142_s16 + $0x40] sm:$0xff]  }
 0x7f4   :  { %5737 = vpow2.f32 %v2034_v55  ;;  %v5576_v55 = vld [vmem:[%s7141_s15 + $0x8] sm:$0xff]  }
 0x7f9   :  { %v5732_v57 = vpop.eup %5731 }
 0x7fa   :  { %v2036_v58 = vsel %vm221_vm1, %v5732_v57, 0.0  ;;  %v5734_v59 = vpop.eup %5733 }
 0x7fb   :  { %2037 = vadd.xlane.f32.xlu0 %v2036_v58  ;;  %v2042_v61 = vsel %vm221_vm1, %v5734_v59, 0.0  ;;  %v5579_v58 = vld [vmem:[%s7142_s16 + $0x48] sm:$0xff]  }
 0x7fd   :  { %v5736_v60 = vpop.eup %5735 }
 0x7fe   :  { %v2039_v62 = vsel %vm221_vm1, %v5736_v60, 0.0  ;;  %v5738_v63 = vpop.eup %5737 }
 0x7ff   :  { %2043 = vadd.xlane.f32.xlu0 %v2042_v61  ;;  %2040 = vadd.xlane.f32.xlu1 %v2039_v62  ;;  %v2045_v1 = vsel %vm221_vm1, %v5738_v63, 0.0  ;;  %v5582_v61 = vld [vmem:[%s7142_s16 + $0x10] sm:$0xff]   ;;  %v5583_v62 = vld [vmem:[%s7142_s16 + $0x58] sm:$0xff]  }
 0x803   :  { %2046 = vadd.xlane.f32.xlu1 %v2045_v1  ;;  %v5585_v1 = vld [vmem:[%s7142_s16 + $0x60] sm:$0xff]  }
 0x888   :  { %v2038_v2 = vpop.xlane.xlu0 %2037 }
 0x889   :  { %5739 = vrcp.f32 %v2038_v2  ;;  %v5586_v2 = vld [vmem:[%s7142_s16 + $0x20] sm:$0xff]  }
 0x88c   :  { %v2041_v3 = vpop.xlane.xlu1 %2040  ;;  %v2044_v4 = vpop.xlane.xlu0 %2043 }
 0x88d   :  { %5741 = vrcp.f32 %v2041_v3  ;;  %v5587_v3 = vld [vmem:[%s7142_s16 + $0x68] sm:$0xff]  }
 0x88e   :  { %5743 = vrcp.f32 %v2044_v4  ;;  %v5588_v4 = vld [vmem:[%s7142_s16 + $0x28] sm:$0xff]  }
 0x890   :  { %v2047_v5 = vpop.xlane.xlu1 %2046 }
 0x891   :  { %5745 = vrcp.f32 %v2047_v5  ;;  %v5589_v5 = vld [vmem:[%s7142_s16 + $0x70] sm:$0xff]  }
 0x893   :  { %v5740_v6 = vpop.eup %5739 }
 0x894   :  { %v2052_v8 = vmul.f32 %v5740_v6, %v5732_v57  ;;  %v5578_v57 = vld [vmem:[%s7142_s16] sm:$0xff]   ;;  %v5590_v6 = vld [vmem:[%s7142_s16 + $0x30] sm:$0xff]  }
 0x897   :  { %v5742_v7 = vpop.eup %5741 }
 0x898   :  { %v2053_v9 = vmul.f32 %v5742_v7, %v5736_v60  ;;  %v5744_v10 = vpop.eup %5743  ;;  %v5581_v60 = vld [vmem:[%s7142_s16 + $0x50] sm:$0xff]   ;;  %v5591_v7 = vld [vmem:[%s7142_s16 + $0x78] sm:$0xff]  }
 0x899   :  { %v2054_v13 = vmul.f32 %v5744_v10, %v5734_v59  ;;  %v5580_v59 = vld [vmem:[%s7142_s16 + $0x8] sm:$0xff]  }
 0x89a   :  { %v2056_v11 = vpack.c.bf16 %v2053_v9, %v2052_v8  ;;  %v5592_v8 = vld [vmem:[%s7142_s16 + $0x38] sm:$0xff]  }
 0x89b   :  { %v5746_v12 = vpop.eup %5745 }
 0x89c   :  { %5235 = vmatpush3.bf16.msra.mxu0 %v2056_v11  ;;  %5283 = vmatpush3.bf16.msra.mxu1 %v2056_v11  ;;  %v2055_v14 = vmul.f32 %v5746_v12, %v5738_v63  ;;  %v5584_v63 = vld [vmem:[%s7142_s16 + $0x18] sm:$0xff]  }
 0x89d   :  { %5236 = vmatprep.subr.bf16.mxu0 %v5993_v0  ;;  %5284 = vmatprep.subr.bf16.mxu1 %v5993_v0 }
 0x89e   :  { %v2057_v15 = vpack.c.bf16 %v2055_v14, %v2054_v13 }
 0x8a0   :  { %5237 = vmatpush3.bf16.msra.mxu0 %v2057_v15  ;;  %5285 = vmatpush3.bf16.msra.mxu1 %v2057_v15 }
 0x8a1   :  { %5242 = vmatprep.subr.bf16.mxu0 %v5993_v0  ;;  %5298 = vmatprep.subr.bf16.mxu1 %v5993_v0 }
 0x8a3   :  { %5239 = vmatmul.mubr.msk.bf16.vlgmr.msra.gmra.mrb[52].mxu0 %vm221_vm1, %v2058_v16  ;;  %5287 = vmatmul.mubr.msk.bf16.vlgmr.msra.gmra.mrb[32].mxu1 %vm221_vm1, %v2376_v20  ;;  %v5596_v20 = vld [vmem:[%s7142_s16 + $0x88] sm:$0xff]  }
 0x8a4   :  { %5243 = vmatpush3.bf16.msra.mxu0 %v2056_v11  ;;  %5246 = vmatprep.mubr.msk.bf16.mxu0 %vm5994_vm0, %v5993_v0 }
 0x8a5   :  { %5244 = vmatprep.subr.bf16.mxu0 %v5993_v0  ;;  %5300 = vmatprep.mubr.msk.bf16.mxu1 %vm5994_vm0, %v5993_v0 }
 0x8a8   :  { %5245 = vmatpush3.bf16.msra.mxu0 %v2057_v15 }
 0x8a9   :  { %5250 = vmatprep.subr.bf16.mxu0 %v5993_v0 }
 0x8ab   :  { %5247 = vmatmul.mubr.msk.bf16.vlgmr.msra.gmra.mrb[56].mxu0 %vm221_vm1, %v2108_v17 }
 0x8ac   :  { %5254 = vmatprep.mubr.msk.bf16.mxu0 %vm5994_vm0, %v5993_v0  ;;  %5251 = vmatpush3.bf16.msra.mxu0 %v5567_v18 }
 0x8ad   :  { %5252 = vmatprep.subr.bf16.mxu0 %v5993_v0 }
 0x8b0   :  { %5253 = vmatpush3.bf16.msra.mxu0 %v5568_v19  ;;  %v5595_v19 = vld [vmem:[%s7142_s16 + $0x80] sm:$0xff]  }
 0x8b1   :  { %5258 = vmatprep.subr.bf16.mxu0 %v5993_v0 }
 0x976   :  { %v2096_v21 = vpop.f32.mrb[52].mxu0  ;;  %v2414_v36 = vpop.f32.mrb[32].mxu1 }
 0x977   :  { %v5240_v22 = vpop.f32.mrb[53].mxu0  ;;  %v2102_v32 = vpack.c.bf16 %v2096_v21, %v2096_v21  ;;  %v5288_v37 = vpop.f32.mrb[33].mxu1  ;;  %v2420_v47 = vpack.c.bf16 %v2414_v36, %v2414_v36  ;;  %v5593_v21 = vld [vmem:[%s7141_s15 + $0x10] sm:$0xff]   ;;  %v5610_v36 = vld [vmem:[%s7142_s16 + $0xf8] sm:$0xff]  }
 0x978   :  { %v2099_v23 = vpop.f32.mrb[54].mxu0  ;;  %v2417_v38 = vpop.f32.mrb[34].mxu1  ;;  %v5597_v22 = vld [vmem:[%s7142_s16 + $0x90] sm:$0xff]  }
 0x979   :  { %v5241_v24 = vpop.f32.mrb[55].mxu0  ;;  %v5289_v39 = vpop.f32.mrb[35].mxu1  ;;  %v5599_v23 = vld [vmem:[%s7142_s16 + $0x98] sm:$0xff]  }
 0x97a   :  { %v5594_v24 = vld [vmem:[%s7141_s15 + $0x18] sm:$0xff]  }
 0x97e   :  { %v2146_v25 = vpop.f32.mrb[56].mxu0 }
 0x97f   :  { %v2152_v27 = vpack.c.bf16 %v2146_v25, %v2146_v25  ;;  %v5248_v28 = vpop.f32.mrb[57].mxu0  ;;  %v5598_v25 = vld [vmem:[%s7142_s16 + $0xc0] sm:$0xff]  }
 0x980   :  { %v2149_v29 = vpop.f32.mrb[58].mxu0  ;;  %v5602_v28 = vld [vmem:[%s7142_s16 + $0xd0] sm:$0xff]  }
 0x981   :  { %v5249_v30 = vpop.f32.mrb[59].mxu0  ;;  %5255 = vmatmul.mubr.msk.bf16.vlgmr.msra.gmra.mrb[60].mxu0 %vm221_vm1, %v2152_v27  ;;  %v5600_v27 = vld [vmem:[%s7142_s16 + $0xc8] sm:$0xff]  }
 0x982   :  { %5259 = vmatpush3.bf16.msra.mxu0 %v5569_v26  ;;  %5262 = vmatprep.mubr.msk.bf16.mxu0 %vm5994_vm0, %v5993_v0  ;;  %v5601_v26 = vld [vmem:[%s7142_s16 + $0xa0] sm:$0xff]   ;;  %v5603_v29 = vld [vmem:[%s7142_s16 + $0xa8] sm:$0xff]   ;;  %v5604_v30 = vld [vmem:[%s7142_s16 + $0xd8] sm:$0xff]  }
 0x983   :  { %5260 = vmatprep.subr.bf16.mxu0 %v5993_v0 }
 0x986   :  { %5261 = vmatpush3.bf16.msra.mxu0 %v5570_v31  ;;  %v5605_v31 = vld [vmem:[%s7142_s16 + $0xb0] sm:$0xff]  }
 0x987   :  { %5266 = vmatprep.subr.bf16.mxu0 %v5993_v0 }
 0x98d   :  { %5263 = vmatmul.mubr.msk.bf16.vlgmr.msra.gmra.mrb[60].mxu0 %vm221_vm1, %v2102_v32  ;;  %v5606_v32 = vld [vmem:[%s7142_s16 + $0xe0] sm:$0xff]  }
 0x98e   :  { %5267 = vmatpush3.bf16.msra.mxu0 %v2056_v11  ;;  %5270 = vmatprep.mubr.msk.bf16.mxu0 %vm5994_vm0, %v5993_v0 }
 0x98f   :  { %5268 = vmatprep.subr.bf16.mxu0 %v5993_v0 }
 0x992   :  { %5269 = vmatpush3.bf16.msra.mxu0 %v2057_v15 }
 0x993   :  { %5274 = vmatprep.subr.bf16.mxu0 %v5993_v0 }
 0x995   :  { %5271 = vmatmul.mubr.msk.bf16.vlgmr.msra.gmra.mrb[64].mxu0 %vm221_vm1, %v2269_v33  ;;  %v5607_v33 = vld [vmem:[%s7142_s16 + $0xb8] sm:$0xff]  }
 0x996   :  { %5275 = vmatpush3.bf16.msra.mxu0 %v5571_v34  ;;  %5278 = vmatprep.mubr.msk.bf16.mxu0 %vm5994_vm0, %v5993_v0  ;;  %v5608_v34 = vld [vmem:[%s7142_s16 + $0xe8] sm:$0xff]  }
 0x997   :  { %5276 = vmatprep.subr.bf16.mxu0 %v5993_v0 }
 0x99a   :  { %5277 = vmatpush3.bf16.msra.mxu0 %v5572_v35  ;;  %v5609_v35 = vld [vmem:[%s7142_s16 + $0xf0] sm:$0xff]  }
 0x99b   :  { %5290 = vmatprep.subr.bf16.mxu0 %v5993_v0 }
 0xa68   :  { %v2307_v40 = vpop.f32.mrb[64].mxu0 }
 0xa69   :  { %v2313_v42 = vpack.c.bf16 %v2307_v40, %v2307_v40  ;;  %v5272_v43 = vpop.f32.mrb[65].mxu0 }
 0xa6a   :  { %v2310_v44 = vpop.f32.mrb[66].mxu0 }
 0xa6b   :  { %v5273_v45 = vpop.f32.mrb[67].mxu0  ;;  %5279 = vmatmul.mubr.msk.bf16.vlgmr.msra.gmra.mrb[60].mxu0 %vm221_vm1, %v2313_v42 }
 0xa6c   :  { %5291 = vmatpush3.bf16.msra.mxu0 %v5573_v41  ;;  %5294 = vmatprep.mubr.msk.bf16.mxu0 %vm5994_vm0, %v5993_v0 }
 0xa6d   :  { %5292 = vmatprep.subr.bf16.mxu0 %v5993_v0 }
 0xa70   :  { %5293 = vmatpush3.bf16.msra.mxu0 %v5574_v46 }
 0xa71   :  { %5304 = vmatprep.subr.bf16.mxu0 %v5993_v0 }
 0xa77   :  { %5295 = vmatmul.mubr.msk.bf16.vlgmr.msra.gmra.mrb[60].mxu0 %vm221_vm1, %v2420_v47 }
 0xa78   :  { %5306 = vmatprep.mubr.msk.bf16.mxu0 %vm5994_vm0, %v5993_v0 }
 0xb4a   :  { %v2475_v48 = vpop.f32.mrb[60].mxu0 }
 0xb4b   :  { %v2482_v49 = vpack.c.bf16 %v2475_v48, %v2475_v48  ;;  %v5296_v50 = vpop.f32.mrb[61].mxu0 }
 0xb4c   :  { %v2478_v51 = vpop.f32.mrb[62].mxu0 }
 0xb4d   :  { %v6643_v52 = vsel %vm1354_vm5, %v2482_v49, 0  ;;  %v5297_v53 = vpop.f32.mrb[63].mxu0 }
 0xb4e   :  { %5299 = vmatpush3.bf16.msra.mxu1 %v6643_v52  ;;  %5305 = vmatpush3.bf16.msra.mxu0 %v6643_v52 }
 0xb4f   :  { %5310 = vmatprep.subr.bf16.mxu1 %v5993_v0  ;;  %5330 = vmatprep.subr.bf16.mxu0 %v5993_v0 }
 0xb51   :  { %5301 = vmatmul.mubr.msk.bf16.vlgmr.msra.gmra.mrb[36].mxu1 %vm1347_vm4, %v5575_v54  ;;  %5307 = vmatmul.mubr.msk.bf16.vlgmr.msra.gmra.mrb[68].mxu0 %vm1347_vm4, %v5576_v55 }
 0xb52   :  { %5311 = vmatpush3.bf16.msra.mxu1 %v5577_v56  ;;  %5331 = vmatpush3.bf16.msra.mxu0 %v5578_v57  ;;  %v5611_v56 = vld [vmem:[%s7144_s18] sm:$0xff]  }
 0xb53   :  { %5312 = vmatprep.subr.bf16.mxu1 %v5993_v0  ;;  %5332 = vmatprep.subr.bf16.mxu0 %v5993_v0  ;;  %v5619_v57 = vld [vmem:[%s7145_s19 + $0x80] ss:$8 sps:$4 sm:$0xff]  }
 0xb54   :  { %5326 = vmatprep.mubr.msk.bf16.mxu1 %vm5994_vm0, %v5993_v0  ;;  %5346 = vmatprep.mubr.msk.bf16.mxu0 %vm5994_vm0, %v5993_v0 }
 0xb56   :  { %5313 = vmatpush3.bf16.msra.mxu1 %v5579_v58  ;;  %5333 = vmatpush3.bf16.msra.mxu0 %v5580_v59  ;;  %v5621_v58 = vld [vmem:[%s7145_s19 + $0x84] ss:$8 sps:$4 sm:$0xff]   ;;  %v5624_v59 = vld [vmem:[%s7145_s19 + $0x94] ss:$8 sps:$4 sm:$0xff]  }
 0xb57   :  { %5314 = vmatprep.subr.bf16.mxu1 %v5993_v0  ;;  %5334 = vmatprep.subr.bf16.mxu0 %v5993_v0 }
 0xb5a   :  { %5315 = vmatpush3.bf16.msra.mxu1 %v5581_v60  ;;  %5335 = vmatpush3.bf16.msra.mxu0 %v5582_v61  ;;  %v5622_v60 = vld [vmem:[%s7145_s19 + $0x90] ss:$8 sps:$4 sm:$0xff]   ;;  %v5627_v61 = vld [vmem:[%s7145_s19 + $0xa4] ss:$8 sps:$4 sm:$0xff]  }
 0xb5b   :  { %5316 = vmatprep.subr.bf16.mxu1 %v5993_v0  ;;  %5336 = vmatprep.subr.bf16.mxu0 %v5993_v0 }
 0xb5e   :  { %5317 = vmatpush3.bf16.msra.mxu1 %v5583_v62  ;;  %5337 = vmatpush3.bf16.msra.mxu0 %v5584_v63  ;;  %v5625_v62 = vld [vmem:[%s7145_s19 + $0xa0] ss:$8 sps:$4 sm:$0xff]   ;;  %v5630_v63 = vld [vmem:[%s7145_s19 + $0xb4] ss:$8 sps:$4 sm:$0xff]  }
 0xb5f   :  { %5318 = vmatprep.subr.bf16.mxu1 %v5993_v0  ;;  %5338 = vmatprep.subr.bf16.mxu0 %v5993_v0 }
 0xb62   :  { %5319 = vmatpush3.bf16.msra.mxu1 %v5585_v1  ;;  %5339 = vmatpush3.bf16.msra.mxu0 %v5586_v2  ;;  %v5628_v1 = vld [vmem:[%s7145_s19 + $0xb0] ss:$8 sps:$4 sm:$0xff]   ;;  %v5633_v2 = vld [vmem:[%s7145_s19 + $0xc4] ss:$8 sps:$4 sm:$0xff]  }
 0xb63   :  { %5320 = vmatprep.subr.bf16.mxu1 %v5993_v0  ;;  %5340 = vmatprep.subr.bf16.mxu0 %v5993_v0 }
 0xb66   :  { %5321 = vmatpush3.bf16.msra.mxu1 %v5587_v3  ;;  %5341 = vmatpush3.bf16.msra.mxu0 %v5588_v4  ;;  %v5631_v3 = vld [vmem:[%s7145_s19 + $0xc0] ss:$8 sps:$4 sm:$0xff]   ;;  %v5636_v4 = vld [vmem:[%s7145_s19 + $0xd4] ss:$8 sps:$4 sm:$0xff]  }
 0xb67   :  { %5322 = vmatprep.subr.bf16.mxu1 %v5993_v0  ;;  %5342 = vmatprep.subr.bf16.mxu0 %v5993_v0 }
 0xb6a   :  { %5323 = vmatpush3.bf16.msra.mxu1 %v5589_v5  ;;  %5343 = vmatpush3.bf16.msra.mxu0 %v5590_v6  ;;  %v5634_v5 = vld [vmem:[%s7145_s19 + $0xd0] ss:$8 sps:$4 sm:$0xff]  }
 0xb6b   :  { %5324 = vmatprep.subr.bf16.mxu1 %v5993_v0  ;;  %5344 = vmatprep.subr.bf16.mxu0 %v5993_v0 }
 0xb6e   :  { %5325 = vmatpush3.bf16.msra.mxu1 %v5591_v7  ;;  %5345 = vmatpush3.bf16.msra.mxu0 %v5592_v8 }
 0xb6f   :  { %5350 = vmatprep.subr.bf16.mxu1 %v5993_v0  ;;  %5356 = vmatprep.subr.bf16.mxu0 %v5993_v0 }
 0xc24   :  { %v2530_v9 = vpop.f32.mrb[36].mxu1  ;;  %v2599_v10 = vpop.f32.mrb[68].mxu0 }
 0xc25   :  { %v5302_v11 = vpop.f32.mrb[37].mxu1  ;;  %v5308_v12 = vpop.f32.mrb[69].mxu0 }
 0xc26   :  { %v2533_v13 = vpop.f32.mrb[38].mxu1  ;;  %v2602_v14 = vpop.f32.mrb[70].mxu0 }
 0xc27   :  { %v2537_v15 = vpack.c.bf16 %v2533_v13, %v2530_v9  ;;  %v2606_v16 = vpack.c.bf16 %v2602_v14, %v2599_v10  ;;  %v5309_v17 = vpop.f32.mrb[71].mxu0  ;;  %v5303_v18 = vpop.f32.mrb[39].mxu1  ;;  %v4612_v13 = vld [vmem:[#allocation13] ss:$0 sm:$0xff] }
 0xc29   :  { %5327 = vmatmul.mubr.bf16.vlgmr.msra.gmra.mrb[40].mxu1 %v2606_v16  ;;  %5347 = vmatmul.mubr.bf16.vlgmr.msra.gmra.mrb[72].mxu0 %v2537_v15 }
 0xc2a   :  { %5351 = vmatpush3.bf16.msra.mxu1 %v6643_v52  ;;  %5352 = vmatprep.mubr.msk.bf16.mxu1 %vm5994_vm0, %v5993_v0 }
 0xc2b   :  { %5376 = vmatprep.subr.bf16.mxu1 %v5993_v0  ;;  %5357 = vmatpush3.bf16.msra.mxu0 %v5595_v19 }
 0xc2c   :  { %5358 = vmatprep.subr.bf16.mxu0 %v5993_v0  ;;  %5372 = vmatprep.mubr.msk.bf16.mxu0 %vm5994_vm0, %v5993_v0 }
 0xc2f   :  { %5359 = vmatpush3.bf16.msra.mxu0 %v5596_v20 }
 0xc30   :  { %5360 = vmatprep.subr.bf16.mxu0 %v5993_v0 }
 0xc31   :  { %5353 = vmatmul.mubr.msk.bf16.vlgmr.msra.gmra.mrb[44].mxu1 %vm1347_vm4, %v5593_v21 }
 0xc32   :  { %5377 = vmatpush3.bf16.msra.mxu1 %v6643_v52  ;;  %5378 = vmatprep.mubr.msk.bf16.mxu1 %vm5994_vm0, %v5993_v0 }
 0xc33   :  { %5382 = vmatprep.subr.bf16.mxu1 %v5993_v0  ;;  %5361 = vmatpush3.bf16.msra.mxu0 %v5597_v22 }
 0xc34   :  { %5362 = vmatprep.subr.bf16.mxu0 %v5993_v0 }
 0xc37   :  { %5363 = vmatpush3.bf16.msra.mxu0 %v5599_v23 }
 0xc38   :  { %5364 = vmatprep.subr.bf16.mxu0 %v5993_v0 }
 0xc39   :  { %5379 = vmatmul.mubr.msk.bf16.vlgmr.msra.gmra.mrb[48].mxu1 %vm1347_vm4, %v5594_v24  ;;  %v5612_v24 = vld [vmem:[%s7144_s18 + $0x8] sm:$0xff]  }
 0xc3a   :  { %5383 = vmatpush3.bf16.msra.mxu1 %v5598_v25  ;;  %5398 = vmatprep.mubr.msk.bf16.mxu1 %vm5994_vm0, %v5993_v0  ;;  %v5613_v25 = vld [vmem:[%s7144_s18 + $0x10] sm:$0xff]  }
 0xc3b   :  { %5384 = vmatprep.subr.bf16.mxu1 %v5993_v0  ;;  %5365 = vmatpush3.bf16.msra.mxu0 %v5601_v26  ;;  %v5614_v26 = vld [vmem:[%s7144_s18 + $0x18] sm:$0xff]  }
 0xc3c   :  { %5366 = vmatprep.subr.bf16.mxu0 %v5993_v0 }
 0xc3e   :  { %5385 = vmatpush3.bf16.msra.mxu1 %v5600_v27  ;;  %v5615_v27 = vld [vmem:[%s7144_s18 + $0x20] sm:$0xff]  }
 0xc3f   :  { %5386 = vmatprep.subr.bf16.mxu1 %v5993_v0  ;;  %5367 = vmatpush3.bf16.msra.mxu0 %v5603_v29  ;;  %v5617_v29 = vld [vmem:[%s7144_s18 + $0x30] sm:$0xff]  }
 0xc40   :  { %5368 = vmatprep.subr.bf16.mxu0 %v5993_v0 }
 0xc42   :  { %5387 = vmatpush3.bf16.msra.mxu1 %v5602_v28  ;;  %v5616_v28 = vld [vmem:[%s7144_s18 + $0x28] sm:$0xff]  }
 0xc43   :  { %5388 = vmatprep.subr.bf16.mxu1 %v5993_v0  ;;  %5369 = vmatpush3.bf16.msra.mxu0 %v5605_v31  ;;  %v5637_v31 = vld [vmem:[%s7145_s19 + $0xe0] ss:$8 sps:$4 sm:$0xff]  }
 0xc44   :  { %5370 = vmatprep.subr.bf16.mxu0 %v5993_v0 }
 0xc46   :  { %5389 = vmatpush3.bf16.msra.mxu1 %v5604_v30  ;;  %v5618_v30 = vld [vmem:[%s7144_s18 + $0x38] sm:$0xff]  }
 0xc47   :  { %5390 = vmatprep.subr.bf16.mxu1 %v5993_v0  ;;  %5371 = vmatpush3.bf16.msra.mxu0 %v5607_v33  ;;  %v5642_v33 = vld [vmem:[%s7145_s19 + $0xf4] ss:$8 sps:$4 sm:$0xff]  }
 0xc4a   :  { %5391 = vmatpush3.bf16.msra.mxu1 %v5606_v32  ;;  %v5639_v32 = vld [vmem:[%s7145_s19 + $0xe4] ss:$8 sps:$4 sm:$0xff]  }
 0xc4b   :  { %5392 = vmatprep.subr.bf16.mxu1 %v5993_v0 }
 0xc4e   :  { %5393 = vmatpush3.bf16.msra.mxu1 %v5608_v34  ;;  %v5640_v34 = vld [vmem:[%s7145_s19 + $0xf0] ss:$8 sps:$4 sm:$0xff]  }
 0xc4f   :  { %5394 = vmatprep.subr.bf16.mxu1 %v5993_v0 }
 0xc52   :  { %5395 = vmatpush3.bf16.msra.mxu1 %v5609_v35  ;;  %v5645_v35 = vld [vmem:[%s7145_s19 + $0x4] ss:$8 sps:$4 sm:$0xff]  }
 0xc53   :  { %5396 = vmatprep.subr.bf16.mxu1 %v5993_v0 }
 0xc56   :  { %5397 = vmatpush3.bf16.msra.mxu1 %v5610_v36  ;;  %v5995_v36 = vmov 0  }
 0xc57   :  { %3392 = vmatprep.subr.bf16.mxu1 %v5621_v58  ;;  %v5643_v58 = vld [vmem:[%s7145_s19] ss:$8 sps:$4 sm:$0xff]  }
 0xcfc   :  { %v2706_v37 = vpop.f32.mrb[40].mxu1  ;;  %v2795_v38 = vpop.f32.mrb[72].mxu0 }
 0xcfd   :  { %v2796_v39 = vadd.f32 %v2795_v38, %v2706_v37  ;;  %v5328_v40 = vpop.f32.mrb[41].mxu1  ;;  %v5348_v41 = vpop.f32.mrb[73].mxu0  ;;  %v5715_v37 = vld [vmem:[#allocation14 + $0x40] sm:$0xff]  }
 0xcfe   :  { %v2709_v42 = vpop.f32.mrb[42].mxu1  ;;  %v2798_v43 = vpop.f32.mrb[74].mxu0  ;;  %v5716_v38 = vld [vmem:[#allocation14] sm:$0xff]   ;;  %v5718_v40 = vld [vmem:[#allocation14 + $0x8] sm:$0xff]   ;;  %v5719_v41 = vld [vmem:[#allocation14 + $0x50] sm:$0xff]  }
 0xcff   :  { %v2799_v44 = vadd.f32 %v2798_v43, %v2709_v42  ;;  %v5329_v45 = vpop.f32.mrb[43].mxu1  ;;  %v5349_v46 = vpop.f32.mrb[75].mxu0  ;;  %v5720_v42 = vld [vmem:[#allocation14 + $0x10] sm:$0xff]   ;;  %v5721_v43 = vld [vmem:[#allocation14 + $0x58] sm:$0xff]  }
 0xd00   :  { %v5722_v46 = vld [vmem:[#allocation14 + $0x18] sm:$0xff]  }
 0xd04   :  { %v2847_v47 = vpop.f32.mrb[44].mxu1 }
 0xd05   :  { %v5354_v48 = vpop.f32.mrb[45].mxu1 }
 0xd06   :  { %v2850_v49 = vpop.f32.mrb[46].mxu1  ;;  %v5723_v48 = vld [vmem:[#allocation14 + $0x60] sm:$0xff]  }
 0xd07   :  { %v2854_v50 = vpack.c.bf16 %v2850_v49, %v2847_v47  ;;  %v5355_v0 = vpop.f32.mrb[47].mxu1 }
 0xd09   :  { %5373 = vmatmul.mubr.bf16.vlgmr.msra.gmra.mrb[76].mxu0 %v2854_v50 }
 0xd0a   :  { %5404 = vmatprep.mubr.msk.bf16.mxu0 %vm719_vm3, %v5611_v56 }
 0xd0c   :  { %v3008_v51 = vpop.f32.mrb[48].mxu1 }
 0xd0d   :  { %v5380_v52 = vpop.f32.mrb[49].mxu1 }
 0xd0e   :  { %v3011_v53 = vpop.f32.mrb[50].mxu1  ;;  %v5725_v52 = vld [vmem:[#allocation14 + $0x68] sm:$0xff]  }
 0xd0f   :  { %v3015_v54 = vpack.c.bf16 %v3011_v53, %v3008_v51  ;;  %v5381_v55 = vpop.f32.mrb[51].mxu1  ;;  %v5724_v51 = vld [vmem:[#allocation14 + $0x20] sm:$0xff]  }
 0xd11   :  { %5399 = vmatmul.mubr.bf16.vlgmr.msra.gmra.mrb[52].mxu1 %v3015_v54 }
 0xd12   :  { %3393 = vmatpush1.bf16.msra.mxu1 %v5619_v57  ;;  %3424 = vmatprep.mubr.bf16.mxu1 %v5995_v36 }
 0xd13   :  { %3394 = vmatprep.subr.bf16.mxu1 %v5624_v59 }
 0xd16   :  { %3395 = vmatpush1.bf16.msra.mxu1 %v5622_v60  ;;  %v5648_v60 = vld [vmem:[%s7145_s19 + $0x14] ss:$8 sps:$4 sm:$0xff]  }
 0xd17   :  { %3396 = vmatprep.subr.bf16.mxu1 %v5627_v61  ;;  %v5646_v61 = vld [vmem:[%s7145_s19 + $0x10] ss:$8 sps:$4 sm:$0xff]  }
 0xd1a   :  { %3397 = vmatpush1.bf16.msra.mxu1 %v5625_v62  ;;  %v5651_v62 = vld [vmem:[%s7145_s19 + $0x24] ss:$8 sps:$4 sm:$0xff]  }
 0xd1b   :  { %3398 = vmatprep.subr.bf16.mxu1 %v5630_v63 }
 0xd1e   :  { %3399 = vmatpush1.bf16.msra.mxu1 %v5628_v1 }
 0xd1f   :  { %3400 = vmatprep.subr.bf16.mxu1 %v5633_v2 }
 0xd22   :  { %3401 = vmatpush1.bf16.msra.mxu1 %v5631_v3  ;;  %v5649_v3 = vld [vmem:[%s7145_s19 + $0x20] ss:$8 sps:$4 sm:$0xff]  }
 0xd23   :  { %3402 = vmatprep.subr.bf16.mxu1 %v5636_v4 }
 0xd26   :  { %3403 = vmatpush1.bf16.msra.mxu1 %v5634_v5 }
 0xd27   :  { %3404 = vmatprep.subr.bf16.mxu1 %v5639_v32  ;;  %v5679_v32 = vld [vmem:[%s7145_s19 + $0x140] ss:$8 sps:$4 sm:$0xff]  }
 0xd2a   :  { %3405 = vmatpush1.bf16.msra.mxu1 %v5637_v31  ;;  %v5681_v31 = vld [vmem:[%s7145_s19 + $0x144] ss:$8 sps:$4 sm:$0xff]  }
 0xd2b   :  { %3406 = vmatprep.subr.bf16.mxu1 %v5642_v33  ;;  %v5684_v33 = vld [vmem:[%s7145_s19 + $0x154] ss:$8 sps:$4 sm:$0xff]  }
 0xd2e   :  { %3407 = vmatpush1.bf16.msra.mxu1 %v5640_v34  ;;  %v5682_v34 = vld [vmem:[%s7145_s19 + $0x150] ss:$8 sps:$4 sm:$0xff]  }
 0xd2f   :  { %3525 = vmatprep.subr.bf16.mxu1 %v5645_v35  ;;  %v5687_v35 = vld [vmem:[%s7145_s19 + $0x164] ss:$8 sps:$4 sm:$0xff]  }
 0xddc   :  { %v2954_v6 = vpop.f32.mrb[76].mxu0 }
 0xddd   :  { %v2961_v7 = vadd.f32 %v2954_v6, %v2796_v39  ;;  %v5374_v8 = vpop.f32.mrb[77].mxu0  ;;  %v5717_v39 = vld [vmem:[#allocation14 + $0x48] sm:$0xff]   ;;  %v5654_v6 = vld [vmem:[%s7145_s19 + $0x34] ss:$8 sps:$4 sm:$0xff]  }
 0xdde   :  { %v2957_v9 = vpop.f32.mrb[78].mxu0  ;;  %v5652_v8 = vld [vmem:[%s7145_s19 + $0x30] ss:$8 sps:$4 sm:$0xff]  }
 0xddf   :  { %v2962_v10 = vadd.f32 %v2957_v9, %v2799_v44  ;;  %v5375_v11 = vpop.f32.mrb[79].mxu0  ;;  %v5657_v9 = vld [vmem:[%s7145_s19 + $0x44] ss:$8 sps:$4 sm:$0xff]  }
 0xde4   :  { %v3115_v12 = vpop.f32.mrb[52].mxu1 }
 0xde5   :  { %v3122_v14 = vadd.f32 %v3115_v12, %v2961_v7  ;;  %v5400_v15 = vpop.f32.mrb[53].mxu1 }
 0xde6   :  { %v3118_v16 = vpop.f32.mrb[54].mxu1 }
 0xde7   :  { %v3131_v17 = vadd.f32 %v4612_v13, %v3122_v14  ;;  %v3123_v18 = vadd.f32 %v3118_v16, %v2962_v10  ;;  %v5401_v19 = vpop.f32.mrb[55].mxu1  ;;  %v5660_v16 = vld [vmem:[%s7145_s19 + $0x54] ss:$8 sps:$4 sm:$0xff]  }
 0xde8   :  { %v5663_v19 = vld [vmem:[%s7145_s19 + $0x64] ss:$8 sps:$4 sm:$0xff]  }
 0xde9   :  { %v3132_v20 = vadd.f32 %v4612_v13, %v3123_v18  ;;  %v3133_v21 = vmax.f32 %v3131_v17, 0.0  ;;  %v5655_v13 = vld [vmem:[%s7145_s19 + $0x40] ss:$8 sps:$4 sm:$0xff]   ;;  %v5658_v18 = vld [vmem:[%s7145_s19 + $0x50] ss:$8 sps:$4 sm:$0xff]  }
 0xdeb   :  { %v3134_v22 = vmax.f32 %v3132_v20, 0.0  ;;  %v5661_v20 = vld [vmem:[%s7145_s19 + $0x60] ss:$8 sps:$4 sm:$0xff]  }
 0xded   :  { %v3135_v23 = vpack.c.bf16 %v3134_v22, %v3133_v21  ;;  %v5666_v21 = vld [vmem:[%s7145_s19 + $0x74] ss:$8 sps:$4 sm:$0xff]   ;;  %v5664_v22 = vld [vmem:[%s7145_s19 + $0x70] ss:$8 sps:$4 sm:$0xff]  }
 0xdef   :  { %5402 = vmatprep.subr.bf16.mxu0 %v3135_v23 }
 0xdf0   :  { %5403 = vmatpush3.bf16.msra.mxu0 %v3135_v23 }
 0xdf1   :  { %5408 = vmatprep.subr.bf16.mxu0 %v3135_v23 }
 0xdf3   :  { %5405 = vmatmul.mubr.msk.bf16.vlgmr.msra.gmra.mrb[80].mxu0 %vm719_vm3, %v5612_v24  ;;  %v5667_v24 = vld [vmem:[%s7145_s19 + $0x100] ss:$8 sps:$4 sm:$0xff]  }
 0xdf4   :  { %5409 = vmatpush3.bf16.msra.mxu0 %v3135_v23  ;;  %5410 = vmatprep.mubr.msk.bf16.mxu0 %vm719_vm3, %v5613_v25  ;;  %v5672_v25 = vld [vmem:[%s7145_s19 + $0x114] ss:$8 sps:$4 sm:$0xff]  }
 0xdf5   :  { %5414 = vmatprep.subr.bf16.mxu0 %v3135_v23 }
 0xdfb   :  { %5411 = vmatmul.mubr.msk.bf16.vlgmr.msra.gmra.mrb[84].mxu0 %vm719_vm3, %v5614_v26  ;;  %v5670_v26 = vld [vmem:[%s7145_s19 + $0x110] ss:$8 sps:$4 sm:$0xff]  }
 0xdfc   :  { %5415 = vmatpush3.bf16.msra.mxu0 %v3135_v23  ;;  %5416 = vmatprep.mubr.msk.bf16.mxu0 %vm719_vm3, %v5615_v27  ;;  %v5675_v27 = vld [vmem:[%s7145_s19 + $0x124] ss:$8 sps:$4 sm:$0xff]  }
 0xdfd   :  { %5420 = vmatprep.subr.bf16.mxu0 %v3135_v23 }
 0xe03   :  { %5417 = vmatmul.mubr.msk.bf16.vlgmr.msra.gmra.mrb[88].mxu0 %vm719_vm3, %v5616_v28  ;;  %v5673_v28 = vld [vmem:[%s7145_s19 + $0x120] ss:$8 sps:$4 sm:$0xff]  }
 0xe04   :  { %5421 = vmatpush3.bf16.msra.mxu0 %v3135_v23  ;;  %5422 = vmatprep.mubr.msk.bf16.mxu0 %vm719_vm3, %v5617_v29  ;;  %v5669_v23 = vld [vmem:[%s7145_s19 + $0x104] ss:$8 sps:$4 sm:$0xff]   ;;  %v5678_v29 = vld [vmem:[%s7145_s19 + $0x134] ss:$8 sps:$4 sm:$0xff]  }
 0xe05   :  { %4958 = vmatprep.subr.bf16.mxu0 %v5715_v37  ;;  %v5685_v37 = vld [vmem:[%s7145_s19 + $0x160] ss:$8 sps:$4 sm:$0xff]  }
 0xe0b   :  { %5423 = vmatmul.mubr.msk.bf16.vlgmr.msra.gmra.mrb[92].mxu0 %vm719_vm3, %v5618_v30  ;;  %v5676_v30 = vld [vmem:[%s7145_s19 + $0x130] ss:$8 sps:$4 sm:$0xff]  }
 0xe0c   :  { %4959 = vmatpush3.bf16.msra.mxu0 %v5716_v38  ;;  %v5690_v38 = vld [vmem:[%s7145_s19 + $0x174] ss:$8 sps:$4 sm:$0xff]  }
 0xe0d   :  { %4960 = vmatprep.subr.bf16.mxu0 %v5717_v39  ;;  %v5688_v39 = vld [vmem:[%s7145_s19 + $0x170] ss:$8 sps:$4 sm:$0xff]  }
 0xe10   :  { %4961 = vmatpush3.bf16.msra.mxu0 %v5718_v40  ;;  %v5693_v40 = vld [vmem:[%s7145_s19 + $0x184] ss:$8 sps:$4 sm:$0xff]  }
 0xe11   :  { %4962 = vmatprep.subr.bf16.mxu0 %v5719_v41  ;;  %v5691_v41 = vld [vmem:[%s7145_s19 + $0x180] ss:$8 sps:$4 sm:$0xff]  }
 0xe14   :  { %4963 = vmatpush3.bf16.msra.mxu0 %v5720_v42  ;;  %v5696_v42 = vld [vmem:[%s7145_s19 + $0x194] ss:$8 sps:$4 sm:$0xff]  }
 0xe15   :  { %4964 = vmatprep.subr.bf16.mxu0 %v5721_v43  ;;  %v5694_v43 = vld [vmem:[%s7145_s19 + $0x190] ss:$8 sps:$4 sm:$0xff]  }
 0xe18   :  { %4965 = vmatpush3.bf16.msra.mxu0 %v5722_v46  ;;  %v5702_v46 = vld [vmem:[%s7145_s19 + $0x1b4] ss:$8 sps:$4 sm:$0xff]  }
 0xe19   :  { %4966 = vmatprep.subr.bf16.mxu0 %v5723_v48  ;;  %v5705_v48 = vld [vmem:[%s7145_s19 + $0x1c4] ss:$8 sps:$4 sm:$0xff]  }
 0xe1c   :  { %4967 = vmatpush3.bf16.msra.mxu0 %v5724_v51  ;;  %v5711_v51 = vld [vmem:[%s7145_s19 + $0x1e4] ss:$8 sps:$4 sm:$0xff]  }
 0xe1d   :  { %4968 = vmatprep.subr.bf16.mxu0 %v5725_v52  ;;  %v5709_v52 = vld [vmem:[%s7145_s19 + $0x1e0] ss:$8 sps:$4 sm:$0xff]  }
 0xec6   :  { %v6891_v44 = vpop.f32.mrb[80].mxu0 }
 0xec7   :  { %v6893_v45 = vpop.f32.mrb[81].mxu0 }
 0xec8   :  { %v6895_v47 = vpop.f32.mrb[82].mxu0 }
 0xec9   :  { %v3206_v49 = vpack.c.bf16 %v6895_v47, %v6891_v44  ;;  %v6899_v50 = vpop.f32.mrb[83].mxu0  ;;  %v5699_v44 = vld [vmem:[%s7145_s19 + $0x1a4] ss:$8 sps:$4 sm:$0xff]   ;;  %v5700_v47 = vld [vmem:[%s7145_s19 + $0x1b0] ss:$8 sps:$4 sm:$0xff]  }
 0xeca   :  { %v3205_v0 = vpack.c.bf16 %v6899_v50, %v6893_v45  ;;  %v5697_v45 = vld [vmem:[%s7145_s19 + $0x1a0] ss:$8 sps:$4 sm:$0xff]   ;;  %v5708_v50 = vld [vmem:[%s7145_s19 + $0x1d4] ss:$8 sps:$4 sm:$0xff]  }
 0xece   :  { %v5412_v53 = vpop.f32.mrb[84].mxu0 }
 0xecf   :  { %v3278_v54 = vpop.f32.mrb[85].mxu0 }
 0xed0   :  { %v5413_v55 = vpop.f32.mrb[86].mxu0 }
 0xed1   :  { %v3294_v56 = vpack.c.bf16 %v5413_v55, %v5412_v53  ;;  %v3281_v57 = vpop.f32.mrb[87].mxu0  ;;  %v5714_v53 = vld [vmem:[%s7145_s19 + $0x1f4] ss:$8 sps:$4 sm:$0xff]   ;;  %v5726_v55 = vld [vmem:[#allocation14 + $0x28] sm:$0xff]  }
 0xed2   :  { %v3293_v59 = vpack.c.bf16 %v3281_v57, %v3278_v54  ;;  %v5712_v54 = vld [vmem:[%s7145_s19 + $0x1f0] ss:$8 sps:$4 sm:$0xff]   ;;  %4969 = vmatpush3.bf16.msra.mxu0 %v5726_v55 }
 0xed3   :  { %v5728_v57 = vld [vmem:[#allocation14 + $0x30] sm:$0xff]  }
 0xed4   :  { %3425 = vmatmul.mubr.bf16.vlgmr.msra.gmra.mrb[56].mxu1 %v3293_v59  ;;  %v5730_v59 = vld [vmem:[#allocation14 + $0x38] sm:$0xff]  }
 0xed5   :  { %3526 = vmatpush1.bf16.msra.mxu1 %v5643_v58  ;;  %3434 = vmatprep.mubr.bf16.mxu1 %v5995_v36  ;;  %v5729_v58 = vld [vmem:[#allocation14 + $0x78] sm:$0xff]  }
 0xed6   :  { %3527 = vmatprep.subr.bf16.mxu1 %v5648_v60  ;;  %v6916_v63 = vpop.f32.mrb[88].mxu0  ;;  %v4040_v60 = vlaneseq }
 0xed7   :  { %v6918_v1 = vpop.f32.mrb[89].mxu0 }
 0xed8   :  { %v6920_v2 = vpop.f32.mrb[90].mxu0 }
 0xed9   :  { %3528 = vmatpush1.bf16.msra.mxu1 %v5646_v61  ;;  %v3649_v4 = vpack.c.bf16 %v6920_v2, %v6916_v63  ;;  %v6927_v5 = vpop.f32.mrb[91].mxu0  ;;  %v4041_v61 = vshrl.u32 %v4040_v60, 7 }
 0xeda   :  { %3529 = vmatprep.subr.bf16.mxu1 %v5651_v62  ;;  %v3648_v7 = vpack.c.bf16 %v6927_v5, %v6918_v1 }
 0xedb   :  { %v4042_v62 = vsub.s32 0, %v4041_v61  ;;  %v4046_v63 = vsub.s32 1, %v4041_v61 }
 0xedc   :  { %3435 = vmatmul.mubr.bf16.gmra.mrb[60].mxu1 %v3294_v56  ;;  %v5727_v56 = vld [vmem:[#allocation14 + $0x70] sm:$0xff]  }
 0xedd   :  { %3530 = vmatpush1.bf16.msra.mxu1 %v5649_v3  ;;  %3557 = vmatprep.mubr.bf16.mxu1 %v5995_v36 }
 0xede   :  { %3531 = vmatprep.subr.bf16.mxu1 %v5654_v6  ;;  %v6941_v10 = vpop.f32.mrb[92].mxu0  ;;  %4970 = vmatprep.subr.bf16.mxu0 %v5727_v56 }
 0xedf   :  { %v6943_v11 = vpop.f32.mrb[93].mxu0  ;;  %4971 = vmatpush3.bf16.msra.mxu0 %v5728_v57 }
 0xee0   :  { %v6945_v12 = vpop.f32.mrb[94].mxu0  ;;  %4972 = vmatprep.subr.bf16.mxu0 %v5729_v58 }
 0xee1   :  { %3532 = vmatpush1.bf16.msra.mxu1 %v5652_v8  ;;  %v3879_v14 = vpack.c.bf16 %v6945_v12, %v6941_v10  ;;  %v6952_v15 = vpop.f32.mrb[95].mxu0 }
 0xee2   :  { %3533 = vmatprep.subr.bf16.mxu1 %v5657_v9  ;;  %v3878_v17 = vpack.c.bf16 %v6952_v15, %v6943_v11 }
 0xee3   :  { %4973 = vmatpush3.bf16.msra.mxu0 %v5730_v59 }
 0xee5   :  { %3534 = vmatpush1.bf16.msra.mxu1 %v5655_v13 }
 0xee6   :  { %3535 = vmatprep.subr.bf16.mxu1 %v5660_v16 }
 0xee9   :  { %3536 = vmatpush1.bf16.msra.mxu1 %v5658_v18 }
 0xeea   :  { %3537 = vmatprep.subr.bf16.mxu1 %v5663_v19 }
 0xeed   :  { %3538 = vmatpush1.bf16.msra.mxu1 %v5661_v20 }
 0xeee   :  { %3539 = vmatprep.subr.bf16.mxu1 %v5666_v21 }
 0xef1   :  { %3540 = vmatpush1.bf16.msra.mxu1 %v5664_v22 }
 0xef2   :  { %3747 = vmatprep.subr.bf16.mxu1 %v5669_v23 }
 0xef4   :  { %3558 = vmatmul.mubr.bf16.vlgmr.msra.gmra.mrb[56].mxu1 %v3205_v0  ;;  %v5706_v0 = vld [vmem:[%s7145_s19 + $0x1d0] ss:$8 sps:$4 sm:$0xff]  }
 0xef5   :  { %3748 = vmatpush1.bf16.msra.mxu1 %v5667_v24  ;;  %3567 = vmatprep.mubr.bf16.mxu1 %v5995_v36 }
 0xef6   :  { %3749 = vmatprep.subr.bf16.mxu1 %v5672_v25 }
 0xef9   :  { %3750 = vmatpush1.bf16.msra.mxu1 %v5670_v26 }
 0xefa   :  { %3751 = vmatprep.subr.bf16.mxu1 %v5675_v27 }
 0xefc   :  { %3568 = vmatmul.mubr.bf16.gmra.mrb[60].mxu1 %v3206_v49  ;;  %v5703_v49 = vld [vmem:[%s7145_s19 + $0x1c0] ss:$8 sps:$4 sm:$0xff]  }
 0xefd   :  { %3752 = vmatpush1.bf16.msra.mxu1 %v5673_v28  ;;  %3779 = vmatprep.mubr.bf16.mxu1 %v5995_v36 }
 0xefe   :  { %3753 = vmatprep.subr.bf16.mxu1 %v5678_v29 }
 0xf01   :  { %3754 = vmatpush1.bf16.msra.mxu1 %v5676_v30 }
 0xf02   :  { %3755 = vmatprep.subr.bf16.mxu1 %v5681_v31 }
 0xf05   :  { %3756 = vmatpush1.bf16.msra.mxu1 %v5679_v32 }
 0xf06   :  { %3757 = vmatprep.subr.bf16.mxu1 %v5684_v33 }
 0xf09   :  { %3758 = vmatpush1.bf16.msra.mxu1 %v5682_v34 }
 0xf0a   :  { %3759 = vmatprep.subr.bf16.mxu1 %v5687_v35 }
 0xf0d   :  { %3760 = vmatpush1.bf16.msra.mxu1 %v5685_v37 }
 0xf0e   :  { %3761 = vmatprep.subr.bf16.mxu1 %v5690_v38 }
 0xf11   :  { %3762 = vmatpush1.bf16.msra.mxu1 %v5688_v39 }
 0xf12   :  { %3977 = vmatprep.subr.bf16.mxu1 %v5693_v40 }
 0xf14   :  { %3780 = vmatmul.mubr.bf16.vlgmr.msra.gmra.mrb[56].mxu1 %v3648_v7 }
 0xf15   :  { %3978 = vmatpush1.bf16.msra.mxu1 %v5691_v41  ;;  %3789 = vmatprep.mubr.bf16.mxu1 %v5995_v36 }
 0xf16   :  { %3979 = vmatprep.subr.bf16.mxu1 %v5696_v42 }
 0xf19   :  { %3980 = vmatpush1.bf16.msra.mxu1 %v5694_v43 }
 0xf1a   :  { %3981 = vmatprep.subr.bf16.mxu1 %v5699_v44 }
 0xf1c   :  { %3790 = vmatmul.mubr.bf16.gmra.mrb[60].mxu1 %v3649_v4 }
 0xf1d   :  { %3982 = vmatpush1.bf16.msra.mxu1 %v5697_v45  ;;  %4009 = vmatprep.mubr.bf16.mxu1 %v5995_v36 }
 0xf1e   :  { %3983 = vmatprep.subr.bf16.mxu1 %v5702_v46 }
 0xf21   :  { %3984 = vmatpush1.bf16.msra.mxu1 %v5700_v47 }
 0xf22   :  { %3985 = vmatprep.subr.bf16.mxu1 %v5705_v48 }
 0xf25   :  { %3986 = vmatpush1.bf16.msra.mxu1 %v5703_v49 }
 0xf26   :  { %3987 = vmatprep.subr.bf16.mxu1 %v5708_v50 }
 0xf29   :  { %3988 = vmatpush1.bf16.msra.mxu1 %v5706_v0 }
 0xf2a   :  { %3989 = vmatprep.subr.bf16.mxu1 %v5711_v51 }
 0xf2d   :  { %3990 = vmatpush1.bf16.msra.mxu1 %v5709_v52 }
 0xf2e   :  { %3991 = vmatprep.subr.bf16.mxu1 %v5714_v53 }
 0xf31   :  { %3992 = vmatpush1.bf16.msra.mxu1 %v5712_v54 }
 0xf34   :  { %4010 = vmatmul.mubr.bf16.vlgmr.msra.gmra.mrb[56].mxu1 %v3878_v17 }
 0xf35   :  { %4019 = vmatprep.mubr.bf16.mxu1 %v5995_v36  ;;  %v4038_v36 = vld [vmem:[%s7146_s20] sm:$0x3]  ;;  %s5996_s20 = smov [#allocation17]  }
 0xf36   :  { %v4043_v1 = vrot.slane %v4038_v36, %v4042_v62  ;;  %v4047_v2 = vrot.slane %v4038_v36, %v4046_v63  ;;  %s4275_s7 = sshll.u32 %s5996_s20, 4  ;;  %s4276_s7 = int_to_ptr.vmem [resolvable:$true] %s4275_s7 }
 0xf37   :  { %s5923_s25 = scalar_lea.vmem %s4276_s7, 512  ;;  %p5928_p9 = scmp.lt.s32.totalorder %s4276_s7, %s4276_s7 }
 0xf38   :  { %p5924_p8 = scmp.ne.s32.totalorder %s4276_s7, %s5923_s25  ;;  %p5929_p10 = scmp.lt.s32.totalorder %s5923_s25, %s5923_s25 }
 0xf3a   :  { %p5930_p11 = por %p5929_p10, %p5928_p9 }
 0xf3c   :  { %4020 = vmatmul.mubr.bf16.gmra.mrb[60].mxu1 %v3879_v14  ;;  %p5931_p12 = pnand %p5930_p11, %p5924_p8 }
0x1007   :  { %v4011_v3 = vpop.f32.mrb[56].mxu1 }
0x1008   :  { %v4050_v4 = vadd.f32 %v4043_v1, %v4011_v3  ;;  %v4013_v5 = vpop.f32.mrb[57].mxu1 }
0x1009   :  { %v4051_v6 = vadd.f32 %v4047_v2, %v4013_v5  ;;  %v4015_v7 = vpop.f32.mrb[58].mxu1 }
0x100a   :  { %v4052_v8 = vadd.f32 %v4043_v1, %v4015_v7  ;;  %v4017_v9 = vpop.f32.mrb[59].mxu1  ;;  %v4058_v11 = vmax.f32 %v4050_v4, 0.0 }
0x100b   :  { %v4053_v10 = vadd.f32 %v4047_v2, %v4017_v9  ;;  %v4059_v13 = vmax.f32 %v4051_v6, 0.0 }
0x100c   :  { %v4060_v12 = vmax.f32 %v4052_v8, 0.0 }
0x100d   :  { %v4061_v14 = vmax.f32 %v4053_v10, 0.0 }
0x100e   :  { %v4066_v15 = vpack.c.bf16 %v4060_v12, %v4058_v11 }
0x100f   :  { %v4067_v16 = vpack.c.bf16 %v4061_v14, %v4059_v13  ;;  %v4021_v17 = vpop.f32.mrb[60].mxu1 }
0x1010   :  { %v4054_v18 = vadd.f32 %v4043_v1, %v4021_v17  ;;  %v4023_v19 = vpop.f32.mrb[61].mxu1 }
0x1011   :  { %v4055_v20 = vadd.f32 %v4047_v2, %v4023_v19  ;;  %v4025_v21 = vpop.f32.mrb[62].mxu1  ;;  %4237 = vmatprep.mubr.bf16.mxu0 %v4067_v16 }
0x1012   :  { %v4056_v22 = vadd.f32 %v4043_v1, %v4025_v21  ;;  %v4027_v23 = vpop.f32.mrb[63].mxu1  ;;  %4238 = vmatmul.mubr.bf16.vlgmr.msra.gmra.mrb[96].mxu0 %v4066_v15  ;;  %v4062_v25 = vmax.f32 %v4054_v18, 0.0 }
0x1013   :  { %v4057_v24 = vadd.f32 %v4047_v2, %v4027_v23  ;;  %v4063_v27 = vmax.f32 %v4055_v20, 0.0 }
0x1014   :  { %v4064_v26 = vmax.f32 %v4056_v22, 0.0 }
0x1015   :  { %v4065_v28 = vmax.f32 %v4057_v24, 0.0 }
0x1016   :  { %v4068_v29 = vpack.c.bf16 %v4064_v26, %v4062_v25 }
0x1017   :  { %v4069_v30 = vpack.c.bf16 %v4065_v28, %v4063_v27 }
0x1019   :  { %4245 = vmatprep.mubr.bf16.mxu0 %v4069_v30 }
0x101a   :  { %4246 = vmatmul.mubr.bf16.gmra.mrb[100].mxu0 %v4068_v29 }
0x101b   :  { %5934 = shalt.err (!%p5931_p12)
}
0x101c   :  { %s7183_s26 = sld [smem:[#allocation37_spill]] }
0x1022   :  { %s5935_s21 = scalar_lea.hbm %s7183_s26, 512 }
0x1023   :  { %p5936_p13 = scmp.ne.s32.totalorder %s7183_s26, %s5935_s21  ;;  %p5939_p0 = scmp.lt.u32.totalorder %s5935_s21, %s7183_s26 }
0x1025   :  { %p5941_p1 = pnand %p5939_p0, %p5936_p13 }
0x1027   :  { %5944 = shalt.err (!%p5941_p1)
}
0x1028   :  { %4281 = dma.vmem_to_hbm [thread:$0]  %s4276_s7, 512, %s7183_s26, [#allocation18], %s7176_s2, %s7176_s2, %s5983_s8  }
0x1029   :  { %s7184_s13 = sld [smem:[#allocation35_spill]]  ;;  %s5997_s27 = smov [#allocation16]  }
0x102a   :  { %s4263_s16 = sshll.u32 %s5997_s27, 4  ;;  %s4264_s16 = int_to_ptr.vmem [resolvable:$true] %s4263_s16 }
0x102b   :  { %s5945_s22 = scalar_lea.vmem %s4264_s16, 512  ;;  %p5950_p3 = scmp.lt.s32.totalorder %s4264_s16, %s4264_s16 }
0x102c   :  { %p5946_p2 = scmp.ne.s32.totalorder %s4264_s16, %s5945_s22  ;;  %p5951_p4 = scmp.lt.s32.totalorder %s5945_s22, %s5945_s22 }
0x102e   :  { %p5952_p5 = por %p5951_p4, %p5950_p3 }
0x102f   :  { %v4753_v32 = vld [vmem:[%s7184_s13] ss:$0 sm:$0xff] }
0x1030   :  { %p5953_p6 = pnand %p5952_p5, %p5946_p2 }
0x10e5   :  { %v4974_v31 = vpop.f32.mrb[96].mxu0 }
0x10e6   :  { %v4975_v33 = vpop.f32.mrb[97].mxu0 }
0x10e7   :  { %v4976_v34 = vadd.f32 %v4975_v33, %v4974_v31  ;;  %v4977_v35 = vpop.f32.mrb[98].mxu0 }
0x10e8   :  { %v4978_v37 = vpop.f32.mrb[99].mxu0 }
0x10e9   :  { %v4240_v38 = vadd.f32 %v4976_v34, %v4753_v32  ;;  %v4979_v39 = vadd.f32 %v4978_v37, %v4977_v35 }
0x10eb   :  { %4254 = vst [vmem:[#allocation16] sm:$0xff] %v4240_v38  ;;  %v4243_v40 = vadd.f32 %v4979_v39, %v4753_v32 }
0x10ed   :  { %4255 = vst [vmem:[#allocation16 + $0x8] sm:$0xff] %v4243_v40  ;;  %v4980_v41 = vpop.f32.mrb[100].mxu0 }
0x10ee   :  { %v4981_v42 = vpop.f32.mrb[101].mxu0 }
0x10ef   :  { %v4982_v43 = vadd.f32 %v4981_v42, %v4980_v41  ;;  %v4983_v44 = vpop.f32.mrb[102].mxu0 }
0x10f0   :  { %v4984_v45 = vpop.f32.mrb[103].mxu0 }
0x10f1   :  { %v4248_v46 = vadd.f32 %v4982_v43, %v4753_v32  ;;  %v4985_v47 = vadd.f32 %v4984_v45, %v4983_v44 }
0x10f3   :  { %4256 = vst [vmem:[#allocation16 + $0x10] sm:$0xff] %v4248_v46  ;;  %v4251_v48 = vadd.f32 %v4985_v47, %v4753_v32 }
0x10f5   :  { %4257 = vst [vmem:[#allocation16 + $0x18] sm:$0xff] %v4251_v48 }
0x10f6   :  { %5956 = shalt.err (!%p5953_p6)
}
0x10f7   :  { %s7185_s1 = sld [smem:[#allocation36_spill]] }
0x10fd   :  { %s5957_s23 = scalar_lea.hbm %s7185_s1, 512 }
0x10fe   :  { %p5958_p7 = scmp.ne.s32.totalorder %s7185_s1, %s5957_s23  ;;  %p5961_p8 = scmp.lt.u32.totalorder %s5957_s23, %s7185_s1 }
0x1100   :  { %p5963_p9 = pnand %p5961_p8, %p5958_p7 }
0x1102   :  { %5966 = shalt.err (!%p5963_p9)
}
0x1103   :  { %4269 = dma.vmem_to_hbm [thread:$0]  %s4264_s16, 512, %s7185_s1, [#allocation4], %s7176_s2, %s7176_s2, %s5983_s8  }
0x1104   :  { %5977 = dma.done.wait [#allocation4], 512  }
0x1105   :  { %5978 = vsyncadd [#allocation4], 4294966784 }
0x1106   :  { %5979 = dma.done.wait [#allocation18], 512  }
0x1107   :  { %5980 = vsyncadd [#allocation18], 4294966784 }
0x1108   :  { %4288 = vsyncpa [#allocation3], 1 }
0x1109   :  { %4289 = vsyncpa [#allocation6], 1 }
0x110a   :  { %4290 = vsyncpa [#allocation9], 1 }
0x110b   :  { %4291 = vsyncpa [#allocation12], 1 }
0x110c   :  { %4292 = vsyncpa [#allocation15], 1 }
0x110d   :  { %4293 = vsyncpa [#allocation4], 1 }
0x110e   :  { %4294 = vsyncpa [#allocation18], 1 }

</bundles_post_ra>
